<compile_context>
chip_gen: v7x
topology: tpu7x:2x2x1
jax: 0.10.0
libtpu: 0.0.40
codegen_flags: <defaults>
</compile_context>

<pallas_src>
import jax
import jax.numpy as jnp
from jax.experimental import pallas as pl
from jax.experimental.pallas import tpu as pltpu

# ----------------------------- configuration -----------------------------
N, H, W = 2, 16, 16
C_IN, C_OUT = 16, 16
KSIZE, STRIDE = 3, 1
EXPAND_RATIO = 4.0
SE_RATIO = 0.5
BN_EPS = 1e-3
HW = H * W
PAD = KSIZE // 2
W_SHIFT = W.bit_length() - 1
assert (1 << W_SHIFT) == W, "W must be a power of two for the lane index math"


def _round_to_8(val):
    round_up_bias = 0.9
    round_up_to = 8
    new_val = max(round_up_to, int(val + round_up_to / 2) // round_up_to * round_up_to)
    return int(new_val if new_val >= round_up_bias * val else new_val + round_up_to)


C_MID = _round_to_8(C_IN * EXPAND_RATIO)          # 64
C_SE = int(SE_RATIO * C_IN)                       # 8
APPLY_RESIDUAL = (C_IN == C_OUT) and (STRIDE == 1)


# ------------------------------ fused Pallas kernel ------------------------------
def _mbconv_kernel(x_ref, w_exp_ref, b1_ref, w_dw_ref, b2_ref,
                   w_se_r_ref, b_se_r_ref, w_se_e_ref, b_se_e_ref,
                   w_proj_ref, b3_ref, o_ref):
    x = x_ref[0]                                                   # (C_IN, HW) f32, NCHW-native

    # ---- expand 1x1 conv (BN folded) + swish, channel-major ------------------
    y = jnp.dot(w_exp_ref[...], x.astype(jnp.bfloat16),
                preferred_element_type=jnp.float32)                # (C_MID, HW)
    y = y + b1_ref[...]                                            # (C_MID, 1) bias column
    y = y * jax.nn.sigmoid(y)                                      # swish (f32, v5e-safe)

    # ---- depthwise 3x3 'same' via lane-axis rolls (XLU) + boundary masks -----
    lane = jax.lax.broadcasted_iota(jnp.int32, (1, HW), 1)
    w_idx = jnp.bitwise_and(lane, W - 1)                           # column within row
    h_idx = jnp.right_shift(lane, W_SHIFT)                         # row index
    m_h = {-1: h_idx >= 1, 0: None, 1: h_idx <= H - 2}
    m_w = {-1: w_idx >= 1, 0: None, 1: w_idx <= W - 2}

    acc = None
    for kh in range(KSIZE):
        for kw in range(KSIZE):
            dh, dw = kh - PAD, kw - PAD
            if dh == 0 and dw == 0:
                t = y                                              # center tap: no shift, no mask
            else:
                shift = (-(dh * W + dw)) % HW                      # rolled[i] = y[i + dh*W + dw]
                t = pltpu.roll(y, shift, 1)
                mask = m_h[dh]
                if m_w[dw] is not None:
                    mask = m_w[dw] if mask is None else jnp.logical_and(mask, m_w[dw])
                t = jnp.where(mask, t, 0.0)                        # zero the wrapped border taps
            idx = kh * KSIZE + kw
            term = t * w_dw_ref[:, idx:idx + 1]                    # per-channel tap weight column
            acc = term if acc is None else acc + term
    d = acc + b2_ref[...]
    d = d * jax.nn.sigmoid(d)                                      # (C_MID, HW) f32
    d_bf = d.astype(jnp.bfloat16)                                  # bf16 copy for both matmuls

    # ---- squeeze-excite (row-oriented; gate folded into projection weight) ---
    ones_row = jnp.ones((1, HW), jnp.bfloat16)
    pooled = jax.lax.dot_general(                                  # mean over HW -> (1, C_MID)
        ones_row, d_bf, (((1,), (1,)), ((), ())),
        preferred_element_type=jnp.float32) * (1.0 / float(HW))
    r = jnp.dot(pooled, w_se_r_ref[...], preferred_element_type=jnp.float32) + b_se_r_ref[...]
    r = r * jax.nn.sigmoid(r)                                      # (1, C_SE)
    g = jax.nn.sigmoid(
        jnp.dot(r, w_se_e_ref[...], preferred_element_type=jnp.float32) + b_se_e_ref[...]
    )                                                              # (1, C_MID)

    # ---- project 1x1 conv (BN folded); gate folded into the (16,64) weight ---
    wg = (w_proj_ref[...] * g).astype(jnp.bfloat16)                # (C_OUT, C_MID)
    out = jnp.dot(wg, d_bf, preferred_element_type=jnp.float32)    # (C_OUT, HW), lane-dense
    out = out + b3_ref[...]                                        # (C_OUT, 1) bias column
    if APPLY_RESIDUAL:
        out = out + x                                              # residual already channel-major
    o_ref[0] = out


# ------------------------------ wrapper ------------------------------
def inverted_residual(x_nchw, kp):
    x_chw = x_nchw.reshape(N, C_IN, HW)                            # free reshape, no transpose

    full2 = lambda n: (0, 0)
    per_img = lambda n: (n, 0, 0)

    out = pl.pallas_call(
        _mbconv_kernel,
        out_shape=jax.ShapeDtypeStruct((N, C_OUT, HW), jnp.float32),
        grid=(N,),
        in_specs=[
            pl.BlockSpec((1, C_IN, HW), per_img),          # x (channel-major)
            pl.BlockSpec((C_MID, C_IN), full2),            # w_exp^T (folded, bf16)
            pl.BlockSpec((C_MID, 1), full2),               # bias1 column
            pl.BlockSpec((C_MID, KSIZE * KSIZE), full2),   # depthwise taps (folded)
            pl.BlockSpec((C_MID, 1), full2),               # bias2 column
            pl.BlockSpec((C_MID, C_SE), full2),            # w_se_r
            pl.BlockSpec((1, C_SE), full2),                # b_se_r row
            pl.BlockSpec((C_SE, C_MID), full2),            # w_se_e
            pl.BlockSpec((1, C_MID), full2),               # b_se_e row
            pl.BlockSpec((C_OUT, C_MID), full2),           # w_proj^T (folded, f32)
            pl.BlockSpec((C_OUT, 1), full2),               # bias3 column
        ],
        out_specs=pl.BlockSpec((1, C_OUT, HW), per_img),
        compiler_params=pltpu.CompilerParams(dimension_semantics=("parallel",)),
    )(x_chw,
      kp["w_exp_f"], kp["b1"], kp["w_dw_f"], kp["b2"],
      kp["w_se_r"], kp["b_se_r"], kp["w_se_e"], kp["b_se_e"],
      kp["w_proj_f"], kp["b3"])

    return out.reshape(N, C_OUT, H, W)                             # free reshape, already NCHW


# ------------------------------ parameters ------------------------------
def _fold_bn(gamma, beta, mean, var):
    scale = gamma / jnp.sqrt(var + BN_EPS)
    bias = beta - mean * scale
    return scale, bias


def init_params(key):
    ks = jax.random.split(key, 20)
    p = {}
    p["w_exp"] = jax.random.normal(ks[0], (C_IN, C_MID), jnp.float32) / jnp.sqrt(C_IN)
    p["scale1"], p["bias1"] = _fold_bn(
        1.0 + 0.1 * jax.random.normal(ks[1], (C_MID,)),
        0.1 * jax.random.normal(ks[2], (C_MID,)),
        0.1 * jax.random.normal(ks[3], (C_MID,)),
        jax.random.uniform(ks[4], (C_MID,), minval=0.5, maxval=1.5))
    p["w_dw"] = 0.2 * jax.random.normal(ks[5], (KSIZE, KSIZE, C_MID), jnp.float32)
    p["scale2"], p["bias2"] = _fold_bn(
        1.0 + 0.1 * jax.random.normal(ks[6], (C_MID,)),
        0.1 * jax.random.normal(ks[7], (C_MID,)),
        0.1 * jax.random.normal(ks[8], (C_MID,)),
        jax.random.uniform(ks[9], (C_MID,), minval=0.5, maxval=1.5))
    p["w_se_r"] = jax.random.normal(ks[10], (C_MID, C_SE), jnp.float32) / jnp.sqrt(C_MID)
    p["b_se_r"] = 0.1 * jax.random.normal(ks[11], (C_SE,), jnp.float32)
    p["w_se_e"] = jax.random.normal(ks[12], (C_SE, C_MID), jnp.float32) / jnp.sqrt(C_SE)
    p["b_se_e"] = 0.1 * jax.random.normal(ks[13], (C_MID,), jnp.float32)
    p["w_proj"] = jax.random.normal(ks[14], (C_MID, C_OUT), jnp.float32) / jnp.sqrt(C_MID)
    p["scale3"], p["bias3"] = _fold_bn(
        1.0 + 0.1 * jax.random.normal(ks[15], (C_OUT,)),
        0.1 * jax.random.normal(ks[16], (C_OUT,)),
        0.1 * jax.random.normal(ks[17], (C_OUT,)),
        jax.random.uniform(ks[18], (C_OUT,), minval=0.5, maxval=1.5))
    return p


def fold_params(p):
    """Host-side, once: fold BN scales into conv weights; channel-major layouts."""
    kp = {}
    kp["w_exp_f"] = jnp.transpose(p["w_exp"] * p["scale1"][None, :]).astype(jnp.bfloat16)  # (C_MID, C_IN)
    kp["b1"] = p["bias1"][:, None].astype(jnp.float32)                                     # (C_MID, 1)
    kp["w_dw_f"] = jnp.transpose(
        (p["w_dw"] * p["scale2"][None, None, :]).reshape(KSIZE * KSIZE, C_MID)
    ).astype(jnp.float32)                                                                   # (C_MID, 9)
    kp["b2"] = p["bias2"][:, None].astype(jnp.float32)                                      # (C_MID, 1)
    kp["w_se_r"] = p["w_se_r"].astype(jnp.float32)                                          # (C_MID, C_SE)
    kp["b_se_r"] = p["b_se_r"][None, :].astype(jnp.float32)                                 # (1, C_SE)
    kp["w_se_e"] = p["w_se_e"].astype(jnp.float32)                                          # (C_SE, C_MID)
    kp["b_se_e"] = p["b_se_e"][None, :].astype(jnp.float32)                                 # (1, C_MID)
    kp["w_proj_f"] = jnp.transpose(p["w_proj"] * p["scale3"][None, :]).astype(jnp.float32)  # (C_OUT, C_MID)
    kp["b3"] = p["bias3"][:, None].astype(jnp.float32)                                      # (C_OUT, 1)
    return kp


# ------------------------------ pure-JAX reference ------------------------------
def reference_nhwc(x, p):
    y = jnp.einsum("nhwc,cd->nhwd", x, p["w_exp"])
    y = y * p["scale1"] + p["bias1"]
    y = y * jax.nn.sigmoid(y)
    yp = jnp.pad(y, ((0, 0), (PAD, PAD), (PAD, PAD), (0, 0)))
    acc = jnp.zeros_like(y)
    for kh in range(KSIZE):
        for kw in range(KSIZE):
            acc = acc + yp[:, kh:kh + H, kw:kw + W, :] * p["w_dw"][kh, kw]
    d = acc * p["scale2"] + p["bias2"]
    d = d * jax.nn.sigmoid(d)
    pooled = d.mean(axis=(1, 2))
    r = pooled @ p["w_se_r"] + p["b_se_r"]
    r = r * jax.nn.sigmoid(r)
    g = jax.nn.sigmoid(r @ p["w_se_e"] + p["b_se_e"])
    z = d * g[:, None, None, :]
    o = jnp.einsum("nhwc,cd->nhwd", z, p["w_proj"])
    o = o * p["scale3"] + p["bias3"]
    if APPLY_RESIDUAL:
        o = o + x
    return o


# ------------------------------ main ------------------------------
if __name__ == "__main__":
    key = jax.random.PRNGKey(0)
    k_x, k_p = jax.random.split(key)
    x_nchw = jax.random.normal(k_x, (N, C_IN, H, W), jnp.float32)   # PyTorch NCHW input
    params = init_params(k_p)
    kparams = fold_params(params)

    fwd = jax.jit(inverted_residual)
    out_nchw = jax.block_until_ready(fwd(x_nchw, kparams))
    assert out_nchw.shape == (N, C_OUT, H, W) and out_nchw.dtype == jnp.float32

    ref_nchw = jnp.transpose(
        reference_nhwc(jnp.transpose(x_nchw, (0, 2, 3, 1)), params), (0, 3, 1, 2))
    max_err = float(jnp.max(jnp.abs(out_nchw - ref_nchw)))
    assert jnp.allclose(out_nchw, ref_nchw, atol=3e-2, rtol=3e-2), max_err

    print("KERNEL_OK")
</pallas_src>

<mosaic_0001>
module attributes {stable_mosaic.version = 11 : i64} {
  func.func @_mbconv_kernel(%arg0: i32, %arg1: memref<1x16x256xf32, #tpu.memory_space<vmem>>, %arg2: memref<64x16xbf16, #tpu.memory_space<vmem>>, %arg3: memref<64x1xf32, #tpu.memory_space<vmem>>, %arg4: memref<64x9xf32, #tpu.memory_space<vmem>>, %arg5: memref<64x1xf32, #tpu.memory_space<vmem>>, %arg6: memref<64x8xf32, #tpu.memory_space<vmem>>, %arg7: memref<1x8xf32, #tpu.memory_space<vmem>>, %arg8: memref<8x64xf32, #tpu.memory_space<vmem>>, %arg9: memref<1x64xf32, #tpu.memory_space<vmem>>, %arg10: memref<16x64xf32, #tpu.memory_space<vmem>>, %arg11: memref<16x1xf32, #tpu.memory_space<vmem>>, %arg12: memref<1x16x256xf32, #tpu.memory_space<vmem>>) attributes {dimension_semantics = [#tpu.dimension_semantics<parallel>], iteration_bounds = array<i64: 2>, scalar_prefetch = 0 : i64, scratch_operands = 0 : i64, tpu.core_type = #tpu.core_type<tc>, window_params = [{transform_indices = @transform_0, window_bounds = array<i64: 1, 16, 256>}, {pipeline_mode = #tpu.pipeline_mode<synchronous>, transform_indices = @transform_1, window_bounds = array<i64: 64, 16>}, {pipeline_mode = #tpu.pipeline_mode<synchronous>, transform_indices = @transform_2, window_bounds = array<i64: 64, 1>}, {pipeline_mode = #tpu.pipeline_mode<synchronous>, transform_indices = @transform_3, window_bounds = array<i64: 64, 9>}, {pipeline_mode = #tpu.pipeline_mode<synchronous>, transform_indices = @transform_4, window_bounds = array<i64: 64, 1>}, {pipeline_mode = #tpu.pipeline_mode<synchronous>, transform_indices = @transform_5, window_bounds = array<i64: 64, 8>}, {pipeline_mode = #tpu.pipeline_mode<synchronous>, transform_indices = @transform_6, window_bounds = array<i64: 1, 8>}, {pipeline_mode = #tpu.pipeline_mode<synchronous>, transform_indices = @transform_7, window_bounds = array<i64: 8, 64>}, {pipeline_mode = #tpu.pipeline_mode<synchronous>, transform_indices = @transform_8, window_bounds = array<i64: 1, 64>}, {pipeline_mode = #tpu.pipeline_mode<synchronous>, transform_indices = @transform_9, window_bounds = array<i64: 16, 64>}, {pipeline_mode = #tpu.pipeline_mode<synchronous>, transform_indices = @transform_10, window_bounds = array<i64: 16, 1>}, {transform_indices = @transform_11, window_bounds = array<i64: 1, 16, 256>}]} {
    %c0 = arith.constant 0 : index
    %c0_0 = arith.constant 0 : index
    %c0_1 = arith.constant 0 : index
    %0 = vector.load %arg1[%c0, %c0_0, %c0_1] : memref<1x16x256xf32, #tpu.memory_space<vmem>>, vector<1x16x256xf32>
    %1 = vector.shape_cast %0 : vector<1x16x256xf32> to vector<16x256xf32>
    %c0_2 = arith.constant 0 : index
    %c0_3 = arith.constant 0 : index
    %2 = vector.load %arg2[%c0_2, %c0_3] : memref<64x16xbf16, #tpu.memory_space<vmem>>, vector<64x16xbf16>
    %3 = arith.truncf %1 : vector<16x256xf32> to vector<16x256xbf16>
    %cst = arith.constant dense<0.000000e+00> : vector<64x256xf32>
    %4 = tpu.matmul %2, %3, %cst {dimension_numbers = #tpu.dot_dimension_numbers<[1], [0], [0], [1], [0, 0, 1, 1], [], []>} : vector<64x16xbf16>, vector<16x256xbf16>, vector<64x256xf32> -> vector<64x256xf32>
    %c0_4 = arith.constant 0 : index
    %c0_5 = arith.constant 0 : index
    %5 = vector.load %arg3[%c0_4, %c0_5] : memref<64x1xf32, #tpu.memory_space<vmem>>, vector<64x1xf32>
    %6 = vector.broadcast %5 : vector<64x1xf32> to vector<64x256xf32>
    %7 = arith.addf %4, %6 : vector<64x256xf32>
    %8 = arith.negf %7 : vector<64x256xf32>
    %9 = math.exp %8 : vector<64x256xf32>
    %cst_6 = arith.constant 1.000000e+00 : f32
    %10 = vector.broadcast %cst_6 : f32 to vector<64x256xf32>
    %11 = arith.addf %10, %9 : vector<64x256xf32>
    %12 = arith.divf %10, %11 : vector<64x256xf32>
    %13 = arith.mulf %7, %12 : vector<64x256xf32>
    %14 = tpu.iota {dimensions = array<i32: 1>} : vector<1x256xi32>
    %c15_i32 = arith.constant 15 : i32
    %15 = vector.broadcast %c15_i32 : i32 to vector<1x256xi32>
    %16 = arith.andi %14, %15 : vector<1x256xi32>
    %c4_i32 = arith.constant 4 : i32
    %17 = vector.broadcast %c4_i32 : i32 to vector<1x256xi32>
    %18 = arith.shrsi %14, %17 : vector<1x256xi32>
    %c1_i32 = arith.constant 1 : i32
    %19 = vector.broadcast %c1_i32 : i32 to vector<1x256xi32>
    %20 = arith.cmpi sge, %18, %19 : vector<1x256xi32>
    %c14_i32 = arith.constant 14 : i32
    %21 = vector.broadcast %c14_i32 : i32 to vector<1x256xi32>
    %22 = arith.cmpi sle, %18, %21 : vector<1x256xi32>
    %c1_i32_7 = arith.constant 1 : i32
    %23 = vector.broadcast %c1_i32_7 : i32 to vector<1x256xi32>
    %24 = arith.cmpi sge, %16, %23 : vector<1x256xi32>
    %c14_i32_8 = arith.constant 14 : i32
    %25 = vector.broadcast %c14_i32_8 : i32 to vector<1x256xi32>
    %26 = arith.cmpi sle, %16, %25 : vector<1x256xi32>
    %c17_i32 = arith.constant 17 : i32
    %27 = tpu.dynamic_rotate %13 by %c17_i32 dim 1 : vector<64x256xf32>, i32 -> vector<64x256xf32>
    %28 = arith.andi %20, %24 : vector<1x256xi1>
    %cst_9 = arith.constant 0.000000e+00 : f32
    %29 = vector.shape_cast %28 : vector<1x256xi1> to vector<1x256xi1>
    %30 = vector.broadcast %29 : vector<1x256xi1> to vector<64x256xi1>
    %31 = vector.broadcast %cst_9 : f32 to vector<64x256xf32>
    %32 = arith.select %30, %27, %31 : vector<64x256xi1>, vector<64x256xf32>
    %c0_10 = arith.constant 0 : index
    %c0_11 = arith.constant 0 : index
    %33 = vector.load %arg4[%c0_10, %c0_11] : memref<64x9xf32, #tpu.memory_space<vmem>>, vector<64x1xf32>
    %34 = vector.broadcast %33 : vector<64x1xf32> to vector<64x256xf32>
    %35 = arith.mulf %32, %34 : vector<64x256xf32>
    %c16_i32 = arith.constant 16 : i32
    %36 = tpu.dynamic_rotate %13 by %c16_i32 dim 1 : vector<64x256xf32>, i32 -> vector<64x256xf32>
    %cst_12 = arith.constant 0.000000e+00 : f32
    %37 = vector.shape_cast %20 : vector<1x256xi1> to vector<1x256xi1>
    %38 = vector.broadcast %37 : vector<1x256xi1> to vector<64x256xi1>
    %39 = vector.broadcast %cst_12 : f32 to vector<64x256xf32>
    %40 = arith.select %38, %36, %39 : vector<64x256xi1>, vector<64x256xf32>
    %c0_13 = arith.constant 0 : index
    %c1 = arith.constant 1 : index
    %41 = vector.load %arg4[%c0_13, %c1] : memref<64x9xf32, #tpu.memory_space<vmem>>, vector<64x1xf32>
    %42 = vector.broadcast %41 : vector<64x1xf32> to vector<64x256xf32>
    %43 = arith.mulf %40, %42 : vector<64x256xf32>
    %44 = arith.addf %35, %43 : vector<64x256xf32>
    %c15_i32_14 = arith.constant 15 : i32
    %45 = tpu.dynamic_rotate %13 by %c15_i32_14 dim 1 : vector<64x256xf32>, i32 -> vector<64x256xf32>
    %46 = arith.andi %20, %26 : vector<1x256xi1>
    %cst_15 = arith.constant 0.000000e+00 : f32
    %47 = vector.shape_cast %46 : vector<1x256xi1> to vector<1x256xi1>
    %48 = vector.broadcast %47 : vector<1x256xi1> to vector<64x256xi1>
    %49 = vector.broadcast %cst_15 : f32 to vector<64x256xf32>
    %50 = arith.select %48, %45, %49 : vector<64x256xi1>, vector<64x256xf32>
    %c0_16 = arith.constant 0 : index
    %c2 = arith.constant 2 : index
    %51 = vector.load %arg4[%c0_16, %c2] : memref<64x9xf32, #tpu.memory_space<vmem>>, vector<64x1xf32>
    %52 = vector.broadcast %51 : vector<64x1xf32> to vector<64x256xf32>
    %53 = arith.mulf %50, %52 : vector<64x256xf32>
    %54 = arith.addf %44, %53 : vector<64x256xf32>
    %c1_i32_17 = arith.constant 1 : i32
    %55 = tpu.dynamic_rotate %13 by %c1_i32_17 dim 1 : vector<64x256xf32>, i32 -> vector<64x256xf32>
    %cst_18 = arith.constant 0.000000e+00 : f32
    %56 = vector.shape_cast %24 : vector<1x256xi1> to vector<1x256xi1>
    %57 = vector.broadcast %56 : vector<1x256xi1> to vector<64x256xi1>
    %58 = vector.broadcast %cst_18 : f32 to vector<64x256xf32>
    %59 = arith.select %57, %55, %58 : vector<64x256xi1>, vector<64x256xf32>
    %c0_19 = arith.constant 0 : index
    %c3 = arith.constant 3 : index
    %60 = vector.load %arg4[%c0_19, %c3] : memref<64x9xf32, #tpu.memory_space<vmem>>, vector<64x1xf32>
    %61 = vector.broadcast %60 : vector<64x1xf32> to vector<64x256xf32>
    %62 = arith.mulf %59, %61 : vector<64x256xf32>
    %63 = arith.addf %54, %62 : vector<64x256xf32>
    %c0_20 = arith.constant 0 : index
    %c4 = arith.constant 4 : index
    %64 = vector.load %arg4[%c0_20, %c4] : memref<64x9xf32, #tpu.memory_space<vmem>>, vector<64x1xf32>
    %65 = vector.broadcast %64 : vector<64x1xf32> to vector<64x256xf32>
    %66 = arith.mulf %13, %65 : vector<64x256xf32>
    %67 = arith.addf %63, %66 : vector<64x256xf32>
    %c255_i32 = arith.constant 255 : i32
    %68 = tpu.dynamic_rotate %13 by %c255_i32 dim 1 : vector<64x256xf32>, i32 -> vector<64x256xf32>
    %cst_21 = arith.constant 0.000000e+00 : f32
    %69 = vector.shape_cast %26 : vector<1x256xi1> to vector<1x256xi1>
    %70 = vector.broadcast %69 : vector<1x256xi1> to vector<64x256xi1>
    %71 = vector.broadcast %cst_21 : f32 to vector<64x256xf32>
    %72 = arith.select %70, %68, %71 : vector<64x256xi1>, vector<64x256xf32>
    %c0_22 = arith.constant 0 : index
    %c5 = arith.constant 5 : index
    %73 = vector.load %arg4[%c0_22, %c5] : memref<64x9xf32, #tpu.memory_space<vmem>>, vector<64x1xf32>
    %74 = vector.broadcast %73 : vector<64x1xf32> to vector<64x256xf32>
    %75 = arith.mulf %72, %74 : vector<64x256xf32>
    %76 = arith.addf %67, %75 : vector<64x256xf32>
    %c241_i32 = arith.constant 241 : i32
    %77 = tpu.dynamic_rotate %13 by %c241_i32 dim 1 : vector<64x256xf32>, i32 -> vector<64x256xf32>
    %78 = arith.andi %22, %24 : vector<1x256xi1>
    %cst_23 = arith.constant 0.000000e+00 : f32
    %79 = vector.shape_cast %78 : vector<1x256xi1> to vector<1x256xi1>
    %80 = vector.broadcast %79 : vector<1x256xi1> to vector<64x256xi1>
    %81 = vector.broadcast %cst_23 : f32 to vector<64x256xf32>
    %82 = arith.select %80, %77, %81 : vector<64x256xi1>, vector<64x256xf32>
    %c0_24 = arith.constant 0 : index
    %c6 = arith.constant 6 : index
    %83 = vector.load %arg4[%c0_24, %c6] : memref<64x9xf32, #tpu.memory_space<vmem>>, vector<64x1xf32>
    %84 = vector.broadcast %83 : vector<64x1xf32> to vector<64x256xf32>
    %85 = arith.mulf %82, %84 : vector<64x256xf32>
    %86 = arith.addf %76, %85 : vector<64x256xf32>
    %c240_i32 = arith.constant 240 : i32
    %87 = tpu.dynamic_rotate %13 by %c240_i32 dim 1 : vector<64x256xf32>, i32 -> vector<64x256xf32>
    %cst_25 = arith.constant 0.000000e+00 : f32
    %88 = vector.shape_cast %22 : vector<1x256xi1> to vector<1x256xi1>
    %89 = vector.broadcast %88 : vector<1x256xi1> to vector<64x256xi1>
    %90 = vector.broadcast %cst_25 : f32 to vector<64x256xf32>
    %91 = arith.select %89, %87, %90 : vector<64x256xi1>, vector<64x256xf32>
    %c0_26 = arith.constant 0 : index
    %c7 = arith.constant 7 : index
    %92 = vector.load %arg4[%c0_26, %c7] : memref<64x9xf32, #tpu.memory_space<vmem>>, vector<64x1xf32>
    %93 = vector.broadcast %92 : vector<64x1xf32> to vector<64x256xf32>
    %94 = arith.mulf %91, %93 : vector<64x256xf32>
    %95 = arith.addf %86, %94 : vector<64x256xf32>
    %c239_i32 = arith.constant 239 : i32
    %96 = tpu.dynamic_rotate %13 by %c239_i32 dim 1 : vector<64x256xf32>, i32 -> vector<64x256xf32>
    %97 = arith.andi %22, %26 : vector<1x256xi1>
    %cst_27 = arith.constant 0.000000e+00 : f32
    %98 = vector.shape_cast %97 : vector<1x256xi1> to vector<1x256xi1>
    %99 = vector.broadcast %98 : vector<1x256xi1> to vector<64x256xi1>
    %100 = vector.broadcast %cst_27 : f32 to vector<64x256xf32>
    %101 = arith.select %99, %96, %100 : vector<64x256xi1>, vector<64x256xf32>
    %c0_28 = arith.constant 0 : index
    %c8 = arith.constant 8 : index
    %102 = vector.load %arg4[%c0_28, %c8] : memref<64x9xf32, #tpu.memory_space<vmem>>, vector<64x1xf32>
    %103 = vector.broadcast %102 : vector<64x1xf32> to vector<64x256xf32>
    %104 = arith.mulf %101, %103 : vector<64x256xf32>
    %105 = arith.addf %95, %104 : vector<64x256xf32>
    %c0_29 = arith.constant 0 : index
    %c0_30 = arith.constant 0 : index
    %106 = vector.load %arg5[%c0_29, %c0_30] : memref<64x1xf32, #tpu.memory_space<vmem>>, vector<64x1xf32>
    %107 = vector.broadcast %106 : vector<64x1xf32> to vector<64x256xf32>
    %108 = arith.addf %105, %107 : vector<64x256xf32>
    %109 = arith.negf %108 : vector<64x256xf32>
    %110 = math.exp %109 : vector<64x256xf32>
    %cst_31 = arith.constant 1.000000e+00 : f32
    %111 = vector.broadcast %cst_31 : f32 to vector<64x256xf32>
    %112 = arith.addf %111, %110 : vector<64x256xf32>
    %113 = arith.divf %111, %112 : vector<64x256xf32>
    %114 = arith.mulf %108, %113 : vector<64x256xf32>
    %115 = arith.truncf %114 : vector<64x256xf32> to vector<64x256xbf16>
    %cst_32 = arith.constant 1.000000e+00 : bf16
    %116 = vector.broadcast %cst_32 : bf16 to vector<1x256xbf16>
    %cst_33 = arith.constant dense<0.000000e+00> : vector<1x64xf32>
    %117 = tpu.matmul %116, %115, %cst_33 {dimension_numbers = #tpu.dot_dimension_numbers<[1], [1], [0], [0], [0, 0, 1, 0], [], []>} : vector<1x256xbf16>, vector<64x256xbf16>, vector<1x64xf32> -> vector<1x64xf32>
    %cst_34 = arith.constant 3.906250e-03 : f32
    %118 = vector.broadcast %cst_34 : f32 to vector<1x64xf32>
    %119 = arith.mulf %117, %118 : vector<1x64xf32>
    %c0_35 = arith.constant 0 : index
    %c0_36 = arith.constant 0 : index
    %120 = vector.load %arg6[%c0_35, %c0_36] : memref<64x8xf32, #tpu.memory_space<vmem>>, vector<64x8xf32>
    %cst_37 = arith.constant dense<0.000000e+00> : vector<1x8xf32>
    %121 = tpu.matmul %119, %120, %cst_37 {dimension_numbers = #tpu.dot_dimension_numbers<[1], [0], [0], [1], [0, 0, 1, 1], [], []>} : vector<1x64xf32>, vector<64x8xf32>, vector<1x8xf32> -> vector<1x8xf32>
    %c0_38 = arith.constant 0 : index
    %c0_39 = arith.constant 0 : index
    %122 = vector.load %arg7[%c0_38, %c0_39] : memref<1x8xf32, #tpu.memory_space<vmem>>, vector<1x8xf32>
    %123 = arith.addf %121, %122 : vector<1x8xf32>
    %124 = arith.negf %123 : vector<1x8xf32>
    %125 = math.exp %124 : vector<1x8xf32>
    %cst_40 = arith.constant 1.000000e+00 : f32
    %126 = vector.broadcast %cst_40 : f32 to vector<1x8xf32>
    %127 = arith.addf %126, %125 : vector<1x8xf32>
    %128 = arith.divf %126, %127 : vector<1x8xf32>
    %129 = arith.mulf %123, %128 : vector<1x8xf32>
    %c0_41 = arith.constant 0 : index
    %c0_42 = arith.constant 0 : index
    %130 = vector.load %arg8[%c0_41, %c0_42] : memref<8x64xf32, #tpu.memory_space<vmem>>, vector<8x64xf32>
    %cst_43 = arith.constant dense<0.000000e+00> : vector<1x64xf32>
    %131 = tpu.matmul %129, %130, %cst_43 {dimension_numbers = #tpu.dot_dimension_numbers<[1], [0], [0], [1], [0, 0, 1, 1], [], []>} : vector<1x8xf32>, vector<8x64xf32>, vector<1x64xf32> -> vector<1x64xf32>
    %c0_44 = arith.constant 0 : index
    %c0_45 = arith.constant 0 : index
    %132 = vector.load %arg9[%c0_44, %c0_45] : memref<1x64xf32, #tpu.memory_space<vmem>>, vector<1x64xf32>
    %133 = arith.addf %131, %132 : vector<1x64xf32>
    %134 = arith.negf %133 : vector<1x64xf32>
    %135 = math.exp %134 : vector<1x64xf32>
    %cst_46 = arith.constant 1.000000e+00 : f32
    %136 = vector.broadcast %cst_46 : f32 to vector<1x64xf32>
    %137 = arith.addf %136, %135 : vector<1x64xf32>
    %138 = arith.divf %136, %137 : vector<1x64xf32>
    %c0_47 = arith.constant 0 : index
    %c0_48 = arith.constant 0 : index
    %139 = vector.load %arg10[%c0_47, %c0_48] : memref<16x64xf32, #tpu.memory_space<vmem>>, vector<16x64xf32>
    %140 = vector.broadcast %138 : vector<1x64xf32> to vector<16x64xf32>
    %141 = arith.mulf %139, %140 : vector<16x64xf32>
    %142 = arith.truncf %141 : vector<16x64xf32> to vector<16x64xbf16>
    %cst_49 = arith.constant dense<0.000000e+00> : vector<16x256xf32>
    %143 = tpu.matmul %142, %115, %cst_49 {dimension_numbers = #tpu.dot_dimension_numbers<[1], [0], [0], [1], [0, 0, 1, 1], [], []>} : vector<16x64xbf16>, vector<64x256xbf16>, vector<16x256xf32> -> vector<16x256xf32>
    %c0_50 = arith.constant 0 : index
    %c0_51 = arith.constant 0 : index
    %144 = vector.load %arg11[%c0_50, %c0_51] : memref<16x1xf32, #tpu.memory_space<vmem>>, vector<16x1xf32>
    %145 = vector.broadcast %144 : vector<16x1xf32> to vector<16x256xf32>
    %146 = arith.addf %143, %145 : vector<16x256xf32>
    %147 = arith.addf %146, %1 : vector<16x256xf32>
    %c0_52 = arith.constant 0 : index
    %c0_53 = arith.constant 0 : index
    %c0_54 = arith.constant 0 : index
    %148 = vector.load %arg12[%c0_52, %c0_53, %c0_54] : memref<1x16x256xf32, #tpu.memory_space<vmem>>, vector<1x16x256xf32>
    %149 = vector.shape_cast %148 : vector<1x16x256xf32> to vector<16x256xf32>
    %150 = vector.shape_cast %147 : vector<16x256xf32> to vector<1x16x256xf32>
    tpu.vector_store %arg12[%c0_52, %c0_53, %c0_54], %150 {strides = array<i32>} : memref<1x16x256xf32, #tpu.memory_space<vmem>>, vector<1x16x256xf32>,
    return
  }
  func.func @transform_0(%arg0: i32) -> (i32, i32, i32) {
    %c0_i32 = arith.constant 0 : i32
    %c0_i32_0 = arith.constant 0 : i32
    %c0_i32_1 = arith.constant 0 : i32
    return %arg0, %c0_i32, %c0_i32_0 : i32, i32, i32
  }
  func.func @transform_1(%arg0: i32) -> (i32, i32) {
    %c0_i32 = arith.constant 0 : i32
    %c0_i32_0 = arith.constant 0 : i32
    %c0_i32_1 = arith.constant 0 : i32
    return %c0_i32, %c0_i32_0 : i32, i32
  }
  func.func @transform_2(%arg0: i32) -> (i32, i32) {
    %c0_i32 = arith.constant 0 : i32
    %c0_i32_0 = arith.constant 0 : i32
    %c0_i32_1 = arith.constant 0 : i32
    return %c0_i32, %c0_i32_0 : i32, i32
  }
  func.func @transform_3(%arg0: i32) -> (i32, i32) {
    %c0_i32 = arith.constant 0 : i32
    %c0_i32_0 = arith.constant 0 : i32
    %c0_i32_1 = arith.constant 0 : i32
    return %c0_i32, %c0_i32_0 : i32, i32
  }
  func.func @transform_4(%arg0: i32) -> (i32, i32) {
    %c0_i32 = arith.constant 0 : i32
    %c0_i32_0 = arith.constant 0 : i32
    %c0_i32_1 = arith.constant 0 : i32
    return %c0_i32, %c0_i32_0 : i32, i32
  }
  func.func @transform_5(%arg0: i32) -> (i32, i32) {
    %c0_i32 = arith.constant 0 : i32
    %c0_i32_0 = arith.constant 0 : i32
    %c0_i32_1 = arith.constant 0 : i32
    return %c0_i32, %c0_i32_0 : i32, i32
  }
  func.func @transform_6(%arg0: i32) -> (i32, i32) {
    %c0_i32 = arith.constant 0 : i32
    %c0_i32_0 = arith.constant 0 : i32
    %c0_i32_1 = arith.constant 0 : i32
    return %c0_i32, %c0_i32_0 : i32, i32
  }
  func.func @transform_7(%arg0: i32) -> (i32, i32) {
    %c0_i32 = arith.constant 0 : i32
    %c0_i32_0 = arith.constant 0 : i32
    %c0_i32_1 = arith.constant 0 : i32
    return %c0_i32, %c0_i32_0 : i32, i32
  }
  func.func @transform_8(%arg0: i32) -> (i32, i32) {
    %c0_i32 = arith.constant 0 : i32
    %c0_i32_0 = arith.constant 0 : i32
    %c0_i32_1 = arith.constant 0 : i32
    return %c0_i32, %c0_i32_0 : i32, i32
  }
  func.func @transform_9(%arg0: i32) -> (i32, i32) {
    %c0_i32 = arith.constant 0 : i32
    %c0_i32_0 = arith.constant 0 : i32
    %c0_i32_1 = arith.constant 0 : i32
    return %c0_i32, %c0_i32_0 : i32, i32
  }
  func.func @transform_10(%arg0: i32) -> (i32, i32) {
    %c0_i32 = arith.constant 0 : i32
    %c0_i32_0 = arith.constant 0 : i32
    %c0_i32_1 = arith.constant 0 : i32
    return %c0_i32, %c0_i32_0 : i32, i32
  }
  func.func @transform_11(%arg0: i32) -> (i32, i32, i32) {
    %c0_i32 = arith.constant 0 : i32
    %c0_i32_0 = arith.constant 0 : i32
    %c0_i32_1 = arith.constant 0 : i32
    return %arg0, %c0_i32, %c0_i32_0 : i32, i32, i32
  }
}

</mosaic_0001>

<bundles_post_ra>
// kernel: inverted_residual.1
= control target key start
LH: loop header
LB: loop body
LE: loop exit
PB: predicated region body
PF: predicated region fallthrough
CT: control target
= control target key end

     0   :  { %s2768_s17 = smov 0   ;;  %s4975_s0 = inlined_call_operand.vmem [shape: f32[2,16,256], index: 0, kind: input, shape index: {}]   ;;  %s4976_s1 = inlined_call_operand.vmem [shape: bf16[64,16], index: 1, kind: input, shape index: {}]   ;;  %s4977_s2 = inlined_call_operand.vmem [shape: f32[64,1], index: 2, kind: input, shape index: {}]   ;;  %s4978_s3 = inlined_call_operand.vmem [shape: f32[64,9], index: 3, kind: input, shape index: {}]   ;;  %s4979_s4 = inlined_call_operand.vmem [shape: f32[64,1], index: 4, kind: input, shape index: {}]   ;;  %s4980_s5 = inlined_call_operand.vmem [shape: f32[64,8], index: 5, kind: input, shape index: {}]   ;;  %s4981_s6 = inlined_call_operand.vmem [shape: f32[1,8], index: 6, kind: input, shape index: {}]   ;;  %s4982_s7 = inlined_call_operand.vmem [shape: f32[8,64], index: 7, kind: input, shape index: {}]   ;;  %s4983_s8 = inlined_call_operand.vmem [shape: f32[1,64], index: 8, kind: input, shape index: {}]   ;;  %s4984_s9 = inlined_call_operand.vmem [shape: f32[16,64], index: 9, kind: input, shape index: {}]   ;;  %s4985_s10 = inlined_call_operand.vmem [shape: f32[16,1], index: 10, kind: input, shape index: {}]   ;;  %s4986_s11 = inlined_call_operand.vmem [shape: f32[2,16,256], index: 11, kind: output, shape index: {}]  }
   0x1 LB: > { %s2347_s18 = sadd.s32 4294967295, %s2685_s17   ;;  %p2351_p0 = scmp.ge.s32.totalorder %s2685_s17, 1  ;;  %s2685_s17 = sphi %s2768_s17, %s21_s17  }
   0x2   : > { %p337_p1 = scmp.lt.s32.totalorder %s2685_s17, 3 }
   0x4   : > { %p338_p2 = pnand %p2351_p0, %p337_p1 }
   0x6   : > { %341 = sbr.rel (%p338_p2) target bundleno = 1735 (0x6c7), region = 64 }
   0xd   : > { %v405_v0 = vld [vmem:[%s4977_s2 + $0x10] sm:$0xff]  ;;  %p377_p3 = scmp.lt.s32.totalorder %s2347_s18, 1  ;;  %v4991_v1 = vmov 0   ;;  %v406_v2 = vld [vmem:[%s4977_s2 + $0x18] sm:$0xff]  ;;  %v408_v7 = vld [vmem:[%s4977_s2 + $0x28] sm:$0xff]  ;;  %vm471_vm0 = vcmask 130048  }
   0xe   : > { %2482 = vset.pattern.permute.xlu1 %v4991_v1  ;;  %516 = vmatprep.mubr.bf16.mxu0 %v4991_v1  ;;  %v403_v10 = vld [vmem:[%s4977_s2] sm:$0xff]  ;;  %v404_v12 = vld [vmem:[%s4977_s2 + $0x8] sm:$0xff]  ;;  %v410_v13 = vld [vmem:[%s4977_s2 + $0x38] sm:$0xff]  ;;  %v5001_v18 = vmov 1   ;;  %v5002_v21 = vmov 2   ;;  %v4999_v23 = vmov 3  }
   0xf   : > { %423 = vperm.xlu1 %2482, %v405_v0   ;;  %s5631_s18 = smov (!%p377_p3, %s2347_s18), 1  ;;  %2481 = vset.pattern.permute.xlu0 %v4991_v1  ;;  %v2531_v11 = vld [vmem:[%s4976_s1] sm:$0xff]   ;;  %v2822_v15 = vld [vmem:[%s4978_s3 + $0x8] sm:$0xff]  ;;  %v409_v17 = vld [vmem:[%s4977_s2 + $0x30] sm:$0xff]  ;;  %v4995_v26 = vmov 4   ;;  %v4997_v28 = vmov 5  }
  0x10   : > { %s2403_s23 = sshll.u32 %s5631_s18, 5  ;;  %413 = vperm.xlu0 %2481, %v403_v10   ;;  %v407_v14 = vld [vmem:[%s4977_s2 + $0x20] sm:$0xff]  ;;  %v2532_v16 = vld [vmem:[%s4976_s1 + $0x8] sm:$0xff]   ;;  %v2533_v20 = vld [vmem:[%s4976_s1 + $0x10] sm:$0xff]   ;;  %v4993_v29 = vmov 6   ;;  %v4989_v30 = vmov 7  }
  0x11   : > { %s2793_s26 = scalar_lea.vmem %s4975_s0, %s2403_s23  ;;  %v2838_v19 = vld [vmem:[%s4978_s3] sm:$0xff]  ;;  %v2849_v22 = vld [vmem:[%s4978_s3 + $0x18] sm:$0xff]  ;;  %v2866_v25 = vld [vmem:[%s4978_s3 + $0x28] sm:$0xff]  ;;  %v4987_v31 = vmov 8   ;;  %s2696_s14 = smov 15  }
  0x12   : > { %v390_v3 = vld [vmem:[%s2793_s26 + $0x8] sm:$0xff]  ;;  %v392_v4 = vld [vmem:[%s2793_s26 + $0x18] sm:$0xff]  ;;  %v389_v5 = vld [vmem:[%s2793_s26] sm:$0xff]  ;;  %s2697_s15 = smov 17   ;;  %s2698_s16 = smov 1  }
  0x13   : > { %428 = vperm.xlu1 %2482, %v406_v2   ;;  %v402_v6 = vpack.c.bf16 %v392_v4, %v390_v3  ;;  %v391_v8 = vld [vmem:[%s2793_s26 + $0x10] sm:$0xff]  ;;  %v2534_v24 = vld [vmem:[%s4976_s1 + $0x18] sm:$0xff]   ;;  %v2901_v32 = vld [vmem:[%s4978_s3 + $0x20] sm:$0xff]  ;;  %s2699_s19 = smov 16   ;;  %s2700_s20 = smov 127  }
  0x14   : > { %v401_v9 = vpack.c.bf16 %v391_v8, %v389_v5  ;;  %418 = vperm.xlu0 %2481, %v404_v12   ;;  %v2874_v27 = vld [vmem:[%s4978_s3 + $0x10] sm:$0xff]  ;;  %v1820_v33 = vld [vmem:[%s4979_s4] sm:$0xff]  ;;  %v1821_v34 = vld [vmem:[%s4979_s4 + $0x8] sm:$0xff]  ;;  %s2701_s21 = smov 113   ;;  %s2702_s22 = smov 112  }
  0x15   : > { %484 = vmatprep.subr.bf16.mxu0 %v402_v6  ;;  %s2703_s24 = smov 111  }
  0x16   : > { %485 = vmatpush1.bf16.msra.mxu0 %v401_v9 }
  0x17   : > { %438 = vperm.xlu1 %2482, %v408_v7  }
  0x18   : > { %433 = vperm.xlu0 %2481, %v407_v14  }
  0x19   : > { %2360 = vmatmul.mubr.msk.bf16.vlgmr.msra.gmra.mrb[0].mxu0 %vm471_vm0, %v2531_v11 }
  0x1a   : > { %526 = vmatprep.mubr.bf16.mxu0 %v4991_v1 }
  0x1b   : > { %448 = vperm.xlu1 %2482, %v410_v13  }
  0x1c   : > { %443 = vperm.xlu0 %2481, %v409_v17  }
  0x1f   : > { %770 = vperm.xlu1 %2482, %v2822_v15  }
  0x20   : > { %765 = vperm.xlu0 %2481, %v2838_v19  }
  0x21   : > { %2361 = vmatmul.mubr.msk.bf16.gmra.mrb[4].mxu0 %vm471_vm0, %v2532_v16 }
  0x22   : > { %536 = vmatprep.mubr.bf16.mxu0 %v4991_v1 }
  0x23   : > { %2483 = vset.pattern.permute.xlu1 %v5001_v18 }
  0x24   : > { %893 = vperm.xlu1 %2483, %v2822_v15   ;;  %780 = vperm.xlu0 %2481, %v2849_v22  }
  0x28   : > { %2484 = vset.pattern.permute.xlu1 %v5002_v21  ;;  %2488 = vset.pattern.permute.xlu0 %v5001_v18 }
  0x29   : > { %1024 = vperm.xlu1 %2484, %v2838_v19   ;;  %2362 = vmatmul.mubr.msk.bf16.gmra.mrb[8].mxu0 %vm471_vm0, %v2533_v20 }
  0x2a   : > { %546 = vmatprep.mubr.bf16.mxu0 %v4991_v1  ;;  %889 = vperm.xlu0 %2488, %v2838_v19  }
  0x2d   : > { %2485 = vset.pattern.permute.xlu1 %v4999_v23 }
  0x2e   : > { %1157 = vperm.xlu1 %2485, %v2838_v19   ;;  %909 = vperm.xlu0 %2488, %v2866_v25  }
  0x31   : > { %2363 = vmatmul.mubr.msk.bf16.gmra.mrb[12].mxu0 %vm471_vm0, %v2534_v24 }
  0x32   : > { %1161 = vperm.xlu1 %2485, %v2822_v15  }
  0x36   : > { %2486 = vset.pattern.permute.xlu1 %v4995_v26 }
  0x37   : > { %1225 = vperm.xlu1 %2486, %v2822_v15  }
  0x3b   : > { %2487 = vset.pattern.permute.xlu1 %v4991_v1 }
  0x3c   : > { %775 = vperm.xlu1 %2487, %v2874_v27  }
  0x40   : > { %2489 = vset.pattern.permute.xlu1 %v5001_v18 }
  0x41   : > { %897 = vperm.xlu1 %2489, %v2874_v27  }
  0x45   : > { %901 = vperm.xlu1 %2489, %v2849_v22  }
  0x49   : > { %2490 = vset.pattern.permute.xlu1 %v4997_v28 }
  0x4a   : > { %1358 = vperm.xlu1 %2490, %v2822_v15  }
  0x4e   : > { %2491 = vset.pattern.permute.xlu1 %v5002_v21 }
  0x4f   : > { %1032 = vperm.xlu1 %2491, %v2874_v27  }
  0x53   : > { %2492 = vset.pattern.permute.xlu1 %v4993_v29 }
  0x54   : > { %1489 = vperm.xlu1 %2492, %v2838_v19  }
  0x58   : > { %1493 = vperm.xlu1 %2492, %v2822_v15  }
  0x5c   : > { %2493 = vset.pattern.permute.xlu1 %v4999_v23 }
  0x5d   : > { %1169 = vperm.xlu1 %2493, %v2849_v22  }
  0x61   : > { %2494 = vset.pattern.permute.xlu1 %v4989_v30 }
  0x62   : > { %1622 = vperm.xlu1 %2494, %v2838_v19  }
  0x66   : > { %2495 = vset.pattern.permute.xlu1 %v4995_v26 }
  0x67   : > { %1233 = vperm.xlu1 %2495, %v2849_v22  }
  0x6b   : > { %2496 = vset.pattern.permute.xlu1 %v4987_v31 }
  0x6c   : > { %1757 = vperm.xlu1 %2496, %v2838_v19  }
  0x70   : > { %2497 = vset.pattern.permute.xlu1 %v4991_v1 }
  0x71   : > { %790 = vperm.xlu1 %2497, %v2866_v25  }
  0x75   : > { %2498 = vset.pattern.permute.xlu1 %v5001_v18  ;;  %v3186_v18 = vld [vmem:[%s4978_s3 + $0x38] sm:$0xff] }
  0x76   : > { %905 = vperm.xlu1 %2498, %v2901_v32  }
  0x7a   : > { %2499 = vset.pattern.permute.xlu1 %v4997_v28 }
  0x7b   : > { %1362 = vperm.xlu1 %2499, %v2874_v27  }
  0x7f   : > { %1366 = vperm.xlu1 %2499, %v2849_v22  }
  0x83   : > { %2500 = vset.pattern.permute.xlu1 %v5002_v21 }
  0x84   : > { %1044 = vperm.xlu1 %2500, %v2866_v25  }
  0x88   : > { %2501 = vset.pattern.permute.xlu1 %v4993_v29 }
  0x89   : > { %1497 = vperm.xlu1 %2501, %v2874_v27  }
  0x8d   : > { %2502 = vset.pattern.permute.xlu1 %v4991_v1 }
  0x8e   : > { %1830 = vperm.xlu1 %2502, %v1820_v33   ;;  %v2928_v35 = vpop.permute.xlu1 %423 }
  0x8f   : > { %v414_v44 = vpop.permute.xlu0 %413 }
  0x92   : > { %1835 = vperm.xlu1 %2502, %v1821_v34   ;;  %v2930_v36 = vpop.permute.xlu1 %428 }
  0x93   : > { %v419_v54 = vpop.permute.xlu0 %418 }
  0x96   : > { %2503 = vset.pattern.permute.xlu1 %v4999_v23  ;;  %v2932_v37 = vpop.permute.xlu1 %438 }
  0x97   : > { %1177 = vperm.xlu1 %2503, %v2866_v25  }
  0x9a   : > { %v2934_v38 = vpop.permute.xlu1 %448 }
  0x9b   : > { %2504 = vset.pattern.permute.xlu1 %v4989_v30 }
  0x9c   : > { %1630 = vperm.xlu1 %2504, %v2874_v27  }
  0x9e   : > { %v2936_v39 = vpop.permute.xlu1 %770 }
  0x9f   : > { %5173 = vst [vmem:[#allocation2_spill] sm:$0xff] %v2936_v39 }
  0xa0   : > { %2505 = vset.pattern.permute.xlu1 %v4995_v26 }
  0xa1   : > { %1241 = vperm.xlu1 %2505, %v2866_v25  }
  0xa3   : > { %v2938_v40 = vpop.permute.xlu1 %893 }
  0xa4   : > { %5174 = vst [vmem:[#allocation3_spill] sm:$0xff] %v2938_v40  ;;  %v3260_v40 = vld [vmem:[%s4978_s3 + $0x30] sm:$0xff] }
  0xa5   : > { %2506 = vset.pattern.permute.xlu1 %v4987_v31 }
  0xa6   : > { %1765 = vperm.xlu1 %2506, %v2874_v27  }
  0xa8   : > { %v2940_v41 = vpop.permute.xlu1 %1024 }
  0xa9   : > { %5175 = vst [vmem:[#allocation4_spill] sm:$0xff] %v2940_v41 }
  0xaa   : > { %2507 = vset.pattern.permute.xlu1 %v4991_v1 }
  0xad   : > { %v2942_v42 = vpop.permute.xlu1 %1157 }
  0xae   : > { %5176 = vst [vmem:[#allocation5_spill] sm:$0xff] %v2942_v42  ;;  %v5302_v42 = vmov 0 }
  0xb1   : > { %v2944_v43 = vpop.permute.xlu1 %1161 }
  0xb2   : > { %5177 = vst [vmem:[#allocation6_spill] sm:$0xff] %v2944_v43 }
  0xb6   : > { %v2946_v50 = vpop.permute.xlu1 %1225 }
  0xb7   : > { %5178 = vst [vmem:[#allocation7_spill] sm:$0xff] %v2946_v50 }
  0xbb   : > { %v2948_v57 = vpop.permute.xlu1 %775 }
  0xc0   : > { %v2956_v63 = vpop.permute.xlu1 %897 }
  0xc4   : > { %v2966_v8 = vpop.permute.xlu1 %901 }
  0xc5   : > { %5179 = vst [vmem:[#allocation8_spill] sm:$0xff] %v2966_v8 }
  0xc9   : > { %v2974_v13 = vpop.permute.xlu1 %1358 }
  0xca   : > { %5180 = vst [vmem:[#allocation9_spill] sm:$0xff] %v2974_v13 }
  0xce   : > { %v2984_v33 = vpop.permute.xlu1 %1032 }
  0xec   : > { %v518_v45 = vpop.f32.mrb[0].mxu0 }
  0xed   : > { %v519_v46 = vadd.f32 %v518_v45, %v414_v44  ;;  %v520_v47 = vpop.f32.mrb[1].mxu0 }
  0xee   : > { %v521_v48 = vadd.f32 %v520_v47, %v414_v44  ;;  %v522_v49 = vpop.f32.mrb[2].mxu0 }
  0xef   : > { %v2364_v51 = vmul.f32 -1.442695, %v519_v46  ;;  %v524_v52 = vpop.f32.mrb[3].mxu0  ;;  %v523_v55 = vadd.f32 %v522_v49, %v419_v54 }
  0xf0   : > { %v2365_v53 = vmul.f32 -1.442695, %v521_v48  ;;  %v525_v24 = vadd.f32 %v524_v52, %v419_v54 }
  0xf1   : > { %2535 = vpow2.f32 %v2364_v51  ;;  %v2366_v60 = vmul.f32 -1.442695, %v523_v55 }
  0xf2   : > { %2537 = vpow2.f32 %v2365_v53  ;;  %v2367_v44 = vmul.f32 -1.442695, %v525_v24 }
  0xf3   : > { %2539 = vpow2.f32 %v2366_v60 }
  0xf4   : > { %v528_v56 = vpop.f32.mrb[4].mxu0 }
  0xf5   : > { %v2950_v58 = vpop.f32.mrb[5].mxu0  ;;  %v529_v54 = vadd.f32 %v528_v56, %v2928_v35 }
  0xf6   : > { %v2952_v59 = vpop.f32.mrb[6].mxu0 }
  0xf7   : > { %v2954_v61 = vpop.f32.mrb[7].mxu0  ;;  %v2368_v60 = vmul.f32 -1.442695, %v529_v54  ;;  %v533_v56 = vadd.f32 %v2952_v59, %v2930_v36  ;;  %v531_v59 = vadd.f32 %v2950_v58, %v2928_v35 }
  0xfb   : > { %v2536_v62 = vpop.eup %2535 }
  0xfc   : > { %v605_v0 = vadd.f32 1.0, %v2536_v62  ;;  %v2958_v2 = vpop.f32.mrb[8].mxu0  ;;  %v2538_v3 = vpop.eup %2537 }
  0xfd   : > { %v2960_v4 = vpop.f32.mrb[9].mxu0  ;;  %v606_v7 = vadd.f32 1.0, %v2538_v3  ;;  %v2540_v10 = vpop.eup %2539  ;;  %v2370_v3 = vmul.f32 -1.442695, %v533_v56 }
  0xfe   : > { %2541 = vrcp.f32 %v605_v0  ;;  %v2962_v5 = vpop.f32.mrb[10].mxu0  ;;  %v607_v17 = vadd.f32 1.0, %v2540_v10 }
  0xff   : > { %v2964_v6 = vpop.f32.mrb[11].mxu0  ;;  %2543 = vrcp.f32 %v606_v7 }
 0x100   : > { %2545 = vrcp.f32 %v607_v17  ;;  %v2369_v17 = vmul.f32 -1.442695, %v531_v59 }
 0x101   : > { %2547 = vpow2.f32 %v2367_v44  ;;  %v535_v44 = vadd.f32 %v2954_v61, %v2930_v36  ;;  %v434_v36 = vpop.permute.xlu0 %433 }
 0x102   : > { %v539_v61 = vadd.f32 %v2958_v2, %v434_v36 }
 0x104   : > { %v2968_v9 = vpop.f32.mrb[12].mxu0 }
 0x105   : > { %v2970_v11 = vpop.f32.mrb[13].mxu0 }
 0x106   : > { %v2972_v12 = vpop.f32.mrb[14].mxu0 }
 0x107   : > { %v2976_v14 = vpop.f32.mrb[15].mxu0 }
 0x108   : > { %v2542_v16 = vpop.eup %2541 }
 0x109   : > { %v2978_v20 = vmul.f32 %v2542_v16, %v519_v46  ;;  %v2544_v34 = vpop.eup %2543  ;;  %v2992_v46 = vpop.permute.xlu1 %1489 }
 0x10a   : > { %v2990_v45 = vmul.f32 %v2544_v34, %v521_v48  ;;  %5183 = vst [vmem:[#allocation12_spill] sm:$0xff] %v2992_v46  ;;  %v2546_v47 = vpop.eup %2545 }
 0x10b   : > { %5181 = vst [vmem:[#allocation10_spill] sm:$0xff] %v2978_v20  ;;  %952 = vrot.lane.b32.xlu1 %v2978_v20, %s2696_s14  ;;  %684 = vrot.lane.b32.xlu0 %v2978_v20, %s2697_s15  ;;  %v3004_v49 = vmul.f32 %v2546_v47, %v523_v55  ;;  %v2548_v51 = vpop.eup %2547 }
 0x10c   : > { %5182 = vst [vmem:[#allocation11_spill] sm:$0xff] %v2990_v45  ;;  %v608_v53 = vadd.f32 1.0, %v2548_v51  ;;  %v2371_v51 = vmul.f32 -1.442695, %v535_v44 }
 0x10d   : > { %v3002_v48 = vpop.permute.xlu1 %1493  ;;  %5185 = vst [vmem:[#allocation14_spill] sm:$0xff] %v3004_v49 }
 0x10e   : > { %5184 = vst [vmem:[#allocation13_spill] sm:$0xff] %v3002_v48  ;;  %2549 = vrcp.f32 %v608_v53 }
 0x10f   : > { %1087 = vrot.lane.b32.xlu1 %v2978_v20, %s2698_s16  ;;  %819 = vrot.lane.b32.xlu0 %v2978_v20, %s2699_s19  ;;  %2551 = vpow2.f32 %v2368_v60 }
 0x110   : > { %2553 = vpow2.f32 %v2370_v3 }
 0x111   : > { %v3010_v52 = vpop.permute.xlu1 %1169  ;;  %2555 = vpow2.f32 %v2369_v17 }
 0x112   : > { %5186 = vst [vmem:[#allocation15_spill] sm:$0xff] %v3010_v52 }
 0x113   : > { %968 = vrot.lane.b32.xlu1 %v2990_v45, %s2696_s14  ;;  %1284 = vrot.lane.b32.xlu0 %v2978_v20, %s2700_s20 }
 0x115   : > { %v3021_v55 = vpop.permute.xlu1 %1622 }
 0x116   : > { %5187 = vst [vmem:[#allocation16_spill] sm:$0xff] %v3021_v55 }
 0x117   : > { %1103 = vrot.lane.b32.xlu1 %v2990_v45, %s2698_s16  ;;  %1417 = vrot.lane.b32.xlu0 %v2978_v20, %s2701_s21 }
 0x118   : > { %v2550_v0 = vpop.eup %2549 }
 0x119   : > { %v3027_v62 = vpop.permute.xlu1 %1233  ;;  %v3039_v7 = vmul.f32 %v2550_v0, %v525_v24  ;;  %v2552_v16 = vpop.eup %2551 }
 0x11a   : > { %5188 = vst [vmem:[#allocation17_spill] sm:$0xff] %v3027_v62  ;;  %v609_v24 = vadd.f32 1.0, %v2552_v16  ;;  %v2554_v35 = vpop.eup %2553 }
 0x11b   : > { %686 = vrot.lane.b32.xlu1 %v3004_v49, %s2697_s15  ;;  %1552 = vrot.lane.b32.xlu0 %v2978_v20, %s2702_s22  ;;  %5189 = vst [vmem:[#allocation18_spill] sm:$0xff] %v3039_v7  ;;  %v611_v47 = vadd.f32 1.0, %v2554_v35  ;;  %v2556_v60 = vpop.eup %2555  ;;  %v541_v35 = vadd.f32 %v2960_v4, %v434_v36 }
 0x11c   : > { %2557 = vrcp.f32 %v609_v24  ;;  %v610_v3 = vadd.f32 1.0, %v2556_v60  ;;  %v2372_v24 = vmul.f32 -1.442695, %v539_v61 }
 0x11d   : > { %v3041_v10 = vpop.permute.xlu1 %1757  ;;  %2559 = vrcp.f32 %v611_v47  ;;  %v2373_v47 = vmul.f32 -1.442695, %v541_v35 }
 0x11e   : > { %5190 = vst [vmem:[#allocation19_spill] sm:$0xff] %v3041_v10  ;;  %2561 = vpow2.f32 %v2371_v51 }
 0x11f   : > { %821 = vrot.lane.b32.xlu1 %v3004_v49, %s2699_s19  ;;  %1685 = vrot.lane.b32.xlu0 %v2978_v20, %s2703_s24  ;;  %2563 = vrcp.f32 %v610_v3 }
 0x120   : > { %2565 = vpow2.f32 %v2372_v24  ;;  %v543_v24 = vadd.f32 %v2962_v5, %v2932_v37  ;;  %v3119_v5 = vpop.permute.xlu0 %443 }
 0x121   : > { %v3049_v34 = vpop.permute.xlu1 %790  ;;  %2567 = vpow2.f32 %v2373_v47 }
 0x122   : > { %5191 = vst [vmem:[#allocation20_spill] sm:$0xff] %v3049_v34  ;;  %v2374_v31 = vmul.f32 -1.442695, %v543_v24 }
 0x123   : > { %1286 = vrot.lane.b32.xlu1 %v3004_v49, %s2700_s20  ;;  %700 = vrot.lane.b32.xlu0 %v2990_v45, %s2697_s15 }
 0x124   : > { %v3129_v30 = vpop.permute.xlu0 %765 }
 0x125   : > { %v3059_v58 = vpop.permute.xlu1 %905  ;;  %5199 = vst [vmem:[#allocation28_spill] sm:$0xff] %v3129_v30 }
 0x126   : > { %5192 = vst [vmem:[#allocation21_spill] sm:$0xff] %v3059_v58  ;;  %v2558_v0 = vpop.eup %2557 }
 0x127   : > { %1419 = vrot.lane.b32.xlu1 %v3004_v49, %s2701_s21  ;;  %835 = vrot.lane.b32.xlu0 %v2990_v45, %s2699_s19  ;;  %v3078_v16 = vmul.f32 %v2558_v0, %v529_v54  ;;  %v2560_v2 = vpop.eup %2559 }
 0x128   : > { %v2562_v54 = vpop.eup %2561  ;;  %v3093_v4 = vmul.f32 %v2560_v2, %v533_v56 }
 0x129   : > { %v3067_v53 = vpop.permute.xlu1 %1362  ;;  %v612_v60 = vadd.f32 1.0, %v2562_v54  ;;  %v2564_v36 = vpop.eup %2563 }
 0x12a   : > { %5195 = vst [vmem:[#allocation24_spill] sm:$0xff] %v3093_v4  ;;  %v2566_v56 = vpop.eup %2565  ;;  %v3105_v3 = vmul.f32 %v2564_v36, %v531_v59 }
 0x12b   : > { %1554 = vrot.lane.b32.xlu1 %v3004_v49, %s2702_s22  ;;  %1300 = vrot.lane.b32.xlu0 %v2990_v45, %s2700_s20  ;;  %2569 = vrcp.f32 %v612_v60  ;;  %v613_v47 = vadd.f32 1.0, %v2566_v56  ;;  %v2568_v54 = vpop.eup %2567 }
 0x12c   : > { %v614_v59 = vadd.f32 1.0, %v2568_v54 }
 0x12d   : > { %v3080_v17 = vpop.permute.xlu1 %1366  ;;  %2571 = vrcp.f32 %v613_v47  ;;  %v545_v47 = vadd.f32 %v2964_v6, %v2932_v37 }
 0x12e   : > { %5193 = vst [vmem:[#allocation22_spill] sm:$0xff] %v3080_v17  ;;  %2573 = vpow2.f32 %v2374_v31 }
 0x12f   : > { %1687 = vrot.lane.b32.xlu1 %v3004_v49, %s2703_s24  ;;  %1433 = vrot.lane.b32.xlu0 %v2990_v45, %s2701_s21  ;;  %2575 = vrcp.f32 %v614_v59  ;;  %v2375_v1 = vmul.f32 -1.442695, %v545_v47  ;;  %v3143_v59 = vpop.permute.xlu0 %780 }
 0x130   : > { %5201 = vst [vmem:[#allocation30_spill] sm:$0xff] %v3143_v59 }
 0x131   : > { %v3087_v51 = vpop.permute.xlu1 %1044  ;;  %2577 = vpow2.f32 %v2375_v1 }
 0x132   : > { %5194 = vst [vmem:[#allocation23_spill] sm:$0xff] %v3087_v51 }
 0x133   : > { %702 = vrot.lane.b32.xlu1 %v3039_v7, %s2697_s15  ;;  %1568 = vrot.lane.b32.xlu0 %v2990_v45, %s2702_s22  ;;  %v3155_v28 = vpop.permute.xlu0 %889 }
 0x134   : > { %5204 = vst [vmem:[#allocation33_spill] sm:$0xff] %v3155_v28 }
 0x135   : > { %v3099_v0 = vpop.permute.xlu1 %1497  ;;  %v2570_v36 = vpop.eup %2569 }
 0x136   : > { %v3127_v56 = vmul.f32 %v2570_v36, %v535_v44 }
 0x137   : > { %837 = vrot.lane.b32.xlu1 %v3039_v7, %s2699_s19  ;;  %1701 = vrot.lane.b32.xlu0 %v2990_v45, %s2703_s24  ;;  %v2572_v31 = vpop.eup %2571 }
 0x138   : > { %5198 = vst [vmem:[#allocation27_spill] sm:$0xff] %v3127_v56  ;;  %v2574_v44 = vpop.eup %2573  ;;  %v3145_v37 = vmul.f32 %v2572_v31, %v539_v61  ;;  %v3169_v61 = vpop.permute.xlu0 %909 }
 0x139   : > { %v3109_v2 = vpop.permute.xlu1 %1830  ;;  %v2576_v36 = vpop.eup %2575  ;;  %v615_v29 = vadd.f32 1.0, %v2574_v44  ;;  %5206 = vst [vmem:[#allocation35_spill] sm:$0xff] %v3169_v61 }
 0x13a   : > { %5196 = vst [vmem:[#allocation25_spill] sm:$0xff] %v3109_v2  ;;  %5202 = vst [vmem:[#allocation31_spill] sm:$0xff] %v3145_v37  ;;  %v3153_v26 = vmul.f32 %v2576_v36, %v541_v35 }
 0x13b   : > { %1302 = vrot.lane.b32.xlu1 %v3039_v7, %s2700_s20  ;;  %954 = vrot.lane.b32.xlu0 %v3004_v49, %s2696_s14  ;;  %2579 = vrcp.f32 %v615_v29  ;;  %v2578_v35 = vpop.eup %2577 }
 0x13c   : > { %5203 = vst [vmem:[#allocation32_spill] sm:$0xff] %v3153_v26  ;;  %v616_v31 = vadd.f32 1.0, %v2578_v35 }
 0x13d   : > { %v3121_v60 = vpop.permute.xlu1 %1835 }
 0x13e   : > { %5197 = vst [vmem:[#allocation26_spill] sm:$0xff] %v3121_v60  ;;  %2581 = vrcp.f32 %v616_v31  ;;  %v5210_v31 = vmov 2  }
 0x13f   : > { %1435 = vrot.lane.b32.xlu1 %v3039_v7, %s2701_s21  ;;  %1089 = vrot.lane.b32.xlu0 %v3004_v49, %s2698_s16  ;;  %v555_v49 = vadd.f32 %v2976_v14, %v2934_v38 }
 0x141   : > { %v3133_v54 = vpop.permute.xlu1 %1177 }
 0x142   : > { %5200 = vst [vmem:[#allocation29_spill] sm:$0xff] %v3133_v54  ;;  %v1823_v54 = vld [vmem:[%s4979_s4 + $0x18] sm:$0xff] }
 0x143   : > { %1570 = vrot.lane.b32.xlu1 %v3039_v7, %s2702_s22  ;;  %970 = vrot.lane.b32.xlu0 %v3039_v7, %s2696_s14 }
 0x145   : > { %v3147_v6 = vpop.permute.xlu1 %1630  ;;  %v2580_v36 = vpop.eup %2579 }
 0x146   : > { %v3188_v21 = vmul.f32 %v2580_v36, %v543_v24 }
 0x147   : > { %1703 = vrot.lane.b32.xlu1 %v3039_v7, %s2703_s24  ;;  %1105 = vrot.lane.b32.xlu0 %v3039_v7, %s2698_s16 }
 0x148   : > { %v2582_v48 = vpop.eup %2581 }
 0x149   : > { %v3157_v23 = vpop.permute.xlu1 %1241  ;;  %v3212_v2 = vmul.f32 %v2582_v48, %v545_v47 }
 0x14a   : > { %5205 = vst [vmem:[#allocation34_spill] sm:$0xff] %v3157_v23  ;;  %v5226_v23 = vmov 3  }
 0x14b   : > { %688 = vrot.lane.b32.xlu1 %v3078_v16, %s2697_s15  ;;  %823 = vrot.lane.b32.xlu0 %v3078_v16, %s2699_s19 }
 0x14d   : > { %v3167_v1 = vpop.permute.xlu1 %1765 }
 0x14f   : > { %956 = vrot.lane.b32.xlu1 %v3078_v16, %s2696_s14  ;;  %1091 = vrot.lane.b32.xlu0 %v3078_v16, %s2698_s16 }
 0x153   : > { %690 = vrot.lane.b32.xlu1 %v3093_v4, %s2697_s15  ;;  %1288 = vrot.lane.b32.xlu0 %v3078_v16, %s2700_s20 }
 0x157   : > { %825 = vrot.lane.b32.xlu1 %v3093_v4, %s2699_s19  ;;  %1421 = vrot.lane.b32.xlu0 %v3078_v16, %s2701_s21 }
 0x15b   : > { %958 = vrot.lane.b32.xlu1 %v3093_v4, %s2696_s14  ;;  %704 = vrot.lane.b32.xlu0 %v3105_v3, %s2697_s15 }
 0x15f   : > { %1093 = vrot.lane.b32.xlu1 %v3093_v4, %s2698_s16  ;;  %839 = vrot.lane.b32.xlu0 %v3105_v3, %s2699_s19 }
 0x163   : > { %1290 = vrot.lane.b32.xlu1 %v3093_v4, %s2700_s20  ;;  %972 = vrot.lane.b32.xlu0 %v3105_v3, %s2696_s14 }
 0x167   : > { %706 = vrot.lane.b32.xlu1 %v3127_v56, %s2697_s15  ;;  %1107 = vrot.lane.b32.xlu0 %v3105_v3, %s2698_s16 }
 0x16b   : > { %841 = vrot.lane.b32.xlu1 %v3127_v56, %s2699_s19  ;;  %1304 = vrot.lane.b32.xlu0 %v3105_v3, %s2700_s20 }
 0x16f   : > { %974 = vrot.lane.b32.xlu1 %v3127_v56, %s2696_s14  ;;  %827 = vrot.lane.b32.xlu0 %v3145_v37, %s2699_s19 }
 0x173   : > { %1109 = vrot.lane.b32.xlu1 %v3127_v56, %s2698_s16  ;;  %708 = vrot.lane.b32.xlu0 %v3153_v26, %s2697_s15 }
 0x177   : > { %1306 = vrot.lane.b32.xlu1 %v3127_v56, %s2700_s20  ;;  %843 = vrot.lane.b32.xlu0 %v3153_v26, %s2699_s19 }
 0x17b   : > { %692 = vrot.lane.b32.xlu1 %v3145_v37, %s2697_s15  ;;  %976 = vrot.lane.b32.xlu0 %v3153_v26, %s2696_s14 }
 0x17d   : > { %v3175_v44 = vpop.permute.xlu1 %952  ;;  %v3177_v29 = vpop.permute.xlu0 %684 }
 0x17e   : > { %5207 = vst [vmem:[#allocation36_spill] sm:$0xff] %v3175_v44 }
 0x17f   : > { %960 = vrot.lane.b32.xlu1 %v3145_v37, %s2696_s14  ;;  %1437 = vrot.lane.b32.xlu0 %v3105_v3, %s2701_s21 }
 0x181   : > { %v3190_v35 = vpop.permute.xlu1 %1087  ;;  %v3192_v58 = vpop.permute.xlu0 %819 }
 0x182   : > { %5208 = vst [vmem:[#allocation37_spill] sm:$0xff] %v3190_v35 }
 0x183   : > { %694 = vrot.lane.b32.xlu1 %v3188_v21, %s2697_s15  ;;  %917 = vperm.xlu0 %2488, %v3186_v18  }
 0x185   : > { %v3197_v60 = vpop.permute.xlu1 %968  ;;  %v3199_v17 = vpop.permute.xlu0 %1284 }
 0x186   : > { %5209 = vst [vmem:[#allocation38_spill] sm:$0xff] %v3199_v17 }
 0x187   : > { %829 = vrot.lane.b32.xlu1 %v3188_v21, %s2699_s19  ;;  %2509 = vset.pattern.permute.xlu0 %v5210_v31 }
 0x188   : > { %1028 = vperm.xlu0 %2509, %v2822_v15  }
 0x189   : > { %v3205_v24 = vpop.permute.xlu1 %1103  ;;  %v3207_v36 = vpop.permute.xlu0 %1417 }
 0x18a   : > { %5211 = vst [vmem:[#allocation39_spill] sm:$0xff] %v3205_v24  ;;  %5212 = vst [vmem:[#allocation40_spill] sm:$0xff] %v3207_v36  ;;  %v5241_v36 = vmov 6  }
 0x18b   : > { %962 = vrot.lane.b32.xlu1 %v3188_v21, %s2696_s14 }
 0x18c   : > { %1036 = vperm.xlu0 %2509, %v2849_v22  }
 0x18d   : > { %v3214_v52 = vpop.permute.xlu1 %686  ;;  %v3216_v8 = vpop.permute.xlu0 %1552 }
 0x18e   : > { %5213 = vst [vmem:[#allocation41_spill] sm:$0xff] %v3214_v52  ;;  %5214 = vst [vmem:[#allocation42_spill] sm:$0xff] %v3216_v8  ;;  %v5225_v8 = vmov 1  }
 0x18f   : > { %710 = vrot.lane.b32.xlu1 %v3212_v2, %s2697_s15 }
 0x190   : > { %1040 = vperm.xlu0 %2509, %v2901_v32  }
 0x191   : > { %v3221_v59 = vpop.permute.xlu1 %821  ;;  %v3223_v43 = vpop.permute.xlu0 %1685 }
 0x192   : > { %5215 = vst [vmem:[#allocation43_spill] sm:$0xff] %v3221_v59  ;;  %5216 = vst [vmem:[#allocation44_spill] sm:$0xff] %v3223_v43 }
 0x193   : > { %845 = vrot.lane.b32.xlu1 %v3212_v2, %s2699_s19 }
 0x194   : > { %1095 = vrot.lane.b32.xlu0 %v3145_v37, %s2698_s16 }
 0x195   : > { %v3229_v48 = vpop.permute.xlu1 %1286  ;;  %v3231_v47 = vpop.permute.xlu0 %700 }
 0x196   : > { %5217 = vst [vmem:[#allocation45_spill] sm:$0xff] %v3229_v48 }
 0x197   : > { %978 = vrot.lane.b32.xlu1 %v3212_v2, %s2696_s14 }
 0x198   : > { %1111 = vrot.lane.b32.xlu0 %v3153_v26, %s2698_s16 }
 0x199   : > { %v3237_v13 = vpop.permute.xlu1 %1419  ;;  %v3239_v10 = vpop.permute.xlu0 %835 }
 0x19a   : > { %5218 = vst [vmem:[#allocation46_spill] sm:$0xff] %v3237_v13 }
 0x19b   : > { %1423 = vrot.lane.b32.xlu1 %v3093_v4, %s2701_s21 }
 0x19c   : > { %1556 = vrot.lane.b32.xlu0 %v3078_v16, %s2702_s22 }
 0x19d   : > { %v3245_v55 = vpop.permute.xlu1 %1554  ;;  %v3247_v39 = vpop.permute.xlu0 %1300 }
 0x19e   : > { %5219 = vst [vmem:[#allocation47_spill] sm:$0xff] %v3245_v55  ;;  %5220 = vst [vmem:[#allocation48_spill] sm:$0xff] %v3247_v39  ;;  %v551_v55 = vadd.f32 %v2970_v11, %v3119_v5 }
 0x19f   : > { %1439 = vrot.lane.b32.xlu1 %v3127_v56, %s2701_s21 }
 0x1a0   : > { %1572 = vrot.lane.b32.xlu0 %v3105_v3, %s2702_s22  ;;  %v2377_v59 = vmul.f32 -1.442695, %v551_v55 }
 0x1a1   : > { %v3253_v46 = vpop.permute.xlu1 %1687  ;;  %v3255_v13 = vpop.permute.xlu0 %1433 }
 0x1a2   : > { %5221 = vst [vmem:[#allocation49_spill] sm:$0xff] %v3253_v46  ;;  %5222 = vst [vmem:[#allocation50_spill] sm:$0xff] %v3255_v13  ;;  %v549_v46 = vadd.f32 %v2968_v9, %v3119_v5  ;;  %2583 = vpow2.f32 %v2377_v59 }
 0x1a3   : > { %800 = vperm.xlu1 %2507, %v3186_v18  }
 0x1a4   : > { %1048 = vperm.xlu0 %2509, %v3260_v40   ;;  %v2376_v7 = vmul.f32 -1.442695, %v549_v46 }
 0x1a5   : > { %v3266_v48 = vpop.permute.xlu1 %702  ;;  %v3268_v43 = vpop.permute.xlu0 %1568 }
 0x1a6   : > { %5223 = vst [vmem:[#allocation51_spill] sm:$0xff] %v3266_v48  ;;  %5224 = vst [vmem:[#allocation52_spill] sm:$0xff] %v3268_v43  ;;  %v5229_v48 = vmov 5   ;;  %2585 = vpow2.f32 %v2376_v7 }
 0x1a7   : > { %2508 = vset.pattern.permute.xlu1 %v5225_v8 }
 0x1a8   : > { %913 = vperm.xlu1 %2508, %v3260_v40   ;;  %2511 = vset.pattern.permute.xlu0 %v5226_v23 }
 0x1a9   : > { %v3275_v62 = vpop.permute.xlu1 %837  ;;  %v3277_v11 = vpop.permute.xlu0 %1701  ;;  %1165 = vperm.xlu0 %2511, %v2874_v27  }
 0x1aa   : > { %5227 = vst [vmem:[#allocation53_spill] sm:$0xff] %v3275_v62  ;;  %5228 = vst [vmem:[#allocation54_spill] sm:$0xff] %v3277_v11 }
 0x1ac   : > { %2510 = vset.pattern.permute.xlu1 %v5229_v48  ;;  %v2584_v59 = vpop.eup %2583 }
 0x1ad   : > { %1370 = vperm.xlu1 %2510, %v2901_v32   ;;  %v3282_v9 = vpop.permute.xlu1 %1302  ;;  %v3284_v5 = vpop.permute.xlu0 %954  ;;  %1173 = vperm.xlu0 %2511, %v2901_v32   ;;  %v618_v7 = vadd.f32 1.0, %v2584_v59 }
 0x1ae   : > { %5230 = vst [vmem:[#allocation55_spill] sm:$0xff] %v3282_v9  ;;  %5231 = vst [vmem:[#allocation56_spill] sm:$0xff] %v3284_v5 }
 0x1af   : > { %2587 = vrcp.f32 %v618_v7 }
 0x1b0   : > { %v2586_v5 = vpop.eup %2585 }
 0x1b1   : > { %1374 = vperm.xlu1 %2510, %v2866_v25   ;;  %v3288_v8 = vpop.permute.xlu1 %1435  ;;  %v3290_v11 = vpop.permute.xlu0 %1089  ;;  %1689 = vrot.lane.b32.xlu0 %v3078_v16, %s2703_s24  ;;  %v617_v43 = vadd.f32 1.0, %v2586_v5  ;;  %v553_v5 = vadd.f32 %v2972_v12, %v2934_v38  ;;  %v2379_v38 = vmul.f32 -1.442695, %v555_v49 }
 0x1b2   : > { %5232 = vst [vmem:[#allocation57_spill] sm:$0xff] %v3288_v8  ;;  %5233 = vst [vmem:[#allocation58_spill] sm:$0xff] %v3290_v11 }
 0x1b3   : > { %2589 = vrcp.f32 %v617_v43  ;;  %v2378_v50 = vmul.f32 -1.442695, %v553_v5 }
 0x1b5   : > { %1097 = vrot.lane.b32.xlu1 %v3188_v21, %s2698_s16  ;;  %v3296_v62 = vpop.permute.xlu1 %1570  ;;  %v3298_v9 = vpop.permute.xlu0 %970  ;;  %1705 = vrot.lane.b32.xlu0 %v3105_v3, %s2703_s24  ;;  %2591 = vpow2.f32 %v2378_v50 }
 0x1b6   : > { %5234 = vst [vmem:[#allocation59_spill] sm:$0xff] %v3296_v62  ;;  %5235 = vst [vmem:[#allocation60_spill] sm:$0xff] %v3298_v9  ;;  %2512 = vset.pattern.permute.xlu1 %v5210_v31  ;;  %v5238_v31 = vmov 4   ;;  %2593 = vpow2.f32 %v2379_v38 }
 0x1b9   : > { %1113 = vrot.lane.b32.xlu1 %v3212_v2, %s2698_s16  ;;  %v3305_v11 = vpop.permute.xlu1 %1703  ;;  %v3307_v8 = vpop.permute.xlu0 %1105  ;;  %1181 = vperm.xlu0 %2511, %v3260_v40  }
 0x1ba   : > { %5236 = vst [vmem:[#allocation61_spill] sm:$0xff] %v3305_v11  ;;  %5237 = vst [vmem:[#allocation62_spill] sm:$0xff] %v3307_v8  ;;  %v2588_v52 = vpop.eup %2587 }
 0x1bb   : > { %v3333_v43 = vmul.f32 %v2588_v52, %v551_v55  ;;  %v1822_v52 = vld [vmem:[%s4979_s4 + $0x10] sm:$0xff] }
 0x1bd   : > { %1558 = vrot.lane.b32.xlu1 %v3093_v4, %s2702_s22  ;;  %v3312_v62 = vpop.permute.xlu1 %688  ;;  %v3314_v9 = vpop.permute.xlu0 %823  ;;  %2515 = vset.pattern.permute.xlu0 %v5238_v31  ;;  %5240 = vst [vmem:[#allocation64_spill] sm:$0xff] %v3333_v43 }
 0x1be   : > { %1221 = vperm.xlu0 %2515, %v2838_v19   ;;  %v2590_v13 = vpop.eup %2589 }
 0x1bf   : > { %v3348_v55 = vmul.f32 %v2590_v13, %v549_v46 }
 0x1c1   : > { %1574 = vrot.lane.b32.xlu1 %v3127_v56, %s2702_s22  ;;  %v3320_v59 = vpop.permute.xlu1 %956  ;;  %v3322_v11 = vpop.permute.xlu0 %1091  ;;  %5243 = vst [vmem:[#allocation66_spill] sm:$0xff] %v3348_v55 }
 0x1c2   : > { %1229 = vperm.xlu0 %2515, %v2874_v27  }
 0x1c5   : > { %1052 = vperm.xlu1 %2512, %v3186_v18   ;;  %v3328_v7 = vpop.permute.xlu1 %690  ;;  %v3330_v8 = vpop.permute.xlu0 %1288 }
 0x1c6   : > { %5239 = vst [vmem:[#allocation63_spill] sm:$0xff] %v3328_v7  ;;  %1237 = vperm.xlu0 %2515, %v2901_v32  }
 0x1c9   : > { %2513 = vset.pattern.permute.xlu1 %v5241_v36  ;;  %v3338_v27 = vpop.permute.xlu1 %825  ;;  %v3340_v12 = vpop.permute.xlu0 %1421 }
 0x1ca   : > { %5242 = vst [vmem:[#allocation65_spill] sm:$0xff] %v3338_v27  ;;  %1505 = vperm.xlu1 %2513, %v2901_v32   ;;  %712 = vrot.lane.b32.xlu0 %v3333_v43, %s2697_s15  ;;  %v5245_v27 = vmov 0  }
 0x1cd   : > { %v3350_v14 = vpop.permute.xlu1 %958  ;;  %v3352_v7 = vpop.permute.xlu0 %704 }
 0x1ce   : > { %5244 = vst [vmem:[#allocation67_spill] sm:$0xff] %v3350_v14  ;;  %2514 = vset.pattern.permute.xlu1 %v5245_v27  ;;  %831 = vrot.lane.b32.xlu0 %v3348_v55, %s2699_s19  ;;  %v2592_v14 = vpop.eup %2591 }
 0x1cf   : > { %1840 = vperm.xlu1 %2514, %v1822_v52   ;;  %v619_v38 = vadd.f32 1.0, %v2592_v14  ;;  %v2594_v34 = vpop.eup %2593 }
 0x1d1   : > { %v3360_v51 = vpop.permute.xlu1 %1093  ;;  %v3362_v13 = vpop.permute.xlu0 %839  ;;  %2595 = vrcp.f32 %v619_v38 }
 0x1d2   : > { %5246 = vst [vmem:[#allocation68_spill] sm:$0xff] %v3360_v51  ;;  %847 = vrot.lane.b32.xlu0 %v3333_v43, %s2699_s19 }
 0x1d3   : > { %1845 = vperm.xlu1 %2514, %v1823_v54  }
 0x1d5   : > { %v3366_v50 = vpop.permute.xlu1 %1290  ;;  %v3368_v46 = vpop.permute.xlu0 %972 }
 0x1d6   : > { %5247 = vst [vmem:[#allocation69_spill] sm:$0xff] %v3366_v50  ;;  %1292 = vrot.lane.b32.xlu0 %v3145_v37, %s2700_s20  ;;  %v620_v50 = vadd.f32 1.0, %v2594_v34 }
 0x1d7   : > { %1691 = vrot.lane.b32.xlu1 %v3093_v4, %s2703_s24 }
 0x1d8   : > { %2516 = vset.pattern.permute.xlu1 %v5226_v23  ;;  %2597 = vrcp.f32 %v620_v50 }
 0x1d9   : > { %v3375_v52 = vpop.permute.xlu1 %706  ;;  %v3377_v51 = vpop.permute.xlu0 %1107 }
 0x1da   : > { %5248 = vst [vmem:[#allocation70_spill] sm:$0xff] %v3375_v52  ;;  %1308 = vrot.lane.b32.xlu0 %v3153_v26, %s2700_s20  ;;  %v5251_v52 = vmov 7  }
 0x1db   : > { %1707 = vrot.lane.b32.xlu1 %v3127_v56, %s2703_s24  ;;  %v2596_v38 = vpop.eup %2595 }
 0x1dd   : > { %v3383_v54 = vpop.permute.xlu1 %841  ;;  %v3387_v23 = vpop.permute.xlu0 %1304 }
 0x1de   : > { %5249 = vst [vmem:[#allocation71_spill] sm:$0xff] %v3383_v54  ;;  %1245 = vperm.xlu0 %2515, %v3260_v40  }
 0x1df   : > { %1185 = vperm.xlu1 %2516, %v3186_v18  }
 0x1e1   : > { %v3389_v14 = vpop.permute.xlu1 %974  ;;  %v3397_v34 = vpop.permute.xlu0 %827 }
 0x1e2   : > { %5250 = vst [vmem:[#allocation72_spill] sm:$0xff] %v3389_v14  ;;  %2518 = vset.pattern.permute.xlu0 %v5229_v48  ;;  %5253 = vst [vmem:[#allocation74_spill] sm:$0xff] %v3397_v34  ;;  %v3406_v14 = vmul.f32 %v2596_v38, %v553_v5 }
 0x1e3   : > { %2517 = vset.pattern.permute.xlu1 %v5251_v52  ;;  %1354 = vperm.xlu0 %2518, %v2838_v19   ;;  %v2598_v19 = vpop.eup %2597 }
 0x1e4   : > { %1638 = vperm.xlu1 %2517, %v2901_v32  }
 0x1e5   : > { %v3395_v54 = vpop.permute.xlu1 %1109  ;;  %v3408_v56 = vpop.permute.xlu0 %708 }
 0x1e6   : > { %5252 = vst [vmem:[#allocation73_spill] sm:$0xff] %v3395_v54  ;;  %5255 = vst [vmem:[#allocation76_spill] sm:$0xff] %v3408_v56  ;;  %v3416_v54 = vmul.f32 %v2598_v19, %v555_v49 }
 0x1e7   : > { %980 = vrot.lane.b32.xlu0 %v3333_v43, %s2696_s14 }
 0x1e8   : > { %696 = vrot.lane.b32.xlu1 %v3348_v55, %s2697_s15 }
 0x1e9   : > { %v3403_v50 = vpop.permute.xlu1 %1306  ;;  %2519 = vset.pattern.permute.xlu1 %v5238_v31  ;;  %v3424_v5 = vpop.permute.xlu0 %843 }
 0x1ea   : > { %5254 = vst [vmem:[#allocation75_spill] sm:$0xff] %v3403_v50  ;;  %5258 = vst [vmem:[#allocation79_spill] sm:$0xff] %v3424_v5  ;;  %v5266_v50 = vmov 8  }
 0x1eb   : > { %1425 = vrot.lane.b32.xlu0 %v3145_v37, %s2701_s21 }
 0x1ec   : > { %698 = vrot.lane.b32.xlu1 %v3406_v14, %s2697_s15 }
 0x1ed   : > { %v3414_v34 = vpop.permute.xlu1 %692  ;;  %v3431_v56 = vpop.permute.xlu0 %976 }
 0x1ee   : > { %5256 = vst [vmem:[#allocation77_spill] sm:$0xff] %v3414_v34  ;;  %5260 = vst [vmem:[#allocation81_spill] sm:$0xff] %v3431_v56 }
 0x1ef   : > { %1441 = vrot.lane.b32.xlu0 %v3153_v26, %s2701_s21 }
 0x1f0   : > { %714 = vrot.lane.b32.xlu1 %v3416_v54, %s2697_s15 }
 0x1f1   : > { %v3422_v31 = vpop.permute.xlu1 %960  ;;  %v3442_v19 = vpop.permute.xlu0 %1437 }
 0x1f2   : > { %5257 = vst [vmem:[#allocation78_spill] sm:$0xff] %v3422_v31 }
 0x1f3   : > { %1378 = vperm.xlu0 %2518, %v3260_v40  }
 0x1f4   : > { %833 = vrot.lane.b32.xlu1 %v3406_v14, %s2699_s19 }
 0x1f5   : > { %v3429_v38 = vpop.permute.xlu1 %694 }
 0x1f6   : > { %5259 = vst [vmem:[#allocation80_spill] sm:$0xff] %v3429_v38 }
 0x1f7   : > { %2521 = vset.pattern.permute.xlu0 %v5241_v36 }
 0x1f8   : > { %849 = vrot.lane.b32.xlu1 %v3416_v54, %s2699_s19  ;;  %1501 = vperm.xlu0 %2521, %v2849_v22  }
 0x1f9   : > { %v3437_v49 = vpop.permute.xlu1 %829 }
 0x1fa   : > { %5261 = vst [vmem:[#allocation82_spill] sm:$0xff] %v3437_v49  ;;  %v5281_v49 = vmov 0 }
 0x1fc   : > { %1294 = vrot.lane.b32.xlu1 %v3188_v21, %s2700_s20  ;;  %1509 = vperm.xlu0 %2521, %v2866_v25  }
 0x1fd   : > { %v3444_v31 = vpop.permute.xlu1 %962 }
 0x1fe   : > { %5262 = vst [vmem:[#allocation83_spill] sm:$0xff] %v3444_v31 }
 0x200   : > { %1310 = vrot.lane.b32.xlu1 %v3212_v2, %s2700_s20  ;;  %1101 = vrot.lane.b32.xlu0 %v3406_v14, %s2698_s16 }
 0x201   : > { %v3455_v34 = vpop.permute.xlu1 %710 }
 0x202   : > { %v3450_v56 = vpop.permute.xlu0 %917  ;;  %5264 = vst [vmem:[#allocation85_spill] sm:$0xff] %v3455_v34  ;;  %v2671_v34 = vld [vmem:[%s4978_s3 + $0x8] sm:$0xff] }
 0x203   : > { %5263 = vst [vmem:[#allocation84_spill] sm:$0xff] %v3450_v56 }
 0x204   : > { %1249 = vperm.xlu1 %2519, %v3186_v18   ;;  %1117 = vrot.lane.b32.xlu0 %v3416_v54, %s2698_s16 }
 0x205   : > { %v3465_v61 = vpop.permute.xlu1 %845 }
 0x206   : > { %5268 = vst [vmem:[#allocation88_spill] sm:$0xff] %v3465_v61 }
 0x207   : > { %v3457_v5 = vpop.permute.xlu0 %1028 }
 0x208   : > { %5265 = vst [vmem:[#allocation86_spill] sm:$0xff] %v3457_v5  ;;  %2520 = vset.pattern.permute.xlu1 %v5266_v50  ;;  %1562 = vrot.lane.b32.xlu0 %v3188_v21, %s2702_s22 }
 0x209   : > { %1773 = vperm.xlu1 %2520, %v2901_v32   ;;  %v3475_v5 = vpop.permute.xlu1 %978 }
 0x20a   : > { %5270 = vst [vmem:[#allocation90_spill] sm:$0xff] %v3475_v5 }
 0x20b   : > { %v3463_v4 = vpop.permute.xlu0 %1036 }
 0x20c   : > { %5267 = vst [vmem:[#allocation87_spill] sm:$0xff] %v3463_v4  ;;  %1578 = vrot.lane.b32.xlu0 %v3212_v2, %s2702_s22 }
 0x20d   : > { %964 = vrot.lane.b32.xlu1 %v3348_v55, %s2696_s14 }
 0x20e   : > { %2522 = vset.pattern.permute.xlu1 %v5229_v48 }
 0x20f   : > { %v3471_v56 = vpop.permute.xlu0 %1040 }
 0x210   : > { %5269 = vst [vmem:[#allocation89_spill] sm:$0xff] %v3471_v56  ;;  %1517 = vperm.xlu0 %2521, %v3186_v18   ;;  %v3487_v56 = vpop.permute.xlu1 %1423 }
 0x211   : > { %966 = vrot.lane.b32.xlu1 %v3406_v14, %s2696_s14  ;;  %5273 = vst [vmem:[#allocation93_spill] sm:$0xff] %v3487_v56 }
 0x213   : > { %v3479_v32 = vpop.permute.xlu0 %1095 }
 0x214   : > { %5271 = vst [vmem:[#allocation91_spill] sm:$0xff] %v3479_v32  ;;  %2524 = vset.pattern.permute.xlu0 %v5251_v52  ;;  %v3494_v31 = vpop.permute.xlu1 %1439 }
 0x215   : > { %982 = vrot.lane.b32.xlu1 %v3416_v54, %s2696_s14  ;;  %1626 = vperm.xlu0 %2524, %v2822_v15   ;;  %5274 = vst [vmem:[#allocation94_spill] sm:$0xff] %v3494_v31 }
 0x217   : > { %v3485_v4 = vpop.permute.xlu0 %1111 }
 0x218   : > { %5272 = vst [vmem:[#allocation92_spill] sm:$0xff] %v3485_v4  ;;  %v5080_v4 = vlaneseq }
 0x219   : > { %1427 = vrot.lane.b32.xlu1 %v3188_v21, %s2701_s21  ;;  %1634 = vperm.xlu0 %2524, %v2849_v22  }
 0x21b   : > { %v3492_v48 = vpop.permute.xlu0 %1556 }
 0x21d   : > { %1443 = vrot.lane.b32.xlu1 %v3212_v2, %s2701_s21  ;;  %1642 = vperm.xlu0 %2524, %v2866_v25   ;;  %v3513_v25 = vand.u32 127, %v5080_v4 }
 0x21f   : > { %v3499_v32 = vpop.permute.xlu0 %1572  ;;  %v672_v4 = vand.u32 15, %v3513_v25  ;;  %vm5107_vm5 = vcmp.lt.s32.totalorder %v3513_v25, 15  ;;  %vm5112_vm6 = vcmp.lt.s32.totalorder %v3513_v25, 16  ;;  %vm5108_vm8 = vcmp.lt.s32.totalorder %v3513_v25, 17 }
 0x220   : > { %v862_v61 = vsel %vm5112_vm6, %v3362_v13, %v3314_v9  ;;  %vm5105_vm11 = vcmp.lt.s32.totalorder %v3513_v25, 111  ;;  %v987_v17 = vsel %vm5107_vm5, %v3320_v59, %v3368_v46  ;;  %v995_v39 = vsel %vm5107_vm5, %v3368_v46, %v3320_v59 }
 0x221   : > { %1382 = vperm.xlu1 %2522, %v3186_v18   ;;  %1693 = vrot.lane.b32.xlu0 %v3145_v37, %s2703_s24  ;;  %vm3548_vm2 = vcmp.le.s32.totalorder %v672_v4, 14  ;;  %vm3569_vm7 = vcmp.ge.s32.totalorder %v672_v4, 1  ;;  %vm5106_vm15 = vcmp.lt.s32.totalorder %v3513_v25, 1  ;;  %vm5109_vm0 = vcmp.lt.s32.totalorder %v3513_v25, 127 }
 0x222   : > { %v3504_v15 = vpop.permute.xlu1 %800  ;;  %vm5110_vm5 = vcmp.lt.s32.totalorder %v3513_v25, 113 }
 0x223   : > { %5275 = vst [vmem:[#allocation95_spill] sm:$0xff] %v3504_v15  ;;  %v3506_v22 = vpop.permute.xlu0 %1048 }
 0x224   : > { %5276 = vst [vmem:[#allocation96_spill] sm:$0xff] %v3506_v22  ;;  %v3524_v22 = vadd.s32 128, %v3513_v25 }
 0x225   : > { %1099 = vrot.lane.b32.xlu1 %v3348_v55, %s2698_s16  ;;  %1709 = vrot.lane.b32.xlu0 %v3153_v26, %s2703_s24 }
 0x226   : > { %2523 = vset.pattern.permute.xlu1 %v5241_v36  ;;  %v673_v36 = vand.u32 15, %v3524_v22  ;;  %v5091_v38 = vshra.s32 %v3524_v22, 4 }
 0x227   : > { %v3515_v56 = vpop.permute.xlu1 %913 }
 0x228   : > { %5277 = vst [vmem:[#allocation97_spill] sm:$0xff] %v3515_v56  ;;  %v3518_v31 = vpop.permute.xlu0 %1165  ;;  %v5089_v56 = vshra.s32 %v3513_v25, 4  ;;  %vm3556_vm3 = vcmp.ge.s32.totalorder %v5091_v38, 1  ;;  %vm3560_vm4 = vcmp.le.s32.totalorder %v673_v36, 14  ;;  %v854_v38 = vsel %vm5112_vm6, %v3314_v9, %v3362_v13 }
 0x229   : > { %1115 = vrot.lane.b32.xlu1 %v3333_v43, %s2698_s16  ;;  %1646 = vperm.xlu0 %2524, %v3260_v40   ;;  %vm3590_vm10 = vcmp.ge.s32.totalorder %v673_v36, 1  ;;  %v719_v9 = vsel %vm5108_vm8, %v3312_v62, %v3352_v7  ;;  %v727_v13 = vsel %vm5108_vm8, %v3352_v7, %v3312_v62  ;;  %v5299_v36 = vmov 0  ;;  %vm3647_vm14 = vmand %vm3556_vm3, %vm3560_vm4 }
 0x22a   : > { %vm3544_vm1 = vcmp.ge.s32.totalorder %v5089_v56, 1  ;;  %v2672_v56 = vld [vmem:[%s4978_s3 + $0x18] sm:$0xff]  ;;  %vm3632_vm13 = vmand %vm3556_vm3, %vm3590_vm10  ;;  %v877_v46 = vsel %vm3556_vm3, %v854_v38, 0.0  ;;  %v1012_v24 = vsel %vm3647_vm14, %v987_v17, 0.0  ;;  %vm5111_vm8 = vcmp.lt.s32.totalorder %v3513_v25, 112 }
 0x22b   : > { %v5282_v49 = vsel %vm3544_vm1, 4294967295, %v5281_v49  ;;  %vm3586_vm9 = vmand %vm3544_vm1, %vm3548_vm2  ;;  %v5303_v42 = vsel %vm3632_vm13, 4294967295, %v5302_v42  ;;  %v876_v59 = vsel %vm3544_vm1, %v862_v61, 0.0  ;;  %v744_v38 = vsel %vm3632_vm13, %v719_v9, 0.0 }
 0x22c   : > { %v3526_v15 = vpop.permute.xlu1 %1370  ;;  %v3528_v5 = vpop.permute.xlu0 %1173  ;;  %5283 = vst [vmem:[#allocation101_spill] sm:$0xff] %v5282_v49  ;;  %vm3607_vm12 = vmand %vm3544_vm1, %vm3569_vm7  ;;  %v1011_v35 = vsel %vm3586_vm9, %v995_v39, 0.0  ;;  %v924_v28 = vmul.f32 %v2956_v63, %v876_v59  ;;  %v925_v44 = vmul.f32 %v2956_v63, %v877_v46  ;;  %v1130_v39 = vsel %vm5106_vm15, %v3377_v51, %v3322_v11  ;;  %v5489_v49 = vld [vmem:[#allocation8_spill] sm:$0xff] }
 0x22d   : > { %5278 = vst [vmem:[#allocation98_spill] sm:$0xff] %v3526_v15  ;;  %5279 = vst [vmem:[#allocation99_spill] sm:$0xff] %v3528_v5  ;;  %1560 = vrot.lane.b32.xlu1 %v3145_v37, %s2702_s22  ;;  %2526 = vset.pattern.permute.xlu0 %v5266_v50  ;;  %v5284_v37 = vmov 0  ;;  %v5300_v36 = vsel %vm3607_vm12, 4294967295, %v5299_v36  ;;  %v743_v61 = vsel %vm3607_vm12, %v727_v13, 0.0  ;;  %v1059_v17 = vmul.f32 %v2984_v33, %v1011_v35 }
 0x22e   : > { %1761 = vperm.xlu0 %2526, %v2671_v34   ;;  %v5285_v37 = vsel %vm3548_vm2, 4294967295, %v5284_v37  ;;  %v5287_v34 = vmov 0  ;;  %5301 = vst [vmem:[#allocation105_spill] sm:$0xff] %v5300_v36  ;;  %5304 = vst [vmem:[#allocation106_spill] sm:$0xff] %v5303_v42  ;;  %v807_v63 = vmul.f32 %v2948_v57, %v743_v61  ;;  %v1060_v59 = vmul.f32 %v2984_v33, %v1012_v24  ;;  %v5484_v42 = vld [vmem:[#allocation68_spill] sm:$0xff] }
 0x22f   : > { %5286 = vst [vmem:[#allocation102_spill] sm:$0xff] %v5285_v37  ;;  %v5288_v34 = vsel %vm3556_vm3, 4294967295, %v5287_v34  ;;  %v1144_v35 = vsel %vm3569_vm7, %v1130_v39, 0.0 }
 0x230   : > { %v3540_v15 = vpop.permute.xlu1 %1374  ;;  %v1690_v5 = vpop.permute.xlu0 %1689  ;;  %5289 = vst [vmem:[#allocation103_spill] sm:$0xff] %v5288_v34  ;;  %v940_v33 = vadd.f32 %v924_v28, %v807_v63  ;;  %v1192_v61 = vmul.f32 %v3518_v31, %v1144_v35  ;;  %v1327_v28 = vsel %vm5109_vm0, %v3387_v23, %v3330_v8 }
 0x231   : > { %5280 = vst [vmem:[#allocation100_spill] sm:$0xff] %v3540_v15  ;;  %1576 = vrot.lane.b32.xlu1 %v3153_v26, %s2702_s22  ;;  %v5290_v15 = vmov 0 }
 0x232   : > { %v5291_v15 = vsel %vm3560_vm4, 4294967295, %v5290_v15  ;;  %1769 = vperm.xlu0 %2526, %v2672_v56   ;;  %v5297_v56 = vmov 0  ;;  %v1075_v39 = vadd.f32 %v1059_v17, %v940_v33  ;;  %v1342_v17 = vsel %vm3560_vm4, %v1327_v28, 0.0 }
 0x233   : > { %5292 = vst [vmem:[#allocation104_spill] sm:$0xff] %v5291_v15  ;;  %v5298_v56 = vsel %vm3590_vm10, 4294967295, %v5297_v56  ;;  %v5323_v28 = vmov 0 }
 0x234   : > { %v1098_v45 = vpop.permute.xlu1 %1097  ;;  %v1706_v20 = vpop.permute.xlu0 %1705 }
 0x235   : > { %v3621_v62 = vsel %vm5105_vm11, %v1690_v5, %v1706_v20  ;;  %v3625_v7 = vsel %vm5105_vm11, %v1706_v20, %v1690_v5  ;;  %1513 = vperm.xlu1 %2523, %v3260_v40   ;;  %v2673_v20 = vld [vmem:[%s4978_s3 + $0x28] sm:$0xff]  ;;  %v5305_v5 = vmov 0 }
 0x236   : > { %1777 = vperm.xlu0 %2526, %v2673_v20   ;;  %v5306_v5 = vsel %vm3647_vm14, 4294967295, %v5305_v5  ;;  %v1824_v20 = vld [vmem:[%s4979_s4 + $0x20] sm:$0xff] }
 0x238   : > { %v1114_v41 = vpop.permute.xlu1 %1113  ;;  %v3671_v9 = vpop.permute.xlu0 %1181 }
 0x239   : > { %v3665_v30 = vsel %vm5106_vm15, %v1098_v45, %v1114_v41  ;;  %v3669_v13 = vsel %vm5106_vm15, %v1114_v41, %v1098_v45  ;;  %5308 = vst [vmem:[#allocation108_spill] sm:$0xff] %v3671_v9  ;;  %2525 = vset.pattern.permute.xlu1 %v5245_v27  ;;  %v1122_v41 = vsel %vm5106_vm15, %v3322_v11, %v3377_v51  ;;  %v1825_v9 = vld [vmem:[%s4979_s4 + $0x28] sm:$0xff]  ;;  %v5310_v51 = vmov 0 }
 0x23a   : > { %5307 = vst [vmem:[#allocation107_spill] sm:$0xff] %v3665_v30  ;;  %1850 = vperm.xlu1 %2525, %v1824_v20   ;;  %1298 = vrot.lane.b32.xlu0 %v3406_v14, %s2700_s20  ;;  %v808_v45 = vmul.f32 %v2948_v57, %v744_v38  ;;  %v5309_v30 = vshra.s32 %v3513_v25, 4  ;;  %v1319_v57 = vsel %vm5109_vm0, %v3330_v8, %v3387_v23  ;;  %v1145_v11 = vsel %vm3590_vm10, %v1122_v41, 0.0 }
 0x23b   : > { %v5313_v20 = vmov 0  ;;  %v1460_v8 = vsel %vm5110_vm5, %v3442_v19, %v3340_v12 }
 0x23c   : > { %v1559_v46 = vpop.permute.xlu1 %1558  ;;  %vm3696_vm11 = vcmp.le.s32.totalorder %v5309_v30, 14  ;;  %v941_v24 = vadd.f32 %v925_v44, %v808_v45  ;;  %v5312_v30 = vshra.s32 %v3524_v22, 4  ;;  %v1193_v44 = vmul.f32 %v3518_v31, %v1145_v11 }
 0x23d   : > { %v5311_v51 = vsel %vm3696_vm11, 4294967295, %v5310_v51  ;;  %v3709_v38 = vpop.permute.xlu0 %1221  ;;  %v1341_v22 = vsel %vm3548_vm2, %v1319_v57, 0.0  ;;  %v1452_v45 = vsel %vm5110_vm5, %v3340_v12, %v3442_v19  ;;  %vm3748_vm0 = vmand %vm3696_vm11, %vm3569_vm7  ;;  %v1587_v12 = vsel %vm5111_vm8, %v3492_v48, %v3499_v32 }
 0x23e   : > { %vm3713_vm15 = vcmp.le.s32.totalorder %v5312_v30, 14  ;;  %1855 = vperm.xlu1 %2525, %v1825_v9   ;;  %1314 = vrot.lane.b32.xlu0 %v3416_v54, %s2700_s20  ;;  %v1076_v41 = vadd.f32 %v1060_v59, %v941_v24  ;;  %v5317_v9 = vmov 0  ;;  %v1595_v19 = vsel %vm5111_vm8, %v3499_v32, %v3492_v48 }
 0x23f   : > { %v5314_v20 = vsel %vm3713_vm15, 4294967295, %v5313_v20  ;;  %v5318_v9 = vsel %vm3748_vm0, 4294967295, %v5317_v9  ;;  %v1208_v59 = vadd.f32 %v1192_v61, %v1075_v39  ;;  %vm3766_vm5 = vmand %vm3713_vm15, %vm3590_vm10  ;;  %v5320_v57 = vmov 0 }
 0x240   : > { %v1575_v63 = vpop.permute.xlu1 %1574  ;;  %5319 = vst [vmem:[#allocation111_spill] sm:$0xff] %v5318_v9  ;;  %v5321_v57 = vsel %vm3766_vm5, 4294967295, %v5320_v57  ;;  %v1209_v35 = vadd.f32 %v1193_v44, %v1076_v41  ;;  %v1476_v32 = vsel %vm3748_vm0, %v1452_v45, 0.0  ;;  %v1477_v48 = vsel %vm3766_vm5, %v1460_v8, 0.0  ;;  %vm3802_vm6 = vmand %vm3713_vm15, %vm3560_vm4 }
 0x241   : > { %v3738_v23 = vsel %vm5111_vm8, %v1559_v46, %v1575_v63  ;;  %v3742_v31 = vsel %vm5111_vm8, %v1575_v63, %v1559_v46  ;;  %v1230_v46 = vpop.permute.xlu0 %1229  ;;  %5322 = vst [vmem:[#allocation112_spill] sm:$0xff] %v5321_v57  ;;  %v1389_v61 = vmul.f32 %v3067_v53, %v1341_v22  ;;  %vm3788_vm8 = vmand %vm3696_vm11, %vm3548_vm2  ;;  %v1609_v44 = vsel %vm3696_vm11, %v1587_v12, 0.0  ;;  %v5575_v57 = vld [vmem:[#allocation32_spill] sm:$0xff] }
 0x242   : > { %5315 = vst [vmem:[#allocation109_spill] sm:$0xff] %v3738_v23  ;;  %5316 = vst [vmem:[#allocation110_spill] sm:$0xff] %v3742_v31  ;;  %v1256_v33 = vmul.f32 %v1230_v46, %v3078_v16  ;;  %v1257_v24 = vmul.f32 %v1230_v46, %v3105_v3  ;;  %1695 = vrot.lane.b32.xlu1 %v3188_v21, %s2703_s24  ;;  %1785 = vperm.xlu0 %2526, %v3186_v18   ;;  %v5324_v28 = vsel %vm3788_vm8, 4294967295, %v5323_v28  ;;  %v5448_v23 = vld [vmem:[#allocation9_spill] sm:$0xff]  ;;  %v5454_v31 = vld [vmem:[#allocation62_spill] sm:$0xff] }
 0x243   : > { %2527 = vset.pattern.permute.xlu1 %v5251_v52  ;;  %v1390_v16 = vmul.f32 %v3067_v53, %v1342_v17  ;;  %5325 = vst [vmem:[#allocation113_spill] sm:$0xff] %v5324_v28  ;;  %v1610_v52 = vsel %vm3713_vm15, %v1595_v19, 0.0  ;;  %v5327_v53 = vmov 0  ;;  %v1524_v22 = vmul.f32 %v3099_v0, %v1476_v32 }
 0x244   : > { %v3779_v11 = vpop.permute.xlu1 %1052  ;;  %v1272_v3 = vadd.f32 %v1256_v33, %v1208_v59  ;;  %v1273_v30 = vadd.f32 %v1257_v24, %v1209_v35  ;;  %v5328_v53 = vsel %vm3802_vm6, 4294967295, %v5327_v53  ;;  %v1525_v41 = vmul.f32 %v3099_v0, %v1477_v48  ;;  %v2674_v0 = vld [vmem:[%s4978_s3 + $0x20] sm:$0xff] }
 0x245   : > { %v3796_v39 = vpop.permute.xlu0 %1237  ;;  %5329 = vst [vmem:[#allocation115_spill] sm:$0xff] %v5328_v53  ;;  %v1744_v8 = vsel %vm3788_vm8, %v3621_v62, 0.0  ;;  %v1745_v17 = vsel %vm3802_vm6, %v3625_v7, 0.0  ;;  %v1657_v12 = vmul.f32 %v3147_v6, %v1609_v44  ;;  %v1658_v19 = vmul.f32 %v3147_v6, %v1610_v52 }
 0x246   : > { %5326 = vst [vmem:[#allocation114_spill] sm:$0xff] %v3796_v39  ;;  %v1405_v63 = vadd.f32 %v1389_v61, %v1272_v3  ;;  %v1406_v45 = vadd.f32 %v1390_v16, %v1273_v30  ;;  %1711 = vrot.lane.b32.xlu1 %v3212_v2, %s2703_s24  ;;  %2529 = vset.pattern.permute.xlu0 %v5245_v27  ;;  %vm5330_vm6 = vcmp.lt.s32.totalorder %v3513_v25, 16  ;;  %vm5332_vm15 = vcmp.lt.s32.totalorder %v3513_v25, 17 }
 0x247   : > { %785 = vperm.xlu0 %2529, %v2674_v0   ;;  %v1792_v33 = vmul.f32 %v3167_v1, %v1744_v8  ;;  %v1793_v7 = vmul.f32 %v3167_v1, %v1745_v17  ;;  %vm5331_vm8 = vmmov %vm5330_vm6  ;;  %v717_v44 = vsel %vm5332_vm15, %v3177_v29, %v3231_v47 }
 0x248   : > { %v1540_v46 = vadd.f32 %v1524_v22, %v1405_v63  ;;  %v1541_v35 = vadd.f32 %v1525_v41, %v1406_v45  ;;  %v860_v1 = vsel %vm5331_vm8, %v3239_v10, %v3192_v58  ;;  %vm5333_vm11 = vmmov %vm5332_vm15  ;;  %v5338_v45 = vld [vmem:[#allocation36_spill] sm:$0xff] }
 0x249   : > { %v3822_v59 = vpop.permute.xlu1 %1505  ;;  %v3824_v62 = vpop.permute.xlu0 %712  ;;  %v725_v52 = vsel %vm5333_vm11, %v3231_v47, %v3177_v29  ;;  %vm5336_vm8 = vmmov %vm5330_vm6  ;;  %v740_v47 = vsel %vm3632_vm13, %v717_v44, 0.0  ;;  %vm5339_vm11 = vcmp.lt.s32.totalorder %v3513_v25, 15 }
 0x24a   : > { %1650 = vperm.xlu1 %2527, %v3186_v18   ;;  %v1673_v24 = vadd.f32 %v1657_v12, %v1540_v46  ;;  %v1674_v32 = vadd.f32 %v1658_v19, %v1541_v35  ;;  %v852_v18 = vsel %vm5330_vm6, %v3192_v58, %v3239_v10  ;;  %v872_v10 = vsel %vm3544_vm1, %v860_v1, 0.0  ;;  %vm5340_vm15 = vmmov %vm5339_vm11  ;;  %v5341_v12 = vld [vmem:[#allocation33_spill] sm:$0xff] }
 0x24b   : > { %795 = vperm.xlu0 %2529, %v3260_v40   ;;  %v873_v58 = vsel %vm3556_vm3, %v852_v18, 0.0  ;;  %v739_v29 = vsel %vm3607_vm12, %v725_v52, 0.0  ;;  %v985_v8 = vsel %vm5339_vm11, %v5338_v45, %v3197_v60  ;;  %v993_v17 = vsel %vm5340_vm15, %v3197_v60, %v5338_v45  ;;  %v5344_v60 = vld [vmem:[#allocation37_spill] sm:$0xff]  ;;  %v1826_v52 = vld [vmem:[%s4979_s4 + $0x30] sm:$0xff] }
 0x24c   : > { %v1808_v6 = vadd.f32 %v1792_v33, %v1673_v24  ;;  %v1809_v48 = vadd.f32 %v1793_v7, %v1674_v32  ;;  %v920_v19 = vmul.f32 %v5341_v12, %v872_v10  ;;  %v921_v0 = vmul.f32 %v5341_v12, %v873_v58  ;;  %v5342_v33 = vld [vmem:[#allocation28_spill] sm:$0xff] }
 0x24d   : > { %v832_v61 = vpop.permute.xlu0 %831  ;;  %v803_v7 = vmul.f32 %v5342_v33, %v739_v29  ;;  %v804_v24 = vmul.f32 %v5342_v33, %v740_v47  ;;  %v1007_v32 = vsel %vm3586_vm9, %v993_v17, 0.0  ;;  %vm5347_vm11 = vcmp.lt.s32.totalorder %v3513_v25, 127  ;;  %v5355_v47 = vld [vmem:[#allocation4_spill] sm:$0xff] }
 0x24e   : > { %v1841_v16 = vpop.permute.xlu1 %1840  ;;  %1296 = vrot.lane.b32.xlu1 %v3348_v55, %s2700_s20  ;;  %vm5349_vm15 = vmmov %vm5347_vm11  ;;  %v1055_v45 = vmul.f32 %v5355_v47, %v1007_v32  ;;  %v5358_v32 = vld [vmem:[#allocation48_spill] sm:$0xff] }
 0x24f   : > { %v3832_v3 = vadd.f32 %v1841_v16, %v1808_v6  ;;  %v3834_v30 = vadd.f32 %v1841_v16, %v1809_v48  ;;  %2528 = vset.pattern.permute.xlu1 %v5266_v50  ;;  %1445 = vrot.lane.b32.xlu0 %v3333_v43, %s2701_s21  ;;  %v1008_v6 = vsel %vm3647_vm14, %v985_v8, 0.0  ;;  %v5343_v48 = vld [vmem:[#allocation39_spill] sm:$0xff]  ;;  %v936_v16 = vadd.f32 %v920_v19, %v803_v7 }
 0x250   : > { %v937_v18 = vadd.f32 %v921_v0, %v804_v24  ;;  %v1056_v8 = vmul.f32 %v5355_v47, %v1008_v6  ;;  %v5359_v6 = vld [vmem:[#allocation38_spill] sm:$0xff] }
 0x251   : > { %v848_v22 = vpop.permute.xlu0 %847  ;;  %v1071_v19 = vadd.f32 %v1055_v45, %v936_v16  ;;  %v5362_v16 = vld [vmem:[#allocation11_spill] sm:$0xff] }
 0x252   : > { %v3855_v41 = vpop.permute.xlu1 %1845  ;;  %v3863_v50 = vsel %vm5330_vm6, %v832_v61, %v848_v22  ;;  %v3867_v63 = vsel %vm5336_vm8, %v848_v22, %v832_v61  ;;  %1312 = vrot.lane.b32.xlu1 %v3333_v43, %s2700_s20  ;;  %vm5345_vm6 = vcmp.lt.s32.totalorder %v3513_v25, 1  ;;  %v1072_v0 = vadd.f32 %v1056_v8, %v937_v18 }
 0x253   : > { %5334 = vst [vmem:[#allocation116_spill] sm:$0xff] %v3855_v41  ;;  %5335 = vst [vmem:[#allocation117_spill] sm:$0xff] %v3863_v50  ;;  %1564 = vrot.lane.b32.xlu0 %v3348_v55, %s2702_s22  ;;  %v1120_v61 = vsel %vm5345_vm6, %v5344_v60, %v5343_v48  ;;  %v1253_v18 = vmul.f32 %v3709_v38, %v5362_v16  ;;  %v5369_v16 = vld [vmem:[#allocation82_spill] sm:$0xff] }
 0x254   : > { %5337 = vst [vmem:[#allocation118_spill] sm:$0xff] %v3867_v63  ;;  %vm5346_vm8 = vmmov %vm5345_vm6  ;;  %vm5351_vm6 = vcmp.lt.s32.totalorder %v3513_v25, 111  ;;  %v1141_v12 = vsel %vm3590_vm10, %v1120_v61, 0.0  ;;  %v5361_v61 = vld [vmem:[#allocation10_spill] sm:$0xff] }
 0x255   : > { %v1293_v46 = vpop.permute.xlu0 %1292 }
 0x256   : > { %v1692_v35 = vpop.permute.xlu1 %1691  ;;  %1781 = vperm.xlu1 %2528, %v3260_v40   ;;  %v1128_v40 = vsel %vm5346_vm8, %v5343_v48, %v5344_v60  ;;  %vm5353_vm8 = vmmov %vm5351_vm6  ;;  %v1317_v48 = vsel %vm5347_vm11, %v5359_v6, %v5358_v32 }
 0x257   : > { %1580 = vrot.lane.b32.xlu0 %v3333_v43, %s2702_s22  ;;  %v1140_v17 = vsel %vm3569_vm7, %v1128_v40, 0.0  ;;  %v1252_v40 = vmul.f32 %v3709_v38, %v5361_v61 }
 0x259   : > { %v1309_v1 = vpop.permute.xlu0 %1308 }
 0x25a   : > { %v1708_v44 = vpop.permute.xlu1 %1707  ;;  %v3909_v22 = vsel %vm5347_vm11, %v1293_v46, %v1309_v1  ;;  %v3913_v10 = vsel %vm5349_vm15, %v1309_v1, %v1293_v46  ;;  %1429 = vrot.lane.b32.xlu1 %v3348_v55, %s2701_s21  ;;  %vm5360_vm15 = vmmov %vm5347_vm11  ;;  %vm5370_vm11 = vcmp.lt.s32.totalorder %v3513_v25, 16 }
 0x25b   : > { %5348 = vst [vmem:[#allocation36_spill] sm:$0xff] %v3909_v22  ;;  %5350 = vst [vmem:[#allocation33_spill] sm:$0xff] %v3913_v10  ;;  %v3919_v58 = vsel %vm5351_vm6, %v1692_v35, %v1708_v44  ;;  %v3923_v29 = vsel %vm5353_vm8, %v1708_v44, %v1692_v35  ;;  %2530 = vset.pattern.permute.xlu1 %v5245_v27  ;;  %1860 = vperm.xlu0 %2529, %v1826_v52   ;;  %v5357_v35 = vld [vmem:[#allocation5_spill] sm:$0xff]  ;;  %v1337_v52 = vsel %vm3548_vm2, %v1317_v48, 0.0  ;;  %v5402_v10 = vld [vmem:[#allocation51_spill] sm:$0xff] }
 0x25c   : > { %5352 = vst [vmem:[#allocation28_spill] sm:$0xff] %v3919_v58  ;;  %5354 = vst [vmem:[#allocation39_spill] sm:$0xff] %v3923_v29  ;;  %v1188_v7 = vmul.f32 %v5357_v35, %v1140_v17  ;;  %v1189_v24 = vmul.f32 %v5357_v35, %v1141_v12  ;;  %v1325_v60 = vsel %vm5360_vm15, %v5358_v32, %v5359_v6  ;;  %vm5364_vm6 = vcmp.lt.s32.totalorder %v3513_v25, 17  ;;  %v5424_v29 = vld [vmem:[#allocation54_spill] sm:$0xff] }
 0x25d   : > { %v3932_v46 = vpop.permute.xlu0 %1245  ;;  %v1338_v47 = vsel %vm3560_vm4, %v1325_v60, 0.0  ;;  %vm5366_vm8 = vmmov %vm5364_vm6 }
 0x25e   : > { %5356 = vst [vmem:[#allocation37_spill] sm:$0xff] %v3932_v46  ;;  %v3934_v33 = vpop.permute.xlu1 %1185  ;;  %1431 = vrot.lane.b32.xlu1 %v3406_v14, %s2701_s21  ;;  %v1204_v1 = vadd.f32 %v1188_v7, %v1071_v19  ;;  %v1205_v44 = vadd.f32 %v1189_v24, %v1072_v0  ;;  %v2227_v7 = vld [vmem:[%s4985_s10 + $0x8] sm:$0xff]  ;;  %vm5371_vm15 = vmmov %vm5370_vm11  ;;  %v5396_v46 = vld [vmem:[#allocation40_spill] sm:$0xff] }
 0x25f   : > { %1699 = vrot.lane.b32.xlu0 %v3406_v14, %s2703_s24 }
 0x260   : > { %v1268_v17 = vadd.f32 %v1252_v40, %v1204_v1  ;;  %v1269_v12 = vadd.f32 %v1253_v18, %v1205_v44  ;;  %v5368_v40 = vld [vmem:[#allocation88_spill] sm:$0xff]  ;;  %v5372_v44 = vld [vmem:[#allocation85_spill] sm:$0xff] }
 0x261   : > { %v857_v18 = vsel %vm5370_vm11, %v5369_v16, %v5368_v40  ;;  %v865_v1 = vsel %vm5371_vm15, %v5368_v40, %v5369_v16  ;;  %vm5375_vm11 = vcmp.lt.s32.totalorder %v3513_v25, 113 }
 0x262   : > { %1447 = vrot.lane.b32.xlu1 %v3416_v54, %s2701_s21  ;;  %v1355_v45 = vpop.permute.xlu0 %1354  ;;  %vm5376_vm15 = vmmov %vm5375_vm11 }
 0x263   : > { %v3960_v8 = vpop.permute.xlu1 %1638  ;;  %v1385_v38 = vmul.f32 %v1355_v45, %v1337_v52  ;;  %v1386_v35 = vmul.f32 %v1355_v45, %v1338_v47  ;;  %1715 = vrot.lane.b32.xlu0 %v3416_v54, %s2703_s24  ;;  %v5373_v52 = vld [vmem:[#allocation80_spill] sm:$0xff] }
 0x264   : > { %5363 = vst [vmem:[#allocation4_spill] sm:$0xff] %v3960_v8  ;;  %v722_v47 = vsel %vm5364_vm6, %v5373_v52, %v5372_v44 }
 0x265   : > { %v3964_v19 = vadd.f32 %v1385_v38, %v1268_v17  ;;  %v3966_v0 = vadd.f32 %v1386_v35, %v1269_v12  ;;  %v882_v17 = vsel %vm3544_vm1, %v865_v1, 0.0  ;;  %v883_v12 = vsel %vm3556_vm3, %v857_v18, 0.0 }
 0x266   : > { %1566 = vrot.lane.b32.xlu1 %v3406_v14, %s2702_s22  ;;  %v3973_v24 = vpop.permute.xlu0 %980  ;;  %v750_v18 = vsel %vm3632_vm13, %v722_v47, 0.0 }
 0x267   : > { %v697_v32 = vpop.permute.xlu1 %696  ;;  %2235 = vperm.xlu0 %2529, %v2227_v7  }
 0x268   : > { %v3978_v6 = vsel %vm5364_vm6, %v697_v32, %v3824_v62  ;;  %v3983_v48 = vsel %vm5366_vm8, %v3824_v62, %v697_v32  ;;  %v1827_v62 = vld [vmem:[%s4979_s4 + $0x38] sm:$0xff]  ;;  %vm5374_vm8 = vmmov %vm5364_vm6 }
 0x269   : > { %5365 = vst [vmem:[#allocation5_spill] sm:$0xff] %v3978_v6  ;;  %5367 = vst [vmem:[#allocation48_spill] sm:$0xff] %v3983_v48  ;;  %v730_v45 = vsel %vm5374_vm8, %v5372_v44, %v5373_v52  ;;  %v5378_v52 = vld [vmem:[#allocation90_spill] sm:$0xff]  ;;  %v5386_v6 = vld [vmem:[#allocation20_spill] sm:$0xff] }
 0x26a   : > { %1582 = vrot.lane.b32.xlu1 %v3416_v54, %s2702_s22  ;;  %v1426_v60 = vpop.permute.xlu0 %1425  ;;  %vm5377_vm8 = vmmov %vm5364_vm6  ;;  %v749_v1 = vsel %vm3607_vm12, %v730_v45, 0.0  ;;  %s386_s22 = scalar_lea.vmem %s4986_s11, %s2403_s23 }
 0x26b   : > { %v699_v61 = vpop.permute.xlu1 %698  ;;  %v813_v48 = vmul.f32 %v5386_v6, %v749_v1 }
 0x26e   : > { %1865 = vperm.xlu1 %2530, %v1827_v62   ;;  %v1442_v38 = vpop.permute.xlu0 %1441 }
 0x26f   : > { %v715_v35 = vpop.permute.xlu1 %714  ;;  %v1454_v7 = vsel %vm5375_vm11, %v1426_v60, %v1442_v38  ;;  %v1462_v32 = vsel %vm5376_vm15, %v1442_v38, %v1426_v60  ;;  %v5379_v60 = vld [vmem:[#allocation83_spill] sm:$0xff]  ;;  %vm5380_vm11 = vcmp.lt.s32.totalorder %v3513_v25, 15 }
 0x270   : > { %v724_v40 = vsel %vm5364_vm6, %v699_v61, %v715_v35  ;;  %v732_v16 = vsel %vm5377_vm8, %v715_v35, %v699_v61  ;;  %v1480_v62 = vsel %vm3748_vm0, %v1454_v7, 0.0  ;;  %v1481_v44 = vsel %vm3766_vm5, %v1462_v32, 0.0  ;;  %vm5381_vm15 = vmmov %vm5380_vm11  ;;  %v5384_v35 = vld [vmem:[#allocation35_spill] sm:$0xff] }
 0x271   : > { %v990_v38 = vsel %vm5380_vm11, %v5379_v60, %v5378_v52  ;;  %v998_v61 = vsel %vm5381_vm15, %v5378_v52, %v5379_v60  ;;  %v4035_v45 = vmul.f32 %v3822_v59, %v1480_v62  ;;  %v4038_v47 = vmul.f32 %v3822_v59, %v1481_v44 }
 0x272   : > { %v930_v7 = vmul.f32 %v5384_v35, %v882_v17  ;;  %v931_v32 = vmul.f32 %v5384_v35, %v883_v12  ;;  %1697 = vrot.lane.b32.xlu1 %v3348_v55, %s2703_s24  ;;  %v4044_v8 = vpop.permute.xlu0 %1378  ;;  %v814_v52 = vmul.f32 %v5386_v6, %v750_v18  ;;  %v1017_v62 = vsel %vm3586_vm9, %v998_v61, 0.0  ;;  %v5387_v12 = vld [vmem:[#allocation107_spill] sm:$0xff]  ;;  %v5401_v55 = vld [vmem:[#allocation41_spill] sm:$0xff] }
 0x273   : > { %5382 = vst [vmem:[#allocation38_spill] sm:$0xff] %v4035_v45  ;;  %5383 = vst [vmem:[#allocation10_spill] sm:$0xff] %v4038_v47  ;;  %v834_v27 = vpop.permute.xlu1 %833  ;;  %v1018_v59 = vsel %vm3647_vm14, %v990_v38, 0.0  ;;  %v1150_v17 = vsel %vm3569_vm7, %v3669_v13, 0.0  ;;  %v1151_v44 = vsel %vm3590_vm10, %v5387_v12, 0.0  ;;  %v753_v1 = vsel %vm3607_vm12, %v732_v16, 0.0 }
 0x274   : > { %5385 = vst [vmem:[#allocation11_spill] sm:$0xff] %v4044_v8  ;;  %v946_v60 = vadd.f32 %v930_v7, %v813_v48  ;;  %v947_v35 = vadd.f32 %v931_v32, %v814_v52  ;;  %v754_v6 = vsel %vm3632_vm13, %v724_v40, 0.0  ;;  %v5388_v38 = vld [vmem:[#allocation23_spill] sm:$0xff]  ;;  %vm5389_vm6 = vcmp.lt.s32.totalorder %v3513_v25, 16  ;;  %v2226_v40 = vld [vmem:[%s4985_s10] sm:$0xff]  ;;  %v5392_v16 = vld [vmem:[#allocation29_spill] sm:$0xff] }
 0x275   : > { %v1065_v61 = vmul.f32 %v5388_v38, %v1017_v62  ;;  %v1066_v13 = vmul.f32 %v5388_v38, %v1018_v59  ;;  %vm5390_vm8 = vmmov %vm5389_vm6  ;;  %v1198_v32 = vmul.f32 %v5392_v16, %v1150_v17  ;;  %v1199_v52 = vmul.f32 %v5392_v16, %v1151_v44  ;;  %v5393_v12 = vld [vmem:[#allocation95_spill] sm:$0xff] }
 0x276   : > { %1713 = vrot.lane.b32.xlu1 %v3333_v43, %s2703_s24  ;;  %v817_v38 = vmul.f32 %v5393_v12, %v753_v1  ;;  %v5395_v43 = vld [vmem:[#allocation50_spill] sm:$0xff]  ;;  %vm5397_vm11 = vcmp.lt.s32.totalorder %v3513_v25, 113 }
 0x277   : > { %v850_v18 = vpop.permute.xlu1 %849  ;;  %v4070_v7 = vpop.permute.xlu0 %1501  ;;  %v1450_v17 = vsel %vm5397_vm11, %v5396_v46, %v5395_v43  ;;  %vm5398_vm15 = vmmov %vm5397_vm11  ;;  %vm5414_vm11 = vcmp.lt.s32.totalorder %v3513_v25, 112 }
 0x278   : > { %v859_v8 = vsel %vm5389_vm6, %v834_v27, %v850_v18  ;;  %v867_v48 = vsel %vm5390_vm8, %v850_v18, %v834_v27  ;;  %5391 = vst [vmem:[#allocation88_spill] sm:$0xff] %v4070_v7  ;;  %v818_v27 = vmul.f32 %v5393_v12, %v754_v6  ;;  %v5394_v18 = vld [vmem:[#allocation84_spill] sm:$0xff]  ;;  %v1458_v44 = vsel %vm5398_vm15, %v5395_v43, %v5396_v46  ;;  %v5404_v43 = vld [vmem:[#allocation18_spill] sm:$0xff]  ;;  %vm5415_vm15 = vmmov %vm5414_vm11 }
 0x279   : > { %v886_v62 = vsel %vm3544_vm1, %v867_v48, 0.0  ;;  %v887_v59 = vsel %vm3556_vm3, %v859_v8, 0.0  ;;  %v5399_v48 = vld [vmem:[#allocation14_spill] sm:$0xff]  ;;  %v5400_v8 = vld [vmem:[#allocation7_spill] sm:$0xff]  ;;  %v1081_v6 = vadd.f32 %v1065_v61, %v946_v60  ;;  %vm5403_vm6 = vcmp.lt.s32.totalorder %v3513_v25, 17 }
 0x27a   : > { %v934_v47 = vmul.f32 %v5394_v18, %v886_v62  ;;  %v935_v45 = vmul.f32 %v5394_v18, %v887_v59  ;;  %v4095_v16 = vmul.f32 %v5400_v8, %v5399_v48  ;;  %2230 = vperm.xlu1 %2530, %v2226_v40   ;;  %v1082_v62 = vadd.f32 %v1066_v13, %v947_v35  ;;  %v5405_v48 = vld [vmem:[#allocation24_spill] sm:$0xff]  ;;  %v5406_v40 = vld [vmem:[#allocation17_spill] sm:$0xff]  ;;  %v5408_v60 = vld [vmem:[#allocation27_spill] sm:$0xff] }
 0x27b   : > { %v1295_v1 = vpop.permute.xlu1 %1294  ;;  %v4101_v18 = vpop.permute.xlu0 %1509  ;;  %v726_v22 = vsel %vm5403_vm6, %v5402_v10, %v5401_v55  ;;  %v4109_v46 = vmul.f32 %v5400_v8, %v5404_v43  ;;  %v4113_v50 = vmul.f32 %v5406_v40, %v5405_v48  ;;  %v1214_v13 = vadd.f32 %v1198_v32, %v1081_v6  ;;  %vm5411_vm8 = vmmov %vm5403_vm6  ;;  %v5412_v48 = vld [vmem:[#allocation52_spill] sm:$0xff] }
 0x27c   : > { %v4097_v12 = vadd.f32 %v934_v47, %v817_v38  ;;  %v4099_v59 = vadd.f32 %v935_v45, %v818_v27  ;;  %v4117_v47 = vmul.f32 %v5406_v40, %v5408_v60  ;;  %v5410_v45 = vld [vmem:[#allocation34_spill] sm:$0xff]  ;;  %v1215_v38 = vadd.f32 %v1199_v52, %v1082_v62 }
 0x27d   : > { %5407 = vst [vmem:[#allocation82_spill] sm:$0xff] %v4113_v50  ;;  %v1262_v35 = vmul.f32 %v5410_v45, %v3188_v21  ;;  %v1263_v61 = vmul.f32 %v5410_v45, %v3212_v2  ;;  %v1472_v27 = vsel %vm3748_vm0, %v1450_v17, 0.0  ;;  %v1473_v8 = vsel %vm3766_vm5, %v1458_v44, 0.0  ;;  %v5413_v40 = vld [vmem:[#allocation42_spill] sm:$0xff]  ;;  %v5418_v17 = vld [vmem:[#allocation53_spill] sm:$0xff]  ;;  %v5419_v44 = vld [vmem:[#allocation43_spill] sm:$0xff] }
 0x27e   : > { %5409 = vst [vmem:[#allocation85_spill] sm:$0xff] %v4117_v47  ;;  %v718_v43 = vsel %vm5411_vm8, %v5401_v55, %v5402_v10  ;;  %v1585_v21 = vsel %vm5414_vm11, %v5413_v40, %v5412_v48  ;;  %v741_v2 = vsel %vm3607_vm12, %v726_v22, 0.0  ;;  %v1593_v32 = vsel %vm5415_vm15, %v5412_v48, %v5413_v40 }
 0x27f   : > { %v1311_v60 = vpop.permute.xlu1 %1310  ;;  %vm5416_vm6 = vcmp.lt.s32.totalorder %v3513_v25, 127  ;;  %v1102_v10 = vpop.permute.xlu0 %1101  ;;  %vm5420_vm8 = vcmp.lt.s32.totalorder %v3513_v25, 16  ;;  %v1278_v48 = vadd.f32 %v1262_v35, %v1214_v13  ;;  %v1279_v40 = vadd.f32 %v1263_v61, %v1215_v38 }
 0x280   : > { %v1322_v52 = vsel %vm5416_vm6, %v1295_v1, %v1311_v60  ;;  %vm5417_vm14 = vmmov %vm5416_vm6  ;;  %v853_v6 = vsel %vm5420_vm8, %v5419_v44, %v5418_v17  ;;  %v742_v63 = vsel %vm3632_vm13, %v718_v43, 0.0  ;;  %vm5426_vm15 = vcmp.lt.s32.totalorder %v3513_v25, 111 }
 0x281   : > { %v1330_v55 = vsel %vm5417_vm14, %v1311_v60, %v1295_v1  ;;  %vm5421_vm11 = vmmov %vm5420_vm8  ;;  %v1347_v62 = vsel %vm3548_vm2, %v1322_v52, 0.0  ;;  %v5422_v1 = vld [vmem:[#allocation100_spill] sm:$0xff]  ;;  %vm5423_vm14 = vnez %v5311_v51  ;;  %v875_v13 = vsel %vm3556_vm3, %v853_v6, 0.0 }
 0x282   : > { %v861_v22 = vsel %vm5421_vm11, %v5418_v17, %v5419_v44  ;;  %v1348_v45 = vsel %vm3560_vm4, %v1330_v55, 0.0  ;;  %v1395_v60 = vmul.f32 %v5422_v1, %v1347_v62  ;;  %v1605_v41 = vsel %vm5423_vm14, %v1585_v21, 0.0  ;;  %v5425_v17 = vld [vmem:[#allocation44_spill] sm:$0xff]  ;;  %vm5427_vm6 = vmmov %vm5426_vm15  ;;  %v5429_v62 = vld [vmem:[#allocation55_spill] sm:$0xff] }
 0x283   : > { %v1396_v39 = vmul.f32 %v5422_v1, %v1348_v45  ;;  %v1718_v52 = vsel %vm5426_vm15, %v5425_v17, %v5424_v29  ;;  %v1726_v35 = vsel %vm5427_vm6, %v5424_v29, %v5425_v17  ;;  %v874_v61 = vsel %vm3544_vm1, %v861_v22, 0.0  ;;  %v4179_v21 = vpop.permute.xlu1 %1249  ;;  %v1118_v55 = vpop.permute.xlu0 %1117  ;;  %v5430_v45 = vld [vmem:[#allocation45_spill] sm:$0xff]  ;;  %v5436_v1 = vld [vmem:[#allocation3_spill] sm:$0xff] }
 0x284   : > { %v4175_v38 = vadd.f32 %v1395_v60, %v1278_v48  ;;  %vm5428_vm8 = vnez %v5314_v20  ;;  %vm5431_vm11 = vcmp.lt.s32.totalorder %v3513_v25, 127  ;;  %vm5432_vm15 = vcmp.lt.s32.totalorder %v3513_v25, 1 }
 0x285   : > { %v4177_v43 = vadd.f32 %v1396_v39, %v1279_v40  ;;  %v1606_v44 = vsel %vm5428_vm8, %v1593_v32, 0.0  ;;  %v1318_v29 = vsel %vm5431_vm11, %v5430_v45, %v5429_v62  ;;  %v1127_v22 = vsel %vm5432_vm15, %v1102_v10, %v1118_v55  ;;  %vm5433_vm6 = vmmov %vm5432_vm15 }
 0x286   : > { %v1135_v6 = vsel %vm5433_vm6, %v1118_v55, %v1102_v10  ;;  %vm5434_vm14 = vnez %v5324_v28  ;;  %vm5435_vm3 = vnez %v5328_v53  ;;  %v1155_v40 = vsel %vm3590_vm10, %v1127_v22, 0.0  ;;  %v5438_v22 = vld [vmem:[#allocation2_spill] sm:$0xff] }
 0x287   : > { %v1740_v39 = vsel %vm5434_vm14, %v1718_v52, 0.0  ;;  %v1741_v48 = vsel %vm5435_vm3, %v1726_v35, 0.0  ;;  %v1154_v32 = vsel %vm3569_vm7, %v1135_v6, 0.0  ;;  %v922_v60 = vmul.f32 %v5436_v1, %v874_v61  ;;  %v5437_v52 = vld [vmem:[#allocation12_spill] sm:$0xff] }
 0x288   : > { %v923_v17 = vmul.f32 %v5436_v1, %v875_v13  ;;  %v4202_v58 = vmul.f32 %v3934_v33, %v1154_v32  ;;  %v4205_v10 = vmul.f32 %v3934_v33, %v1155_v40  ;;  %v1520_v55 = vmul.f32 %v5437_v52, %v1472_v27  ;;  %v1563_v13 = vpop.permute.xlu0 %1562  ;;  %v5439_v33 = vld [vmem:[#allocation57_spill] sm:$0xff]  ;;  %v5440_v40 = vld [vmem:[#allocation46_spill] sm:$0xff] }
 0x289   : > { %v1521_v35 = vmul.f32 %v5437_v52, %v1473_v8  ;;  %v4213_v6 = vsel %vm5431_vm11, %v5429_v62, %v5430_v45  ;;  %v1339_v61 = vsel %vm3548_vm2, %v1318_v29, 0.0  ;;  %v805_v32 = vmul.f32 %v5438_v22, %v741_v2  ;;  %v4231_v62 = vpop.permute.xlu1 %1773  ;;  %v5446_v45 = vld [vmem:[#allocation16_spill] sm:$0xff]  ;;  %v5447_v52 = vld [vmem:[#allocation19_spill] sm:$0xff] }
 0x28a   : > { %v806_v1 = vmul.f32 %v5438_v22, %v742_v63  ;;  %vm5441_vm15 = vcmp.lt.s32.totalorder %v3513_v25, 113  ;;  %5445 = vst [vmem:[#allocation83_spill] sm:$0xff] %v4231_v62  ;;  %v1653_v29 = vmul.f32 %v5446_v45, %v1605_v41  ;;  %v1654_v2 = vmul.f32 %v5446_v45, %v1606_v44  ;;  %v5451_v45 = vld [vmem:[#allocation56_spill] sm:$0xff] }
 0x28b   : > { %v4223_v27 = vsel %vm5441_vm15, %v5440_v40, %v5439_v33  ;;  %vm5443_vm6 = vmmov %vm5441_vm15  ;;  %v4236_v63 = vmul.f32 %v5447_v52, %v1740_v39  ;;  %v1789_v22 = vmul.f32 %v5447_v52, %v1741_v48  ;;  %v4243_v7 = vmul.f32 %v5448_v23, %v1339_v61  ;;  %v5450_v39 = vld [vmem:[#allocation60_spill] sm:$0xff]  ;;  %v5453_v52 = vld [vmem:[#allocation58_spill] sm:$0xff] }
 0x28c   : > { %5442 = vst [vmem:[#allocation80_spill] sm:$0xff] %v4223_v27  ;;  %v4229_v8 = vsel %vm5443_vm6, %v5439_v33, %v5440_v40  ;;  %v938_v33 = vadd.f32 %v922_v60, %v805_v32  ;;  %v939_v40 = vadd.f32 %v923_v17, %v806_v1  ;;  %vm5452_vm11 = vcmp.lt.s32.totalorder %v3513_v25, 15  ;;  %v1579_v60 = vpop.permute.xlu0 %1578  ;;  %v5457_v32 = vld [vmem:[#allocation70_spill] sm:$0xff]  ;;  %v5458_v1 = vld [vmem:[#allocation63_spill] sm:$0xff] }
 0x28d   : > { %5444 = vst [vmem:[#allocation90_spill] sm:$0xff] %v4229_v8  ;;  %5449 = vst [vmem:[#allocation35_spill] sm:$0xff] %v4243_v7  ;;  %v986_v48 = vsel %vm5452_vm11, %v5451_v45, %v5450_v39  ;;  %vm5455_vm15 = vcmp.lt.s32.totalorder %v3513_v25, 1  ;;  %vm5459_vm3 = vcmp.lt.s32.totalorder %v3513_v25, 17  ;;  %vm5460_vm14 = vcmp.lt.s32.totalorder %v3513_v25, 112  ;;  %v965_v53 = vpop.permute.xlu1 %964  ;;  %v5471_v7 = vld [vmem:[#allocation47_spill] sm:$0xff] }
 0x28e   : > { %v1129_v61 = vsel %vm5455_vm15, %v5454_v31, %v5453_v52  ;;  %vm5456_vm6 = vmmov %vm5452_vm11  ;;  %v720_v44 = vsel %vm5459_vm3, %v5458_v1, %v5457_v32  ;;  %v4269_v41 = vsel %vm5460_vm14, %v1563_v13, %v1579_v60 }
 0x28f   : > { %v994_v17 = vsel %vm5456_vm6, %v5450_v39, %v5451_v45  ;;  %vm5461_vm11 = vmmov %vm5460_vm14  ;;  %v5463_v39 = vld [vmem:[#allocation65_spill] sm:$0xff]  ;;  %v5464_v45 = vld [vmem:[#allocation71_spill] sm:$0xff]  ;;  %vm5465_vm6 = vcmp.lt.s32.totalorder %v3513_v25, 16  ;;  %v1142_v37 = vsel %vm3569_vm7, %v1129_v61, 0.0 }
 0x290   : > { %v4273_v62 = vsel %vm5461_vm11, %v1579_v60, %v1563_v13  ;;  %vm5462_vm15 = vmmov %vm5459_vm3  ;;  %v863_v28 = vsel %vm5465_vm6, %v5464_v45, %v5463_v39  ;;  %vm5466_vm3 = vcmp.lt.s32.totalorder %v3513_v25, 15  ;;  %v5470_v60 = vld [vmem:[#allocation59_spill] sm:$0xff]  ;;  %v4320_v61 = vpop.permute.xlu0 %1517 }
 0x291   : > { %v728_v47 = vsel %vm5462_vm15, %v5457_v32, %v5458_v1  ;;  %v4286_v50 = vsel %vm5466_vm3, %v965_v53, %v3973_v24  ;;  %vm5468_vm14 = vmmov %vm5466_vm3  ;;  %v4297_v32 = vsel %vm5461_vm11, %v5471_v7, %v5470_v60  ;;  %vm5473_vm15 = vcmp.lt.s32.totalorder %v3513_v25, 1  ;;  %5477 = vst [vmem:[#allocation95_spill] sm:$0xff] %v4320_v61  ;;  %v5481_v61 = vld [vmem:[#allocation72_spill] sm:$0xff] }
 0x292   : > { %5467 = vst [vmem:[#allocation20_spill] sm:$0xff] %v4286_v50  ;;  %v4291_v13 = vsel %vm5468_vm14, %v3973_v24, %v965_v53  ;;  %5472 = vst [vmem:[#allocation23_spill] sm:$0xff] %v4297_v32  ;;  %v1121_v1 = vsel %vm5473_vm15, %v5453_v52, %v5454_v31  ;;  %v855_v53 = vsel %vm5465_vm6, %v5463_v39, %v5464_v45  ;;  %v1009_v50 = vsel %vm3586_vm9, %v994_v17, 0.0 }
 0x293   : > { %5469 = vst [vmem:[#allocation107_spill] sm:$0xff] %v4291_v13  ;;  %vm5474_vm3 = vmmov %vm5461_vm11  ;;  %vm5476_vm14 = vnez %v5306_v5  ;;  %v1537_v52 = vadd.f32 %v1521_v35, %v3966_v0  ;;  %v745_v13 = vsel %vm3607_vm12, %v728_v47, 0.0  ;;  %v746_v39 = vsel %vm3632_vm13, %v720_v44, 0.0  ;;  %v5480_v35 = vld [vmem:[#allocation67_spill] sm:$0xff]  ;;  %v5483_v44 = vld [vmem:[#allocation73_spill] sm:$0xff] }
 0x294   : > { %v4313_v24 = vsel %vm5474_vm3, %v5470_v60, %v5471_v7  ;;  %v1010_v31 = vsel %vm5476_vm14, %v986_v48, 0.0  ;;  %v878_v7 = vsel %vm3544_vm1, %v863_v28, 0.0  ;;  %v1536_v45 = vadd.f32 %v1520_v55, %v3964_v19  ;;  %v967_v60 = vpop.permute.xlu1 %966  ;;  %v5478_v48 = vld [vmem:[#allocation6_spill] sm:$0xff] }
 0x295   : > { %5475 = vst [vmem:[#allocation29_spill] sm:$0xff] %v4313_v24  ;;  %v1143_v17 = vsel %vm3590_vm10, %v1121_v1, 0.0  ;;  %v1190_v24 = vmul.f32 %v5478_v48, %v1142_v37  ;;  %vm5479_vm11 = vnez %v5288_v34  ;;  %vm5482_vm15 = vcmp.lt.s32.totalorder %v3513_v25, 15  ;;  %v5487_v55 = vld [vmem:[#allocation86_spill] sm:$0xff] }
 0x296   : > { %v879_v0 = vsel %vm5479_vm11, %v855_v53, 0.0  ;;  %v996_v47 = vsel %vm5482_vm15, %v5481_v61, %v5480_v35  ;;  %vm5485_vm6 = vcmp.lt.s32.totalorder %v3513_v25, 1  ;;  %v1057_v37 = vmul.f32 %v5487_v55, %v1009_v50  ;;  %v5488_v53 = vld [vmem:[#allocation30_spill] sm:$0xff] }
 0x297   : > { %v1123_v28 = vsel %vm5485_vm6, %v5484_v42, %v5483_v44  ;;  %vm5486_vm3 = vmmov %vm5485_vm6  ;;  %v1058_v1 = vmul.f32 %v5487_v55, %v1010_v31  ;;  %v809_v36 = vmul.f32 %v5488_v53, %v745_v13  ;;  %v810_v34 = vmul.f32 %v5488_v53, %v746_v39  ;;  %v4358_v31 = vpop.permute.xlu0 %1626 }
 0x298   : > { %v1131_v19 = vsel %vm5486_vm3, %v5483_v44, %v5484_v42  ;;  %v926_v32 = vmul.f32 %v5489_v49, %v878_v7  ;;  %v1670_v8 = vadd.f32 %v1654_v2, %v1537_v52  ;;  %v927_v27 = vmul.f32 %v5489_v49, %v879_v0  ;;  %v983_v44 = vpop.permute.xlu1 %982  ;;  %vm5490_vm6 = vmmov %vm5482_vm15 }
 0x299   : > { %v988_v23 = vsel %vm5482_vm15, %v5480_v35, %v5481_v61  ;;  %v1013_v42 = vsel %vm3586_vm9, %v996_v47, 0.0  ;;  %v1669_v50 = vadd.f32 %v1653_v29, %v1536_v45  ;;  %v1146_v13 = vsel %vm3569_vm7, %v1131_v19, 0.0  ;;  %vm5491_vm3 = vmmov %vm5490_vm6  ;;  %v5492_v45 = vld [vmem:[#allocation87_spill] sm:$0xff] }
 0x29a   : > { %v1147_v2 = vsel %vm3590_vm10, %v1123_v28, 0.0  ;;  %v992_v49 = vsel %vm5490_vm6, %v967_v60, %v983_v44  ;;  %v1000_v52 = vsel %vm5491_vm3, %v983_v44, %v967_v60  ;;  %v1073_v61 = vadd.f32 %v1057_v37, %v938_v33 }
 0x29b   : > { %v1074_v39 = vadd.f32 %v1058_v1, %v939_v40  ;;  %v1021_v29 = vsel %vm3586_vm9, %v1000_v52, 0.0  ;;  %v1022_v7 = vsel %vm5476_vm14, %v992_v49, 0.0  ;;  %v1061_v0 = vmul.f32 %v5492_v45, %v1013_v42  ;;  %v4378_v60 = vpop.permute.xlu0 %1634  ;;  %v5494_v49 = vld [vmem:[#allocation25_spill] sm:$0xff] }
 0x29c   : > { %v1069_v35 = vmul.f32 %v3779_v11, %v1021_v29  ;;  %v1070_v47 = vmul.f32 %v3779_v11, %v1022_v7  ;;  %v1805_v28 = vadd.f32 %v1789_v22, %v1670_v8  ;;  %v1191_v19 = vmul.f32 %v5478_v48, %v1143_v17  ;;  %v1428_v40 = vpop.permute.xlu1 %1427  ;;  %v5493_v11 = vld [vmem:[#allocation15_spill] sm:$0xff] }
 0x29d   : > { %v942_v55 = vadd.f32 %v926_v32, %v809_v36  ;;  %v1014_v33 = vsel %vm5476_vm14, %v988_v23, 0.0  ;;  %v1804_v37 = vadd.f32 %v4236_v63, %v1669_v50  ;;  %v943_v1 = vadd.f32 %v927_v27, %v810_v34 }
 0x29e   : > { %v1062_v53 = vmul.f32 %v5492_v45, %v1014_v33  ;;  %v1085_v42 = vadd.f32 %v1069_v35, %v4097_v12  ;;  %v1086_v44 = vadd.f32 %v1070_v47, %v4099_v59  ;;  %v1194_v8 = vmul.f32 %v5493_v11, %v1146_v13 }
 0x29f   : > { %v1195_v22 = vmul.f32 %v5493_v11, %v1147_v2  ;;  %v1206_v36 = vadd.f32 %v1190_v24, %v1073_v61  ;;  %v1207_v32 = vadd.f32 %v1191_v19, %v1074_v39  ;;  %v1077_v17 = vadd.f32 %v1061_v0, %v942_v55  ;;  %v1643_v50 = vpop.permute.xlu0 %1642 }
 0x2a0   : > { %v1218_v23 = vadd.f32 %v4202_v58, %v1085_v42  ;;  %v1219_v48 = vadd.f32 %v4205_v10, %v1086_v44  ;;  %v4389_v63 = vadd.f32 %v5494_v49, %v1805_v28  ;;  %v2384_v34 = vmul.f32 -1.442695, %v3832_v3  ;;  %v1444_v27 = vpop.permute.xlu1 %1443 }
 0x2a1   : > { %v1266_v12 = vmul.f32 %v4179_v21, %v3406_v14  ;;  %v1267_v59 = vmul.f32 %v4179_v21, %v3416_v54  ;;  %v4397_v24 = vadd.f32 %v5494_v49, %v1804_v37  ;;  %v1078_v13 = vadd.f32 %v1062_v53, %v943_v1 }
 0x2a2   : > { %v2385_v58 = vmul.f32 -1.442695, %v3834_v30  ;;  %vm5495_vm15 = vcmp.lt.s32.totalorder %v3513_v25, 113  ;;  %v2381_v29 = vmul.f32 -1.442695, %v4389_v63  ;;  %2599 = vpow2.f32 %v2384_v34  ;;  %v5508_v34 = vld [vmem:[#allocation13_spill] sm:$0xff] }
 0x2a3   : > { %v1455_v10 = vsel %vm5495_vm15, %v1428_v40, %v1444_v27  ;;  %vm5496_vm6 = vmmov %vm5495_vm15  ;;  %v4408_v21 = vadd.f32 %v1266_v12, %v1218_v23  ;;  %v4410_v52 = vadd.f32 %v1267_v59, %v1219_v48  ;;  %vm5497_vm3 = vnez %v5311_v51  ;;  %v4423_v35 = vpop.permute.xlu0 %1693  ;;  %v5506_v48 = vld [vmem:[#allocation80_spill] sm:$0xff]  ;;  %v5509_v59 = vld [vmem:[#allocation90_spill] sm:$0xff] }
 0x2a4   : > { %v1463_v2 = vsel %vm5496_vm6, %v1444_v27, %v1428_v40  ;;  %v1482_v14 = vsel %vm3748_vm0, %v1455_v10, 0.0  ;;  %v1615_v7 = vsel %vm5497_vm3, %v4269_v41, 0.0  ;;  %v1616_v45 = vsel %vm5428_vm8, %v4273_v62, 0.0  ;;  %v4421_v0 = vpop.permute.xlu1 %1382  ;;  %v5498_v41 = vld [vmem:[#allocation75_spill] sm:$0xff]  ;;  %v5499_v40 = vld [vmem:[#allocation69_spill] sm:$0xff] }
 0x2a5   : > { %v1483_v54 = vsel %vm3766_vm5, %v1463_v2, 0.0  ;;  %v1530_v61 = vmul.f32 %v4101_v18, %v1482_v14  ;;  %v2380_v47 = vmul.f32 -1.442695, %v4397_v24  ;;  %v5158_v28 = vmov 1065369472   ;;  %v5513_v2 = vld [vmem:[#allocation23_spill] sm:$0xff] }
 0x2a6   : > { %v1531_v39 = vmul.f32 %v4101_v18, %v1483_v54  ;;  %2036 = vmatprep.mubr.bf16.mxu1 %v5158_v28  ;;  %v1663_v55 = vmul.f32 %v1643_v50, %v1615_v7  ;;  %v1664_v33 = vmul.f32 %v1643_v50, %v1616_v45  ;;  %vm5500_vm15 = vcmp.lt.s32.totalorder %v3513_v25, 127  ;;  %v5511_v50 = vld [vmem:[#allocation102_spill] sm:$0xff]  ;;  %v5514_v54 = vld [vmem:[#allocation29_spill] sm:$0xff] }
 0x2a7   : > { %v1546_v18 = vadd.f32 %v1530_v61, %v4175_v38  ;;  %v1320_v62 = vsel %vm5500_vm15, %v5499_v40, %v5498_v41  ;;  %v1270_v37 = vadd.f32 %v4095_v16, %v1206_v36  ;;  %v1271_v1 = vadd.f32 %v4109_v46, %v1207_v32  ;;  %v5501_v38 = vld [vmem:[#allocation61_spill] sm:$0xff]  ;;  %v4447_v46 = vpop.permute.xlu0 %1709 }
 0x2a8   : > { %v1547_v19 = vadd.f32 %v1531_v39, %v4177_v43  ;;  %2601 = vpow2.f32 %v2385_v58  ;;  %v1210_v53 = vadd.f32 %v1194_v8, %v1077_v17  ;;  %v5502_v43 = vld [vmem:[#allocation49_spill] sm:$0xff]  ;;  %vm5503_vm6 = vcmp.lt.s32.totalorder %v3513_v25, 111  ;;  %v1100_v36 = vpop.permute.xlu1 %1099  ;;  %v5512_v58 = vld [vmem:[#allocation35_spill] sm:$0xff] }
 0x2a9   : > { %v4435_v42 = vadd.f32 %v1663_v55, %v1546_v18  ;;  %2603 = vpow2.f32 %v2381_v29  ;;  %v1719_v11 = vsel %vm5503_vm6, %v5502_v43, %v5501_v38  ;;  %v1328_v23 = vsel %vm5500_vm15, %v5498_v41, %v5499_v40  ;;  %v5505_v32 = vld [vmem:[#allocation9_spill] sm:$0xff]  ;;  %v5515_v29 = vld [vmem:[#allocation82_spill] sm:$0xff] }
 0x2aa   : > { %v4437_v44 = vadd.f32 %v1664_v33, %v1547_v19  ;;  %v1211_v16 = vadd.f32 %v1195_v22, %v1078_v13  ;;  %2605 = vpow2.f32 %v2380_v47  ;;  %v5504_v8 = vsel %vm3560_vm4, %v4213_v6, 0.0  ;;  %v5516_v47 = vld [vmem:[#allocation113_spill] sm:$0xff]  ;;  %v5518_v19 = vld [vmem:[#allocation22_spill] sm:$0xff] }
 0x2ab   : > { %v1388_v17 = vmul.f32 %v5505_v32, %v5504_v8  ;;  %v5507_v49 = vsel %vm3748_vm0, %v5506_v48, 0.0  ;;  %v5510_v22 = vsel %vm3766_vm5, %v5509_v59, 0.0  ;;  %v1343_v13 = vsel %vm3548_vm2, %v1320_v62, 0.0  ;;  %v5519_v33 = vld [vmem:[#allocation94_spill] sm:$0xff]  ;;  %v5520_v41 = vld [vmem:[#allocation93_spill] sm:$0xff]  ;;  %v5530_v59 = vld [vmem:[#allocation115_spill] sm:$0xff] }
 0x2ac   : > { %v1522_v12 = vmul.f32 %v5508_v34, %v5507_v49  ;;  %v1523_v27 = vmul.f32 %v5508_v34, %v5510_v22  ;;  %v1727_v6 = vsel %vm5503_vm6, %v5501_v38, %v5502_v43  ;;  %v1403_v10 = vadd.f32 %v5512_v58, %v1270_v37  ;;  %v5523_v37 = vld [vmem:[#allocation85_spill] sm:$0xff]  ;;  %v1116_v43 = vpop.permute.xlu1 %1115  ;;  %v2600_v32 = vpop.eup %2599  ;;  %v5527_v48 = vld [vmem:[#allocation74_spill] sm:$0xff] }
 0x2ad   : > { %v1607_v14 = vsel %vm5497_vm3, %v5513_v2, 0.0  ;;  %v1608_v61 = vsel %vm5428_vm8, %v5514_v54, 0.0  ;;  %v1344_v39 = vsel %vm3560_vm4, %v1328_v23, 0.0  ;;  %v1274_v7 = vadd.f32 %v5515_v29, %v1210_v53  ;;  %v4492_v53 = vpop.permute.xlu0 %1646  ;;  %v5532_v54 = vld [vmem:[#allocation88_spill] sm:$0xff]  ;;  %v5533_v29 = vld [vmem:[#allocation109_spill] sm:$0xff] }
 0x2ae   : > { %v1404_v45 = vadd.f32 %v1388_v17, %v1271_v1  ;;  %vm5517_vm15 = vnez %v5516_v47  ;;  %v1391_v55 = vmul.f32 %v5518_v19, %v1343_v13  ;;  %vm5521_vm6 = vcmp.lt.s32.totalorder %v3513_v25, 113  ;;  %5524 = vst [vmem:[#allocation84_spill] sm:$0xff] %v4492_v53  ;;  %v5567_v53 = vld [vmem:[#allocation114_spill] sm:$0xff] }
 0x2af   : > { %v1742_v18 = vsel %vm5517_vm15, %v1719_v11, 0.0  ;;  %v1453_v40 = vsel %vm5521_vm6, %v5520_v41, %v5519_v33  ;;  %vm5522_vm2 = vmmov %vm5521_vm6  ;;  %v1275_v38 = vadd.f32 %v5523_v37, %v1211_v16  ;;  %v1655_v1 = vmul.f32 %v4358_v31, %v1607_v14  ;;  %v5528_v16 = vld [vmem:[#allocation79_spill] sm:$0xff] }
 0x2b0   : > { %v1461_v62 = vsel %vm5522_vm2, %v5519_v33, %v5520_v41  ;;  %v1656_v11 = vmul.f32 %v4358_v31, %v1608_v61  ;;  %vm5525_vm4 = vcmp.lt.s32.totalorder %v3513_v25, 1  ;;  %v1392_v17 = vmul.f32 %v5518_v19, %v1344_v39  ;;  %v5534_v33 = vld [vmem:[#allocation110_spill] sm:$0xff] }
 0x2b1   : > { %v4498_v23 = vsel %vm5525_vm4, %v1100_v36, %v1116_v43  ;;  %vm5526_vm6 = vmmov %vm5525_vm4  ;;  %vm5529_vm2 = vcmp.lt.s32.totalorder %v3513_v25, 16  ;;  %v1538_v34 = vadd.f32 %v1522_v12, %v1403_v10  ;;  %vm5531_vm10 = vnez %v5530_v59  ;;  %v4522_v10 = vpop.permute.xlu1 %1560 }
 0x2b2   : > { %v4502_v8 = vsel %vm5526_vm6, %v1116_v43, %v1100_v36  ;;  %v4509_v49 = vsel %vm5529_vm2, %v5528_v16, %v5527_v48  ;;  %v1743_v31 = vsel %vm5531_vm10, %v1727_v6, 0.0  ;;  %v1407_v22 = vadd.f32 %v1391_v55, %v1274_v7  ;;  %v2602_v2 = vpop.eup %2601  ;;  %vm5535_vm4 = vmmov %vm5529_vm2 }
 0x2b3   : > { %v1478_v13 = vsel %vm3748_vm0, %v1453_v40, 0.0  ;;  %v1479_v36 = vsel %vm3766_vm5, %v1461_v62, 0.0  ;;  %v1539_v58 = vadd.f32 %v1523_v27, %v1404_v45  ;;  %v1408_v14 = vadd.f32 %v1392_v17, %v1275_v38  ;;  %v2604_v6 = vpop.eup %2603  ;;  %v1762_v45 = vpop.permute.xlu0 %1761  ;;  %v5537_v17 = vld [vmem:[#allocation28_spill] sm:$0xff] }
 0x2b4   : > { %v1526_v61 = vmul.f32 %v5532_v54, %v1478_v13  ;;  %v1527_v39 = vmul.f32 %v5532_v54, %v1479_v36  ;;  %v1611_v12 = vsel %vm5497_vm3, %v5533_v29, 0.0  ;;  %v1936_v7 = vadd.f32 1.0, %v2600_v32  ;;  %v2606_v41 = vpop.eup %2605 }
 0x2b5   : > { %v1671_v19 = vadd.f32 %v1655_v1, %v1538_v34  ;;  %v1672_v55 = vadd.f32 %v1656_v11, %v1539_v58  ;;  %v1612_v27 = vsel %vm5428_vm8, %v5534_v33, 0.0  ;;  %v1659_v40 = vmul.f32 %v4378_v60, %v1611_v12 }
 0x2b6   : > { %v1660_v62 = vmul.f32 %v4378_v60, %v1612_v27  ;;  %v1790_v37 = vmul.f32 %v1762_v45, %v1742_v18  ;;  %v1791_v38 = vmul.f32 %v1762_v45, %v1743_v31  ;;  %v856_v43 = vsel %vm5535_vm4, %v5527_v48, %v5528_v16  ;;  %v4539_v18 = vpop.permute.xlu1 %1576  ;;  %v5538_v31 = vld [vmem:[#allocation39_spill] sm:$0xff]  ;;  %v2048_v27 = vld [vmem:[%s4980_s5 + $0x18] sm:$0xff] }
 0x2b7   : > { %v880_v11 = vsel %vm3544_vm1, %v4509_v49, 0.0  ;;  %v1937_v32 = vadd.f32 1.0, %v2602_v2  ;;  %v1746_v34 = vsel %vm5517_vm15, %v5537_v17, 0.0  ;;  %v1542_v13 = vadd.f32 %v1526_v61, %v1407_v22  ;;  %v1770_v16 = vpop.permute.xlu0 %1769  ;;  %v2045_v22 = vld [vmem:[%s4980_s5] sm:$0xff] }
 0x2b8   : > { %v1543_v36 = vadd.f32 %v1527_v39, %v1408_v14  ;;  %v1806_v58 = vadd.f32 %v1790_v37, %v1671_v19  ;;  %v1807_v60 = vadd.f32 %v1791_v38, %v1672_v55  ;;  %2607 = vrcp.f32 %v1936_v7  ;;  %v2046_v14 = vld [vmem:[%s4980_s5 + $0x8] sm:$0xff]  ;;  %v5540_v7 = vld [vmem:[#allocation26_spill] sm:$0xff]  ;;  %v2047_v55 = vld [vmem:[%s4980_s5 + $0x10] sm:$0xff] }
 0x2b9   : > { %v1747_v48 = vsel %vm5531_vm10, %v5538_v31, 0.0  ;;  %v1933_v54 = vadd.f32 1.0, %v2604_v6  ;;  %v1932_v29 = vadd.f32 1.0, %v2606_v41  ;;  %v1675_v49 = vadd.f32 %v1659_v40, %v1542_v13  ;;  %v5543_v37 = vld [vmem:[#allocation77_spill] sm:$0xff]  ;;  %v5544_v38 = vld [vmem:[#allocation76_spill] sm:$0xff] }
 0x2ba   : > { %v1676_v2 = vadd.f32 %v1660_v62, %v1543_v36  ;;  %v1794_v12 = vmul.f32 %v1770_v16, %v1746_v34  ;;  %v1795_v33 = vmul.f32 %v1770_v16, %v1747_v48  ;;  %v881_v39 = vsel %vm5479_vm11, %v856_v43, 0.0  ;;  %v4564_v40 = vpop.permute.xlu1 %1513  ;;  %v5546_v36 = vld [vmem:[#allocation116_spill] sm:$0xff]  ;;  %v5550_v16 = vld [vmem:[#allocation81_spill] sm:$0xff] }
 0x2bb   : > { %2609 = vrcp.f32 %v1937_v32  ;;  %v4553_v19 = vadd.f32 %v5540_v7, %v1807_v60  ;;  %v4556_v6 = vadd.f32 %v5540_v7, %v1806_v58  ;;  %5542 = vst [vmem:[#allocation40_spill] sm:$0xff] %v4564_v40  ;;  %v2441_v62 = vpack.c.bf16 %v2046_v14, %v2045_v22  ;;  %v4572_v32 = vpop.permute.xlu0 %1777  ;;  %v5555_v22 = vld [vmem:[#allocation92_spill] sm:$0xff] }
 0x2bc   : > { %v1810_v45 = vadd.f32 %v1794_v12, %v1675_v49  ;;  %v1811_v41 = vadd.f32 %v1795_v33, %v1676_v2  ;;  %vm5545_vm6 = vcmp.lt.s32.totalorder %v3513_v25, 17  ;;  %2611 = vrcp.f32 %v1933_v54  ;;  %v5551_v54 = vld [vmem:[#allocation78_spill] sm:$0xff]  ;;  %v2050_v12 = vld [vmem:[%s4980_s5 + $0x28] sm:$0xff] }
 0x2bd   : > { %5541 = vst [vmem:[#allocation50_spill] sm:$0xff] %v4556_v6  ;;  %v4570_v43 = vsel %vm5545_vm6, %v5544_v38, %v5543_v37  ;;  %v2383_v17 = vmul.f32 -1.442695, %v4553_v19  ;;  %v2382_v34 = vmul.f32 -1.442695, %v4556_v6  ;;  %v2705_v13 = vmov 0.0|0.0   ;;  %vm5549_vm2 = vmmov %vm5545_vm6 }
 0x2be   : > { %2440 = vmatprep.subr.bf16.mxu0 %v2705_v13  ;;  %v4577_v58 = vadd.f32 %v5546_v36, %v1810_v45  ;;  %v4580_v60 = vadd.f32 %v5546_v36, %v1811_v41  ;;  %2613 = vrcp.f32 %v1932_v29  ;;  %v2444_v31 = vpack.c.bf16 %v2048_v27, %v2047_v55  ;;  %v2049_v29 = vld [vmem:[%s4980_s5 + $0x20] sm:$0xff]  ;;  %v5554_v33 = vld [vmem:[#allocation91_spill] sm:$0xff]  ;;  %v5557_v27 = vld [vmem:[#allocation21_spill] sm:$0xff] }
 0x2bf   : > { %2442 = vmatpush3.bf16.msra.mxu0 %v2441_v62  ;;  %v4586_v48 = vsel %vm5549_vm2, %v5543_v37, %v5544_v38  ;;  %vm5552_vm4 = vcmp.lt.s32.totalorder %v3513_v25, 15  ;;  %2615 = vpow2.f32 %v2383_v17  ;;  %vm5556_vm2 = vcmp.lt.s32.totalorder %v3513_v25, 1  ;;  %v4618_v37 = vpop.permute.xlu1 %1850  ;;  %v1299_v38 = vpop.permute.xlu0 %1298  ;;  %v5566_v36 = vld [vmem:[#allocation31_spill] sm:$0xff] }
 0x2c0   : > { %5547 = vst [vmem:[#allocation14_spill] sm:$0xff] %v4577_v58  ;;  %5548 = vst [vmem:[#allocation7_spill] sm:$0xff] %v4580_v60  ;;  %v989_v49 = vsel %vm5552_vm4, %v5551_v54, %v5550_v16  ;;  %2443 = vmatprep.subr.bf16.mxu0 %v2705_v13  ;;  %v1132_v14 = vsel %vm5556_vm2, %v5555_v22, %v5554_v33  ;;  %v2386_v7 = vmul.f32 -1.442695, %v4577_v58  ;;  %v2387_v55 = vmul.f32 -1.442695, %v4580_v60 }
 0x2c1   : > { %vm5553_vm6 = vmmov %vm5552_vm4  ;;  %2617 = vpow2.f32 %v2382_v34  ;;  %v4609_v45 = vmul.f32 %v5557_v27, %v880_v11  ;;  %v4612_v41 = vmul.f32 %v5557_v27, %v881_v39  ;;  %5559 = vst [vmem:[#allocation41_spill] sm:$0xff] %v4618_v37  ;;  %v1148_v28 = vsel %vm3569_vm7, %v1132_v14, 0.0  ;;  %v5565_v14 = vld [vmem:[#allocation118_spill] sm:$0xff] }
 0x2c2   : > { %v997_v2 = vsel %vm5553_vm6, %v5550_v16, %v5551_v54  ;;  %vm5558_vm4 = vmmov %vm5556_vm2  ;;  %2619 = vpow2.f32 %v2386_v7  ;;  %v2447_v16 = vpack.c.bf16 %v2050_v12, %v2049_v29  ;;  %v2608_v54 = vpop.eup %2607  ;;  %vm5563_vm6 = vnez %v5298_v56  ;;  %v5564_v12 = vld [vmem:[#allocation99_spill] sm:$0xff] }
 0x2c3   : > { %v1124_v62 = vsel %vm5558_vm4, %v5554_v33, %v5555_v22  ;;  %v1015_v34 = vsel %vm3586_vm9, %v997_v2, 0.0  ;;  %2445 = vmatpush3.bf16.msra.mxu0 %v2444_v31  ;;  %v1016_v33 = vsel %vm5476_vm14, %v989_v49, 0.0  ;;  %v5562_v22 = vld [vmem:[#allocation89_spill] sm:$0xff]  ;;  %2621 = vpow2.f32 %v2387_v55  ;;  %v2051_v2 = vld [vmem:[%s4980_s5 + $0x30] sm:$0xff]  ;;  %v4665_v37 = vpop.permute.xlu1 %1855  ;;  %v1315_v1 = vpop.permute.xlu0 %1314 }
 0x2c4   : > { %v4631_v27 = vmul.f32 %v5562_v22, %v1015_v34  ;;  %2446 = vmatprep.subr.bf16.mxu0 %v2705_v13  ;;  %v2052_v31 = vld [vmem:[%s4980_s5 + $0x38] sm:$0xff]  ;;  %v4642_v29 = vmul.f32 %v5562_v22, %v1016_v33  ;;  %v1149_v49 = vsel %vm5563_vm6, %v1124_v62, 0.0  ;;  %v4647_v7 = vmul.f32 %v5564_v12, %v1148_v28  ;;  %v5569_v62 = vld [vmem:[#allocation36_spill] sm:$0xff] }
 0x2c5   : > { %v884_v55 = vsel %vm3544_vm1, %v5565_v14, 0.0  ;;  %v2610_v34 = vpop.eup %2609  ;;  %v4653_v39 = vmul.f32 %v5564_v12, %v1149_v49  ;;  %v4657_v40 = vmul.f32 %v5567_v53, %v5566_v36  ;;  %v5568_v33 = vld [vmem:[#allocation117_spill] sm:$0xff]  ;;  %vm5570_vm2 = vnez %v5511_v50 }
 0x2c6   : > { %v885_v22 = vsel %vm5479_vm11, %v5568_v33, 0.0  ;;  %v1345_v28 = vsel %vm5570_vm2, %v5569_v62, 0.0  ;;  %v5571_v14 = vld [vmem:[#allocation33_spill] sm:$0xff]  ;;  %vm5572_vm1 = vnez %v5291_v15  ;;  %vm5573_vm4 = vcmp.lt.s32.totalorder %v3513_v25, 127  ;;  %v2612_v33 = vpop.eup %2611 }
 0x2c7   : > { %v1346_v49 = vsel %vm5572_vm1, %v5571_v14, 0.0  ;;  %v1324_v12 = vsel %vm5573_vm4, %v1299_v38, %v1315_v1  ;;  %vm5574_vm5 = vmmov %vm5573_vm4  ;;  %2448 = vmatpush3.bf16.msra.mxu0 %v2447_v16  ;;  %v2450_v61 = vpack.c.bf16 %v2052_v31, %v2051_v2  ;;  %v4676_v9 = vmul.f32 %v5567_v53, %v5575_v57  ;;  %v5576_v62 = vld [vmem:[#allocation97_spill] sm:$0xff]  ;;  %v5577_v16 = vld [vmem:[#allocation98_spill] sm:$0xff] }
 0x2c8   : > { %v1332_v36 = vsel %vm5574_vm5, %v1315_v1, %v1299_v38  ;;  %v4679_v58 = vmul.f32 %v5576_v62, %v884_v55  ;;  %v1351_v60 = vsel %vm5570_vm2, %v1324_v12, 0.0  ;;  %2449 = vmatprep.subr.bf16.mxu0 %v2705_v13  ;;  %v2614_v6 = vpop.eup %2613  ;;  %v4686_v38 = vmul.f32 %v5576_v62, %v885_v22  ;;  %v5578_v1 = vld [vmem:[#allocation66_spill] sm:$0xff]  ;;  %v5579_v12 = vld [vmem:[#allocation37_spill] sm:$0xff]  ;;  %v5580_v13 = vld [vmem:[#allocation64_spill] sm:$0xff]  ;;  %v1696_v22 = vpop.permute.xlu1 %1695 }
 0x2c9   : > { %v1352_v14 = vsel %vm5572_vm1, %v1332_v36, 0.0  ;;  %v4689_v2 = vmul.f32 %v5577_v16, %v1345_v28  ;;  %v1399_v57 = vmul.f32 %v4421_v0, %v1351_v60  ;;  %v2616_v31 = vpop.eup %2615  ;;  %v4694_v55 = vmul.f32 %v5577_v16, %v1346_v49  ;;  %v4704_v62 = vpop.permute.xlu0 %1785  ;;  %v5582_v28 = vld [vmem:[#allocation48_spill] sm:$0xff]  ;;  %v5583_v16 = vld [vmem:[#allocation5_spill] sm:$0xff] }
 0x2ca   : > { %v1400_v53 = vmul.f32 %v4421_v0, %v1352_v14  ;;  %v4698_v15 = vmul.f32 %v5579_v12, %v5578_v1  ;;  %v4702_v36 = vmul.f32 %v5579_v12, %v5580_v13  ;;  %5581 = vst [vmem:[#allocation51_spill] sm:$0xff] %v4704_v62  ;;  %v751_v60 = vsel %vm3607_vm12, %v5582_v28, 0.0 }
 0x2cb   : > { %v2618_v0 = vpop.eup %2617  ;;  %v4710_v14 = vadd.f32 %v1399_v57, %v4408_v21  ;;  %v752_v1 = vsel %vm3632_vm13, %v5583_v16, 0.0  ;;  %v1935_v12 = vadd.f32 1.0, %v2616_v31  ;;  %2451 = vmatpush3.bf16.msra.mxu0 %v2450_v61  ;;  %v4719_v13 = vmul.f32 %v2608_v54, %v3832_v3  ;;  %v5586_v16 = vld [vmem:[#allocation20_spill] sm:$0xff] }
 0x2cc   : > { %v4713_v49 = vadd.f32 %v1400_v53, %v4410_v52  ;;  %v4722_v62 = vmul.f32 %v2610_v34, %v3834_v30  ;;  %vm5584_vm5 = vcmp.lt.s32.totalorder %v3513_v25, 111  ;;  %v1934_v57 = vadd.f32 1.0, %v2618_v0  ;;  %v2620_v52 = vpop.eup %2619  ;;  %v5585_v53 = vld [vmem:[#allocation107_spill] sm:$0xff]  ;;  %v1712_v31 = vpop.permute.xlu1 %1711 }
 0x2cd   : > { %v1722_v21 = vsel %vm5584_vm5, %v4423_v35, %v4447_v46  ;;  %v1019_v28 = vsel %vm3586_vm9, %v5585_v53, 0.0  ;;  %v1020_v61 = vsel %vm5476_vm14, %v5586_v16, 0.0  ;;  %2623 = vrcp.f32 %v1935_v12  ;;  %v2622_v30 = vpop.eup %2621  ;;  %vm5587_vm11 = vmmov %vm5584_vm5  ;;  %v5592_v16 = vld [vmem:[#allocation83_spill] sm:$0xff] }
 0x2ce   : > { %v1981_v3 = vmul.f32 %v2612_v33, %v4389_v63  ;;  %v1730_v54 = vsel %vm5587_vm11, %v4447_v46, %v4423_v35  ;;  %v1938_v34 = vadd.f32 1.0, %v2620_v52  ;;  %2625 = vrcp.f32 %v1934_v57  ;;  %vm5588_vm9 = vmmov %vm5584_vm5  ;;  %v5590_v33 = vld [vmem:[#allocation96_spill] sm:$0xff] }
 0x2cf   : > { %v4740_v0 = vmul.f32 %v2614_v6, %v4397_v24  ;;  %v1748_v4 = vsel %vm5517_vm15, %v1722_v21, 0.0  ;;  %v1939_v5 = vadd.f32 1.0, %v2622_v30  ;;  %v1723_v12 = vsel %vm5588_vm9, %v1696_v22, %v1712_v31  ;;  %vm5589_vm14 = vmmov %vm5584_vm5  ;;  %v786_v6 = vpop.permute.xlu0 %785 }
 0x2d0   : > { %v1731_v63 = vsel %vm5589_vm14, %v1712_v31, %v1696_v22  ;;  %v1067_v53 = vmul.f32 %v5590_v33, %v1019_v28  ;;  %v1068_v35 = vmul.f32 %v5590_v33, %v1020_v61  ;;  %v1750_v46 = vsel %vm5517_vm15, %v1723_v12, 0.0 }
 0x2d1   : > { %v1751_v24 = vsel %vm5531_vm10, %v1731_v63, 0.0  ;;  %2627 = vrcp.f32 %v1939_v5  ;;  %v1798_v21 = vmul.f32 %v4572_v32, %v1750_v46  ;;  %v5591_v22 = vsel %vm3607_vm12, %v4570_v43, 0.0  ;;  %v4769_v5 = vpop.permute.xlu1 %1650 }
 0x2d2   : > { %v1799_v57 = vmul.f32 %v4572_v32, %v1751_v24  ;;  %v811_v52 = vmul.f32 %v786_v6, %v5591_v22  ;;  %v1749_v28 = vsel %vm5531_vm10, %v1730_v54, 0.0  ;;  %v4763_v61 = vmul.f32 %v5592_v16, %v1748_v4  ;;  %v5597_v22 = vld [vmem:[#allocation4_spill] sm:$0xff] }
 0x2d3   : > { %2629 = vrcp.f32 %v1938_v34  ;;  %v5593_v30 = vsel %vm3632_vm13, %v4586_v48, 0.0  ;;  %v1152_v32 = vsel %vm3569_vm7, %v4502_v8, 0.0  ;;  %vm5594_vm12 = vcmp.lt.s32.totalorder %v3513_v25, 112  ;;  %v796_v34 = vpop.permute.xlu0 %795  ;;  %vm5599_vm7 = vmmov %vm5573_vm4 }
 0x2d4   : > { %v812_v31 = vmul.f32 %v786_v6, %v5593_v30  ;;  %v1589_v43 = vsel %vm5594_vm12, %v4522_v10, %v4539_v18  ;;  %v1814_v17 = vadd.f32 %v1798_v21, %v4435_v42  ;;  %v944_v54 = vadd.f32 %v4609_v45, %v811_v52  ;;  %vm5595_vm13 = vmmov %vm5594_vm12 }
 0x2d5   : > { %v1153_v48 = vsel %vm5563_vm6, %v4498_v23, 0.0  ;;  %v1597_v11 = vsel %vm5595_vm13, %v4539_v18, %v4522_v10  ;;  %v1815_v26 = vadd.f32 %v1799_v57, %v4437_v44  ;;  %v4790_v4 = vmul.f32 %v5592_v16, %v1749_v28  ;;  %v5596_v23 = vld [vmem:[#allocation108_spill] sm:$0xff]  ;;  %v1297_v18 = vpop.permute.xlu1 %1296  ;;  %vm5600_vm6 = vmmov %vm5573_vm4 }
 0x2d6   : > { %v945_v8 = vadd.f32 %v4612_v41, %v812_v31  ;;  %v4793_v42 = vadd.f32 %v4665_v37, %v1814_v17  ;;  %v1079_v45 = vadd.f32 %v4631_v27, %v944_v54  ;;  %v815_v56 = vmul.f32 %v796_v34, %v751_v60 }
 0x2d7   : > { %v1200_v12 = vmul.f32 %v5596_v23, %v1152_v32  ;;  %v1613_v63 = vsel %vm5497_vm3, %v1589_v43, 0.0  ;;  %v816_v44 = vmul.f32 %v796_v34, %v752_v1  ;;  %v2624_v41 = vpop.eup %2623  ;;  %v1201_v33 = vmul.f32 %v5596_v23, %v1153_v48  ;;  %v1446_v1 = vpop.permute.xlu0 %1445  ;;  %v5598_v32 = vld [vmem:[#allocation50_spill] sm:$0xff] }
 0x2d8   : > { %v1080_v10 = vadd.f32 %v4642_v29, %v945_v8  ;;  %v1614_v46 = vsel %vm5428_vm8, %v1597_v11, 0.0  ;;  %v1212_v24 = vadd.f32 %v4647_v7, %v1079_v45  ;;  %v948_v27 = vadd.f32 %v4679_v58, %v815_v56  ;;  %v2626_v60 = vpop.eup %2625  ;;  %v5601_v11 = vld [vmem:[#allocation38_spill] sm:$0xff] }
 0x2d9   : > { %v4806_v6 = vadd.f32 %v4665_v37, %v1815_v26  ;;  %v949_v29 = vadd.f32 %v4686_v38, %v816_v44  ;;  %v1983_v57 = vmul.f32 %v2624_v41, %v4553_v19  ;;  %v1661_v52 = vmul.f32 %v5597_v22, %v1613_v63  ;;  %v1313_v31 = vpop.permute.xlu1 %1312  ;;  %v5603_v56 = vld [vmem:[#allocation10_spill] sm:$0xff]  ;;  %v5604_v63 = vld [vmem:[#allocation7_spill] sm:$0xff] }
 0x2da   : > { %v1213_v21 = vadd.f32 %v4653_v39, %v1080_v10  ;;  %v2390_v28 = vmul.f32 -1.442695, %v4793_v42  ;;  %v1276_v16 = vadd.f32 %v4657_v40, %v1212_v24  ;;  %v1083_v7 = vadd.f32 %v1067_v53, %v948_v27  ;;  %v5605_v44 = vld [vmem:[#allocation11_spill] sm:$0xff]  ;;  %v5606_v41 = vld [vmem:[#allocation14_spill] sm:$0xff] }
 0x2db   : > { %v1084_v30 = vadd.f32 %v1068_v35, %v949_v29  ;;  %v4815_v37 = vpack.c.bf16 %v1983_v57, %v1981_v3  ;;  %v1982_v39 = vmul.f32 %v2626_v60, %v5598_v32  ;;  %v2628_v43 = vpop.eup %2627  ;;  %v1323_v19 = vsel %vm5599_vm7, %v1297_v18, %v1313_v31  ;;  %v1565_v48 = vpop.permute.xlu0 %1564 }
 0x2dc   : > { %v1277_v58 = vadd.f32 %v4676_v9, %v1213_v21  ;;  %v1409_v38 = vadd.f32 %v4689_v2, %v1276_v16  ;;  %v1216_v17 = vadd.f32 %v1200_v12, %v1083_v7  ;;  %v1331_v54 = vsel %vm5600_vm6, %v1313_v31, %v1297_v18  ;;  %v5614_v31 = vld [vmem:[#allocation41_spill] sm:$0xff] }
 0x2dd   : > { %v2630_v40 = vpop.eup %2629  ;;  %v2391_v53 = vmul.f32 -1.442695, %v4806_v6  ;;  %v1217_v35 = vadd.f32 %v1201_v33, %v1084_v30  ;;  %v1349_v3 = vsel %vm5570_vm2, %v1323_v19, 0.0  ;;  %2004 = vmatprep.subr.bf16.mxu1 %v4815_v37  ;;  %v1662_v2 = vmul.f32 %v5597_v22, %v1614_v46  ;;  %v4838_v50 = vpop.permute.xlu1 %1781  ;;  %vm5607_vm2 = vmmov %vm5594_vm12  ;;  %v5616_v19 = vld [vmem:[#allocation84_spill] sm:$0xff] }
 0x2de   : > { %v1410_v9 = vadd.f32 %v4694_v55, %v1277_v58  ;;  %v1544_v26 = vadd.f32 %v5601_v11, %v1409_v38  ;;  %v1280_v8 = vadd.f32 %v4698_v15, %v1216_v17  ;;  %v1350_v45 = vsel %vm5572_vm1, %v1331_v54, 0.0  ;;  %vm5608_vm1 = vmmov %vm5607_vm2  ;;  %v5612_v58 = vld [vmem:[#allocation112_spill] sm:$0xff] }
 0x2df   : > { %v1281_v55 = vadd.f32 %v4702_v36, %v1217_v35  ;;  %v4836_v12 = vpack.c.bf16 %v1982_v39, %v4740_v0  ;;  %v1987_v10 = vmul.f32 %v2628_v43, %v5604_v63  ;;  %2631 = vpow2.f32 %v2390_v28  ;;  %v1581_v0 = vpop.permute.xlu0 %1580  ;;  %v5615_v43 = vld [vmem:[#allocation40_spill] sm:$0xff] }
 0x2e0   : > { %v1545_v23 = vadd.f32 %v5603_v56, %v1410_v9  ;;  %v1397_v18 = vmul.f32 %v5605_v44, %v1349_v3  ;;  %v1986_v33 = vmul.f32 %v2630_v40, %v5606_v41  ;;  %v1677_v15 = vadd.f32 %v1661_v52, %v1544_v26 }
 0x2e1   : > { %2633 = vpow2.f32 %v2391_v53  ;;  %v1398_v46 = vmul.f32 %v5605_v44, %v1350_v45  ;;  %2005 = vmatpush1.bf16.xpose.msra.mxu1 %v4836_v12  ;;  %v4846_v36 = vpack.c.bf16 %v1987_v10, %v4722_v62  ;;  %v1591_v27 = vsel %vm5607_vm2, %v1565_v48, %v1581_v0  ;;  %v1430_v57 = vpop.permute.xlu1 %1429 }
 0x2e2   : > { %v1678_v24 = vadd.f32 %v1662_v2, %v1545_v23  ;;  %v1599_v60 = vsel %vm5608_vm1, %v1581_v0, %v1565_v48  ;;  %v4853_v21 = vpack.c.bf16 %v1986_v33, %v4719_v13  ;;  %v1812_v29 = vadd.f32 %v4763_v61, %v1677_v15  ;;  %v5620_v15 = vld [vmem:[#allocation95_spill] sm:$0xff] }
 0x2e3   : > { %2006 = vmatprep.subr.bf16.mxu1 %v4846_v36  ;;  %v1413_v62 = vadd.f32 %v1397_v18, %v1280_v8  ;;  %v1617_v52 = vsel %vm5497_vm3, %v1591_v27, 0.0  ;;  %vm5609_vm4 = vcmp.lt.s32.totalorder %v3513_v25, 113  ;;  %v1618_v13 = vsel %vm5428_vm8, %v1599_v60, 0.0 }
 0x2e4   : > { %v1813_v22 = vadd.f32 %v4790_v4, %v1678_v24  ;;  %v1456_v28 = vsel %vm5609_vm4, %v1430_v57, %v1446_v1  ;;  %vm5610_vm5 = vmmov %vm5609_vm4  ;;  %vm5613_vm11 = vnez %v5612_v58  ;;  %v4870_v4 = vpop.permute.xlu0 %1860  ;;  %v1414_v39 = vadd.f32 %v1398_v46, %v1281_v55 }
 0x2e5   : > { %v1464_v16 = vsel %vm5610_vm5, %v1446_v1, %v1430_v57  ;;  %v1484_v61 = vsel %vm3748_vm0, %v1456_v28, 0.0  ;;  %v4878_v1 = vadd.f32 %v5614_v31, %v1812_v29  ;;  %v1665_v54 = vmul.f32 %v5616_v19, %v1617_v52  ;;  %v1432_v40 = vpop.permute.xlu1 %1431  ;;  %vm5617_vm9 = vmmov %vm5609_vm4 }
 0x2e6   : > { %v1485_v30 = vsel %vm5613_vm11, %v1464_v16, 0.0  ;;  %v4873_v32 = vadd.f32 %v5614_v31, %v1813_v22  ;;  %v1532_v38 = vmul.f32 %v5615_v43, %v1484_v61  ;;  %v1666_v9 = vmul.f32 %v5616_v19, %v1618_v13  ;;  %vm5618_vm14 = vmmov %vm5609_vm4 }
 0x2e7   : > { %v1533_v17 = vmul.f32 %v5615_v43, %v1485_v30  ;;  %v2388_v48 = vmul.f32 -1.442695, %v4878_v1  ;;  %vm5619_vm12 = vcmp.lt.s32.totalorder %v3513_v25, 111  ;;  %v5624_v43 = vld [vmem:[#allocation51_spill] sm:$0xff]  ;;  %vm2137_vm6 = vcmask 64512  }
 0x2e8   : > { %v2389_v53 = vmul.f32 -1.442695, %v4873_v32  ;;  %v1548_v35 = vadd.f32 %v1532_v38, %v1413_v62  ;;  %v1700_v2 = vpop.permute.xlu0 %1699  ;;  %vm5621_vm13 = vmmov %vm5619_vm12 }
 0x2e9   : > { %v1549_v3 = vadd.f32 %v1533_v17, %v1414_v39  ;;  %2007 = vmatpush1.bf16.xpose.msra.mxu1 %v4853_v21  ;;  %v2632_v11 = vpop.eup %2631  ;;  %v1448_v45 = vpop.permute.xlu1 %1447 }
 0x2ea   : > { %2635 = vpow2.f32 %v2389_v53  ;;  %v4885_v26 = vadd.f32 %v1665_v54, %v1548_v35  ;;  %v1457_v56 = vsel %vm5617_vm9, %v1432_v40, %v1448_v45  ;;  %v1465_v23 = vsel %vm5618_vm14, %v1448_v45, %v1432_v40 }
 0x2eb   : > { %v4887_v8 = vadd.f32 %v1666_v9, %v1549_v3  ;;  %2637 = vpow2.f32 %v2388_v48  ;;  %v2634_v34 = vpop.eup %2633  ;;  %v1942_v63 = vadd.f32 1.0, %v2632_v11  ;;  %v1486_v10 = vsel %vm3748_vm0, %v1457_v56, 0.0  ;;  %vm5622_vm0 = vmmov %vm5608_vm1 }
 0x2ec   : > { %v1716_v55 = vpop.permute.xlu0 %1715  ;;  %v1943_v44 = vadd.f32 1.0, %v2634_v34  ;;  %v1487_v18 = vsel %vm5613_vm11, %v1465_v23, 0.0  ;;  %v1534_v46 = vmul.f32 %v5620_v15, %v1486_v10  ;;  %vm5623_vm7 = vmmov %vm5622_vm0 }
 0x2ed   : > { %v1567_v41 = vpop.permute.xlu1 %1566  ;;  %v1725_v33 = vsel %vm5619_vm12, %v1700_v2, %v1716_v55  ;;  %v1733_v0 = vsel %vm5621_vm13, %v1716_v55, %v1700_v2  ;;  %2639 = vrcp.f32 %v1942_v63  ;;  %v1535_v24 = vmul.f32 %v5620_v15, %v1487_v18 }
 0x2ee   : > { %2641 = vrcp.f32 %v1943_v44  ;;  %v1754_v60 = vsel %vm5517_vm15, %v1725_v33, 0.0  ;;  %v1755_v22 = vsel %vm5531_vm10, %v1733_v0, 0.0  ;;  %v1550_v16 = vadd.f32 %v1534_v46, %v4710_v14 }
 0x2ef   : > { %v1551_v58 = vadd.f32 %v1535_v24, %v4713_v49  ;;  %v1802_v38 = vmul.f32 %v5624_v43, %v1754_v60  ;;  %v1803_v14 = vmul.f32 %v5624_v43, %v1755_v22 }
 0x2f1   : > { %v1583_v29 = vpop.permute.xlu1 %1582 }
 0x2f2   : > { %v1592_v62 = vsel %vm5622_vm0, %v1567_v41, %v1583_v29  ;;  %v1600_v52 = vsel %vm5623_vm7, %v1583_v29, %v1567_v41 }
 0x2f3   : > { %v1619_v13 = vsel %vm5497_vm3, %v1592_v62, 0.0  ;;  %v1620_v7 = vsel %vm5428_vm8, %v1600_v52, 0.0  ;;  %vm5625_vm8 = vmmov %vm5619_vm12 }
 0x2f4   : > { %v2636_v27 = vpop.eup %2635  ;;  %v1667_v30 = vmul.f32 %v4769_v5, %v1619_v13  ;;  %v1668_v31 = vmul.f32 %v4769_v5, %v1620_v7  ;;  %vm5626_vm3 = vmmov %vm5625_vm8  ;;  %v5627_v13 = vmov 1065369472   ;;  %v5628_v7 = vmov 0  }
 0x2f5   : > { %v2638_v57 = vpop.eup %2637  ;;  %v1941_v28 = vadd.f32 1.0, %v2636_v27  ;;  %v1866_v39 = vpop.permute.xlu1 %1865 }
 0x2f6   : > { %v1940_v61 = vadd.f32 1.0, %v2638_v57  ;;  %v1683_v17 = vadd.f32 %v1667_v30, %v1550_v16  ;;  %v1684_v51 = vadd.f32 %v1668_v31, %v1551_v58 }
 0x2f7   : > { %2643 = vrcp.f32 %v1941_v28  ;;  %v2640_v40 = vpop.eup %2639 }
 0x2f8   : > { %2645 = vrcp.f32 %v1940_v61  ;;  %v1818_v19 = vadd.f32 %v1802_v38, %v1683_v17  ;;  %v1819_v54 = vadd.f32 %v1803_v14, %v1684_v51  ;;  %v2642_v9 = vpop.eup %2641  ;;  %v1990_v25 = vmul.f32 %v2640_v40, %v4793_v42 }
 0x2f9   : > { %v1698_v20 = vpop.permute.xlu1 %1697  ;;  %v1991_v11 = vmul.f32 %v2642_v9, %v4806_v6  ;;  %v2707_v61 = vmov 0.0  }
 0x2fa   : > { %v1882_v53 = vadd.f32 %v1866_v39, %v1818_v19  ;;  %v1883_v49 = vadd.f32 %v1866_v39, %v1819_v54  ;;  %2435 = vmatprep.subr.mxu0 %v2707_v61 }
 0x2fc   : > { %v2394_v48 = vmul.f32 -1.442695, %v1882_v53  ;;  %v2395_v45 = vmul.f32 -1.442695, %v1883_v49 }
 0x2fd   : > { %v1714_v35 = vpop.permute.xlu1 %1713 }
 0x2fe   : > { %v1724_v5 = vsel %vm5625_vm8, %v1698_v20, %v1714_v35  ;;  %v1732_v2 = vsel %vm5626_vm3, %v1714_v35, %v1698_v20  ;;  %2647 = vpow2.f32 %v2394_v48  ;;  %v2136_v20 = vld [vmem:[%s4983_s8] sm:$0x1]  ;;  %v5629_v48 = vlaneseq }
 0x2ff   : > { %v1752_v56 = vsel %vm5517_vm15, %v1724_v5, 0.0  ;;  %v1753_v23 = vsel %vm5531_vm10, %v1732_v2, 0.0  ;;  %2649 = vpow2.f32 %v2395_v45  ;;  %vm2706_vm10 = vmmov 0   ;;  %v2218_v45 = vld [vmem:[%s4984_s9 + $0x8] sm:$0xff] }
 0x300   : > { %v1800_v63 = vmul.f32 %v4838_v50, %v1752_v56  ;;  %v1801_v10 = vmul.f32 %v4838_v50, %v1753_v23  ;;  %2432 = vmatprep.mubr.msk.f32.mxu0 %vm2706_vm10, %v2707_v61  ;;  %vm2054_vm15 = vcmask 523264   ;;  %v2220_v5 = vshrl.u32 %v5629_v48, 7 }
 0x301   : > { %v2644_v3 = vpop.eup %2643 }
 0x302   : > { %v2646_v34 = vpop.eup %2645  ;;  %v1989_v55 = vmul.f32 %v2644_v3, %v4873_v32  ;;  %v1816_v6 = vadd.f32 %v1800_v63, %v4885_v26  ;;  %v1817_v47 = vadd.f32 %v1801_v10, %v4887_v8  ;;  %v2221_v2 = vsub.s32 0, %v2220_v5  ;;  %v2231_v10 = vpop.permute.xlu1 %2230 }
 0x303   : > { %v1988_v44 = vmul.f32 %v2646_v34, %v4878_v1  ;;  %v2217_v34 = vld [vmem:[%s4984_s9] sm:$0xff] }
 0x304   : > { %v2001_v18 = vpack.c.bf16 %v1991_v11, %v1989_v55  ;;  %v1880_v59 = vadd.f32 %v4870_v4, %v1816_v6  ;;  %v1881_v32 = vadd.f32 %v4870_v4, %v1817_v47  ;;  %v2236_v6 = vpop.permute.xlu0 %2235 }
 0x305   : > { %v2000_v41 = vpack.c.bf16 %v1990_v25, %v1988_v44 }
 0x306   : > { %2008 = vmatprep.subr.bf16.mxu1 %v2001_v18  ;;  %v2392_v33 = vmul.f32 -1.442695, %v1880_v59  ;;  %v2393_v50 = vmul.f32 -1.442695, %v1881_v32 }
 0x307   : > { %2009 = vmatpush1.bf16.xpose.msra.mxu1 %v2000_v41 }
 0x308   : > { %2651 = vpow2.f32 %v2392_v33  ;;  %v2648_v1 = vpop.eup %2647 }
 0x309   : > { %2653 = vpow2.f32 %v2393_v50  ;;  %v2650_v42 = vpop.eup %2649  ;;  %v1946_v15 = vadd.f32 1.0, %v2648_v1  ;;  %v2676_v1 = vld [vmem:[%s2793_s26 + $0x8] sm:$0xff] }
 0x30a   : > { %v1947_v46 = vadd.f32 1.0, %v2650_v42 }
 0x30b   : > { %2655 = vrcp.f32 %v1946_v15 }
 0x30c   : > { %2657 = vrcp.f32 %v1947_v46  ;;  %v2677_v46 = vld [vmem:[%s2793_s26 + $0x10] sm:$0xff] }
 0x312   : > { %v2652_v0 = vpop.eup %2651 }
 0x313   : > { %v2654_v26 = vpop.eup %2653  ;;  %v1944_v8 = vadd.f32 1.0, %v2652_v0 }
 0x314   : > { %v1945_v24 = vadd.f32 1.0, %v2654_v26  ;;  %v2678_v26 = vld [vmem:[%s2793_s26 + $0x18] sm:$0xff] }
 0x315   : > { %2659 = vrcp.f32 %v1944_v8  ;;  %v2656_v27 = vpop.eup %2655 }
 0x316   : > { %2661 = vrcp.f32 %v1945_v24  ;;  %v2658_v60 = vpop.eup %2657  ;;  %v1994_v57 = vmul.f32 %v2656_v27, %v1882_v53 }
 0x317   : > { %v1995_v62 = vmul.f32 %v2658_v60, %v1883_v49 }
 0x31f   : > { %v2660_v4 = vpop.eup %2659 }
 0x320   : > { %v2662_v29 = vpop.eup %2661  ;;  %v1992_v22 = vmul.f32 %v2660_v4, %v1880_v59  ;;  %v2675_v59 = vld [vmem:[%s2793_s26] sm:$0xff] }
 0x321   : > { %v1993_v52 = vmul.f32 %v2662_v29, %v1881_v32 }
 0x322   : > { %v2002_v28 = vpack.c.bf16 %v1994_v57, %v1992_v22 }
 0x323   : > { %v2003_v16 = vpack.c.bf16 %v1995_v62, %v1993_v52 }
 0x325   : > { %2010 = vmatprep.subr.bf16.mxu1 %v2003_v16 }
 0x326   : > { %2011 = vmatpush1.bf16.xpose.msra.mxu1 %v2002_v28 }
 0x327   : > { %2241 = vmatprep.subr.bf16.mxu1 %v4815_v37 }
 0x32d   : > { %2037 = vmatmul.mubr.bf16.vlgmr.msra.gmra.mrb[0].mxu1 %v5627_v13 }
 0x32e   : > { %2242 = vmatpush1.bf16.msra.mxu1 %v4836_v12  ;;  %2273 = vmatprep.mubr.bf16.mxu1 %v5628_v7 }
 0x32f   : > { %2243 = vmatprep.subr.bf16.mxu1 %v4846_v36  ;;  %v2135_v36 = vld [vmem:[%s4982_s7] sm:$0xff] }
 0x332   : > { %2244 = vmatpush1.bf16.msra.mxu1 %v4853_v21  ;;  %v2053_v21 = vld [vmem:[%s4981_s6] sm:$0x1] }
 0x333   : > { %2245 = vmatprep.subr.bf16.mxu1 %v2001_v18 }
 0x336   : > { %2246 = vmatpush1.bf16.msra.mxu1 %v2000_v41 }
 0x337   : > { %2247 = vmatprep.subr.bf16.mxu1 %v2003_v16 }
 0x33a   : > { %2248 = vmatpush1.bf16.msra.mxu1 %v2002_v28 }
 0x400   : > { %v2038_v58 = vpop.f32.mrb[0].mxu1 }
 0x401   : > { %v2044_v37 = vmul.f32 0.00390625, %v2038_v58  ;;  %v2040_v30 = vpop.f32.mrb[1].mxu1 }
 0x402   : > { %v2041_v31 = vpop.f32.mrb[2].mxu1 }
 0x403   : > { %v2042_v12 = vpop.f32.mrb[3].mxu1  ;;  %2433 = vmatmul.mubr.msk.f32.vlgmr.msra.gmra.mrb[16].mxu0 %vm2054_vm15, %v2044_v37 }
 0x404   : > { %2437 = vmatprep.mubr.msk.f32.mxu0 %vm2706_vm10, %v2707_v61  ;;  %2436 = vmatpush3.msra.mxu0 %v2135_v36 }
 0x4d6   : > { %v2124_v39 = vpop.f32.mrb[16].mxu0 }
 0x4d7   : > { %v2125_v43 = vadd.f32 %v2124_v39, %v2053_v21  ;;  %v2434_v38 = vpop.f32.mrb[17].mxu0 }
 0x4d9   : > { %v2397_v14 = vmul.f32 -1.442695, %v2125_v43 }
 0x4db   : > { %2663 = vpow2.f32 %v2397_v14 }
 0x4e5   : > { %v2664_v17 = vpop.eup %2663 }
 0x4e6   : > { %v2131_v51 = vadd.f32 1.0, %v2664_v17 }
 0x4e8   : > { %2665 = vrcp.f32 %v2131_v51 }
 0x4f2   : > { %v2666_v19 = vpop.eup %2665 }
 0x4f3   : > { %v2134_v54 = vmul.f32 %v2666_v19, %v2125_v43 }
 0x4f5   : > { %2438 = vmatmul.mubr.msk.f32.vlgmr.msra.gmra.mrb[18].mxu0 %vm2137_vm6, %v2134_v54 }
 0x5c8   : > { %v2207_v40 = vpop.f32.mrb[18].mxu0 }
 0x5c9   : > { %v2208_v53 = vadd.f32 %v2207_v40, %v2136_v20  ;;  %v2439_v9 = vpop.f32.mrb[19].mxu0 }
 0x5cb   : > { %v2399_v49 = vmul.f32 -1.442695, %v2208_v53 }
 0x5cd   : > { %2667 = vpow2.f32 %v2399_v49 }
 0x5d7   : > { %v2668_v35 = vpop.eup %2667 }
 0x5d8   : > { %v2214_v3 = vadd.f32 1.0, %v2668_v35 }
 0x5da   : > { %2669 = vrcp.f32 %v2214_v3 }
 0x5e4   : > { %v2670_v11 = vpop.eup %2669 }
 0x5e5   : > { %v2222_v56 = vrot.slane %v2670_v11, %v2221_v2 }
 0x5e7   : > { %v2223_v23 = vmul.f32 %v2222_v56, %v2217_v34  ;;  %v2224_v55 = vmul.f32 %v2222_v56, %v2218_v45 }
 0x5e9   : > { %v2225_v63 = vpack.c.bf16 %v2224_v55, %v2223_v23 }
 0x5eb   : > { %2400 = vmatmul.mubr.msk.bf16.vlgmr.msra.gmra.mrb[4].mxu1 %vm2054_vm15, %v2225_v63 }
 0x6be   : > { %v2275_v44 = vpop.f32.mrb[4].mxu1 }
 0x6bf   : > { %v2276_v25 = vadd.f32 %v2275_v44, %v2231_v10  ;;  %v2277_v18 = vpop.f32.mrb[5].mxu1 }
 0x6c0   : > { %v2278_v47 = vadd.f32 %v2277_v18, %v2231_v10  ;;  %v2279_v41 = vpop.f32.mrb[6].mxu1 }
 0x6c1   : > { %v2284_v32 = vadd.f32 %v2675_v59, %v2276_v25  ;;  %v2280_v33 = vadd.f32 %v2279_v41, %v2236_v6  ;;  %v2281_v50 = vpop.f32.mrb[7].mxu1 }
 0x6c2   : > { %v2285_v42 = vadd.f32 %v2676_v1, %v2278_v47  ;;  %v2282_v15 = vadd.f32 %v2281_v50, %v2236_v6 }
 0x6c3   : > { %2288 = vst [vmem:[%s386_s22] sm:$0xff] %v2284_v32  ;;  %v2286_v0 = vadd.f32 %v2677_v46, %v2280_v33 }
 0x6c4   : > { %2289 = vst [vmem:[%s386_s22 + $0x8] sm:$0xff] %v2285_v42  ;;  %v2287_v8 = vadd.f32 %v2678_v26, %v2282_v15 }
 0x6c5   : > { %2290 = vst [vmem:[%s386_s22 + $0x10] sm:$0xff] %v2286_v0 }
 0x6c6   : > { %2291 = vst [vmem:[%s386_s22 + $0x18] sm:$0xff] %v2287_v8 }
 0x6c7 PF: > { %s21_s17 = sadd.s32 1, %s2685_s17  }
 0x6c8   : > { %p18_p4 = scmp.ge.s32.totalorder %s21_s17, 4  }
 0x6ca   :  { %20 = sbr.rel (!%p18_p4) target bundleno = 1 (0x1), region = 94 }

</bundles_post_ra>
